<compile_context>
chip_gen: v5e
topology: v5e:2x2
jax: 0.10.0
libtpu: 0.0.40
codegen_flags: <defaults>
</compile_context>

<pallas_src>
import functools

import jax
import jax.numpy as jnp
from jax import lax
from jax.experimental import pallas as pl
from jax.experimental.pallas import tpu as pltpu

# Centre tap first so the residual (== x) is the first Cin columns of x_col.
_TAP_ORDER = ((1, 1), (0, 0), (0, 1), (0, 2), (1, 0),
              (1, 2), (2, 0), (2, 1), (2, 2))


# --------------------------------------------------------------------------
# Fused kernel: the whole batch in one step.
# --------------------------------------------------------------------------
def fused_resnet_kernel(xcol_ref, mask_ref, w1_ref, w2_ref, b1_ref, b2_ref,
                        wfc_ref, bfc_ref, o_ref, *, w_img, batch):
    """Shapes:
      xcol_ref : (N*H*W, 9*C)  im2col of x, taps in _TAP_ORDER (centre first)
      mask_ref : (N*H*W, 9*C)  1.0 where a tap lies inside its image, else 0.0
      w1_ref   : (9*C, C)      conv1 weights, rows column-stacked in _TAP_ORDER
      w2_ref   : (9*C, C)      conv2 weights, rows column-stacked in _TAP_ORDER
      b1_ref   : (1, C)
      b2_ref   : (1, C)
      wfc_ref  : (C, K)
      bfc_ref  : (1, K)
      o_ref    : (N, K)        logits
    """
    nhw, nine_c = xcol_ref.shape
    c = nine_c // 9
    hw = nhw // batch

    xcol = xcol_ref[...]

    # ---- conv1: single im2col matmul (K = 9*C) ----------------------------
    y = jnp.dot(xcol, w1_ref[...], preferred_element_type=jnp.float32)
    y = jnp.maximum(y + b1_ref[...], 0.0)                    # (N*H*W, C)

    # ---- build y_col (N*H*W, 9*C) via static flat row shifts --------------
    # Tap (kh, kw) of pixel (h, w) lives at flat row offset s = (kh-1)*W+(kw-1).
    # Zero fill covers the global array edges; the precomputed mask zeroes taps
    # that fall outside their own image (SAME padding + batch boundaries).
    def shift_rows(v, s):
        if s == 0:
            return v
        z = jnp.zeros((abs(s), v.shape[1]), v.dtype)
        if s > 0:
            return jnp.concatenate([v[s:, :], z], axis=0)
        return jnp.concatenate([z, v[: v.shape[0] + s, :]], axis=0)

    ycol = jnp.concatenate(
        [shift_rows(y, (kh - 1) * w_img + (kw - 1)) for kh, kw in _TAP_ORDER],
        axis=1)                                              # (N*H*W, 9*C)
    ycol = ycol * mask_ref[...]

    # ---- conv2 (single K = 9*C matmul) + bias + residual + relu -----------
    z = jnp.dot(ycol, w2_ref[...], preferred_element_type=jnp.float32)
    z = z + b2_ref[...]
    # residual == x == centre-tap columns of x_col (stride-1 identity skip).
    a = jnp.maximum(z + xcol[:, 0:c], 0.0)                   # (N*H*W, C)

    # ---- pool BEFORE the fc: (N, C) segment mean, then tiny matmul --------
    pooled = jnp.sum(a.reshape(batch, hw, c), axis=1) * (1.0 / float(hw))
    o_ref[...] = (jnp.dot(pooled, wfc_ref[...],
                          preferred_element_type=jnp.float32) + bfc_ref[...])


# --------------------------------------------------------------------------
# Wrapper (layout plumbing: NCHW->NHWC, im2col, tap masks, weight repacking)
# --------------------------------------------------------------------------
def _im2col_3x3(x_nhwc):
    n, h, w, c = x_nhwc.shape
    xp = jnp.pad(x_nhwc, ((0, 0), (1, 1), (1, 1), (0, 0)))
    cols = [xp[:, kh:kh + h, kw:kw + w, :].reshape(n * h * w, c)
            for kh, kw in _TAP_ORDER]
    return jnp.concatenate(cols, axis=1)                     # (N*H*W, 9*C)


def _tap_mask(n, h, w, c):
    """(N*H*W, 9*C) validity mask: 1 where tap (kh,kw) stays inside the image."""
    hh = jnp.arange(h)
    ww = jnp.arange(w)
    cols = []
    for kh, kw in _TAP_ORDER:
        vh = (hh + (kh - 1) >= 0) & (hh + (kh - 1) < h)      # (H,)
        vw = (ww + (kw - 1) >= 0) & (ww + (kw - 1) < w)      # (W,)
        m = (vh[:, None] & vw[None, :]).astype(jnp.float32)  # (H, W)
        m = jnp.tile(m.reshape(1, h * w), (n, 1)).reshape(n * h * w, 1)
        cols.append(jnp.broadcast_to(m, (n * h * w, c)))
    return jnp.concatenate(cols, axis=1)


def full_resnet_forward(x_nchw, params):
    """x_nchw: (N, C, H, W) float32 -> (N, num_classes) float32."""
    x = jnp.transpose(x_nchw, (0, 2, 3, 1)).astype(jnp.float32)  # NCHW->NHWC
    n, h, w, c = x.shape
    k = params["wfc"].shape[-1]
    nhw = n * h * w

    x_col = _im2col_3x3(x)                                       # (N*HW, 9C)
    mask = _tap_mask(n, h, w, c)                                 # (N*HW, 9C)
    w1_col = jnp.concatenate(
        [params["w1"][kh, kw] for kh, kw in _TAP_ORDER], axis=0)  # (9C, C)
    w2_col = jnp.concatenate(
        [params["w2"][kh, kw] for kh, kw in _TAP_ORDER], axis=0)  # (9C, C)
    b1 = params["b1"].reshape(1, c)
    b2 = params["b2"].reshape(1, c)
    bfc = params["bfc"].reshape(1, k)

    kernel = functools.partial(fused_resnet_kernel, w_img=w, batch=n)
    out = pl.pallas_call(
        kernel,
        out_shape=jax.ShapeDtypeStruct((n, k), jnp.float32),
        grid=(1,),
        in_specs=[
            pl.BlockSpec((nhw, 9 * c), lambda i: (0, 0)),    # x_col
            pl.BlockSpec((nhw, 9 * c), lambda i: (0, 0)),    # mask
            pl.BlockSpec((9 * c, c), lambda i: (0, 0)),      # w1_col
            pl.BlockSpec((9 * c, c), lambda i: (0, 0)),      # w2_col
            pl.BlockSpec((1, c), lambda i: (0, 0)),          # b1
            pl.BlockSpec((1, c), lambda i: (0, 0)),          # b2
            pl.BlockSpec((c, k), lambda i: (0, 0)),          # wfc
            pl.BlockSpec((1, k), lambda i: (0, 0)),          # bfc
        ],
        out_specs=pl.BlockSpec((n, k), lambda i: (0, 0)),
    )(x_col, mask, w1_col, w2_col, b1, b2, params["wfc"], bfc)
    return out


# --------------------------------------------------------------------------
# Pure-JAX reference (for correctness check)
# --------------------------------------------------------------------------
def ref_forward(x_nchw, params):
    x = jnp.transpose(x_nchw, (0, 2, 3, 1)).astype(jnp.float32)

    def conv(v, w, b):
        y = lax.conv_general_dilated(
            v, w, window_strides=(1, 1), padding="SAME",
            dimension_numbers=("NHWC", "HWIO", "NHWC"))
        return y + b.reshape(1, 1, 1, -1)

    y = jax.nn.relu(conv(x, params["w1"], params["b1"]))
    z = conv(y, params["w2"], params["b2"])
    a = jax.nn.relu(z + x)
    pooled = jnp.mean(a, axis=(1, 2))
    return pooled @ params["wfc"] + params["bfc"]


# --------------------------------------------------------------------------
if __name__ == "__main__":
    N, C, H, W = 2, 4, 16, 16
    NUM_CLASSES = 8

    key = jax.random.PRNGKey(0)
    k_x, k_w1, k_b1, k_w2, k_b2, k_wfc, k_bfc = jax.random.split(key, 7)

    x = jax.random.normal(k_x, (N, C, H, W), dtype=jnp.float32)
    params = {
        "w1": 0.1 * jax.random.normal(k_w1, (3, 3, C, C), dtype=jnp.float32),
        "b1": 0.1 * jax.random.normal(k_b1, (C,), dtype=jnp.float32),
        "w2": 0.1 * jax.random.normal(k_w2, (3, 3, C, C), dtype=jnp.float32),
        "b2": 0.1 * jax.random.normal(k_b2, (C,), dtype=jnp.float32),
        "wfc": 0.1 * jax.random.normal(k_wfc, (C, NUM_CLASSES), dtype=jnp.float32),
        "bfc": 0.1 * jax.random.normal(k_bfc, (NUM_CLASSES,), dtype=jnp.float32),
    }

    fwd = jax.jit(full_resnet_forward)
    out = jax.block_until_ready(fwd(x, params))
    ref = jax.block_until_ready(ref_forward(x, params))

    assert out.shape == (N, NUM_CLASSES)
    assert jnp.allclose(out, ref, rtol=1e-4, atol=1e-4), (
        f"mismatch: max abs err {jnp.max(jnp.abs(out - ref))}")
    print("KERNEL_OK")
</pallas_src>

<mosaic_0001>
module attributes {stable_mosaic.version = 11 : i64} {
  func.func @fused_resnet_kernel(%arg0: i32, %arg1: memref<512x36xf32, #tpu.memory_space<vmem>>, %arg2: memref<512x36xf32, #tpu.memory_space<vmem>>, %arg3: memref<36x4xf32, #tpu.memory_space<vmem>>, %arg4: memref<36x4xf32, #tpu.memory_space<vmem>>, %arg5: memref<1x4xf32, #tpu.memory_space<vmem>>, %arg6: memref<1x4xf32, #tpu.memory_space<vmem>>, %arg7: memref<4x8xf32, #tpu.memory_space<vmem>>, %arg8: memref<1x8xf32, #tpu.memory_space<vmem>>, %arg9: memref<2x8xf32, #tpu.memory_space<vmem>>) attributes {dimension_semantics = [#tpu.dimension_semantics<arbitrary>], iteration_bounds = array<i64: 1>, scalar_prefetch = 0 : i64, scratch_operands = 0 : i64, tpu.core_type = #tpu.core_type<tc>, window_params = [{pipeline_mode = #tpu.pipeline_mode<synchronous>, transform_indices = @transform_0, window_bounds = array<i64: 512, 36>}, {pipeline_mode = #tpu.pipeline_mode<synchronous>, transform_indices = @transform_1, window_bounds = array<i64: 512, 36>}, {pipeline_mode = #tpu.pipeline_mode<synchronous>, transform_indices = @transform_2, window_bounds = array<i64: 36, 4>}, {pipeline_mode = #tpu.pipeline_mode<synchronous>, transform_indices = @transform_3, window_bounds = array<i64: 36, 4>}, {pipeline_mode = #tpu.pipeline_mode<synchronous>, transform_indices = @transform_4, window_bounds = array<i64: 1, 4>}, {pipeline_mode = #tpu.pipeline_mode<synchronous>, transform_indices = @transform_5, window_bounds = array<i64: 1, 4>}, {pipeline_mode = #tpu.pipeline_mode<synchronous>, transform_indices = @transform_6, window_bounds = array<i64: 4, 8>}, {pipeline_mode = #tpu.pipeline_mode<synchronous>, transform_indices = @transform_7, window_bounds = array<i64: 1, 8>}, {pipeline_mode = #tpu.pipeline_mode<synchronous>, transform_indices = @transform_8, window_bounds = array<i64: 2, 8>}]} {
    %c0 = arith.constant 0 : index
    %c0_0 = arith.constant 0 : index
    %0 = vector.load %arg1[%c0, %c0_0] : memref<512x36xf32, #tpu.memory_space<vmem>>, vector<512x36xf32>
    %c0_1 = arith.constant 0 : index
    %c0_2 = arith.constant 0 : index
    %1 = vector.load %arg3[%c0_1, %c0_2] : memref<36x4xf32, #tpu.memory_space<vmem>>, vector<36x4xf32>
    %cst = arith.constant dense<0.000000e+00> : vector<512x4xf32>
    %2 = tpu.matmul %0, %1, %cst {dimension_numbers = #tpu.dot_dimension_numbers<[1], [0], [0], [1], [0, 0, 1, 1], [], []>} : vector<512x36xf32>, vector<36x4xf32>, vector<512x4xf32> -> vector<512x4xf32>
    %c0_3 = arith.constant 0 : index
    %c0_4 = arith.constant 0 : index
    %3 = vector.load %arg5[%c0_3, %c0_4] : memref<1x4xf32, #tpu.memory_space<vmem>>, vector<1x4xf32>
    %4 = vector.broadcast %3 : vector<1x4xf32> to vector<512x4xf32>
    %5 = arith.addf %2, %4 : vector<512x4xf32>
    %cst_5 = arith.constant 0.000000e+00 : f32
    %6 = vector.broadcast %cst_5 : f32 to vector<512x4xf32>
    %7 = arith.maximumf %5, %6 : vector<512x4xf32>
    %cst_6 = arith.constant 0.000000e+00 : f32
    %8 = vector.broadcast %cst_6 : f32 to vector<17x4xf32>
    %9 = vector.extract_strided_slice %7 {offsets = [0, 0], sizes = [495, 4], strides = [1, 1]} : vector<512x4xf32> to vector<495x4xf32>
    %10 = tpu.concatenate %8, %9 in 0 : vector<17x4xf32>, vector<495x4xf32> -> vector<512x4xf32>
    %cst_7 = arith.constant 0.000000e+00 : f32
    %11 = vector.broadcast %cst_7 : f32 to vector<16x4xf32>
    %12 = vector.extract_strided_slice %7 {offsets = [0, 0], sizes = [496, 4], strides = [1, 1]} : vector<512x4xf32> to vector<496x4xf32>
    %13 = tpu.concatenate %11, %12 in 0 : vector<16x4xf32>, vector<496x4xf32> -> vector<512x4xf32>
    %cst_8 = arith.constant 0.000000e+00 : f32
    %14 = vector.broadcast %cst_8 : f32 to vector<15x4xf32>
    %15 = vector.extract_strided_slice %7 {offsets = [0, 0], sizes = [497, 4], strides = [1, 1]} : vector<512x4xf32> to vector<497x4xf32>
    %16 = tpu.concatenate %14, %15 in 0 : vector<15x4xf32>, vector<497x4xf32> -> vector<512x4xf32>
    %cst_9 = arith.constant 0.000000e+00 : f32
    %17 = vector.broadcast %cst_9 : f32 to vector<1x4xf32>
    %18 = vector.extract_strided_slice %7 {offsets = [0, 0], sizes = [511, 4], strides = [1, 1]} : vector<512x4xf32> to vector<511x4xf32>
    %19 = tpu.concatenate %17, %18 in 0 : vector<1x4xf32>, vector<511x4xf32> -> vector<512x4xf32>
    %cst_10 = arith.constant 0.000000e+00 : f32
    %20 = vector.broadcast %cst_10 : f32 to vector<1x4xf32>
    %21 = vector.extract_strided_slice %7 {offsets = [1, 0], sizes = [511, 4], strides = [1, 1]} : vector<512x4xf32> to vector<511x4xf32>
    %22 = tpu.concatenate %21, %20 in 0 : vector<511x4xf32>, vector<1x4xf32> -> vector<512x4xf32>
    %cst_11 = arith.constant 0.000000e+00 : f32
    %23 = vector.broadcast %cst_11 : f32 to vector<15x4xf32>
    %24 = vector.extract_strided_slice %7 {offsets = [15, 0], sizes = [497, 4], strides = [1, 1]} : vector<512x4xf32> to vector<497x4xf32>
    %25 = tpu.concatenate %24, %23 in 0 : vector<497x4xf32>, vector<15x4xf32> -> vector<512x4xf32>
    %cst_12 = arith.constant 0.000000e+00 : f32
    %26 = vector.broadcast %cst_12 : f32 to vector<16x4xf32>
    %27 = vector.extract_strided_slice %7 {offsets = [16, 0], sizes = [496, 4], strides = [1, 1]} : vector<512x4xf32> to vector<496x4xf32>
    %28 = tpu.concatenate %27, %26 in 0 : vector<496x4xf32>, vector<16x4xf32> -> vector<512x4xf32>
    %cst_13 = arith.constant 0.000000e+00 : f32
    %29 = vector.broadcast %cst_13 : f32 to vector<17x4xf32>
    %30 = vector.extract_strided_slice %7 {offsets = [17, 0], sizes = [495, 4], strides = [1, 1]} : vector<512x4xf32> to vector<495x4xf32>
    %31 = tpu.concatenate %30, %29 in 0 : vector<495x4xf32>, vector<17x4xf32> -> vector<512x4xf32>
    %32 = tpu.concatenate %7, %10, %13, %16, %19, %22, %25, %28, %31 in 1 : vector<512x4xf32>, vector<512x4xf32>, vector<512x4xf32>, vector<512x4xf32>, vector<512x4xf32>, vector<512x4xf32>, vector<512x4xf32>, vector<512x4xf32>, vector<512x4xf32> -> vector<512x36xf32>
    %c0_14 = arith.constant 0 : index
    %c0_15 = arith.constant 0 : index
    %33 = vector.load %arg2[%c0_14, %c0_15] : memref<512x36xf32, #tpu.memory_space<vmem>>, vector<512x36xf32>
    %34 = arith.mulf %32, %33 : vector<512x36xf32>
    %c0_16 = arith.constant 0 : index
    %c0_17 = arith.constant 0 : index
    %35 = vector.load %arg4[%c0_16, %c0_17] : memref<36x4xf32, #tpu.memory_space<vmem>>, vector<36x4xf32>
    %cst_18 = arith.constant dense<0.000000e+00> : vector<512x4xf32>
    %36 = tpu.matmul %34, %35, %cst_18 {dimension_numbers = #tpu.dot_dimension_numbers<[1], [0], [0], [1], [0, 0, 1, 1], [], []>} : vector<512x36xf32>, vector<36x4xf32>, vector<512x4xf32> -> vector<512x4xf32>
    %c0_19 = arith.constant 0 : index
    %c0_20 = arith.constant 0 : index
    %37 = vector.load %arg6[%c0_19, %c0_20] : memref<1x4xf32, #tpu.memory_space<vmem>>, vector<1x4xf32>
    %38 = vector.broadcast %37 : vector<1x4xf32> to vector<512x4xf32>
    %39 = arith.addf %36, %38 : vector<512x4xf32>
    %40 = vector.extract_strided_slice %0 {offsets = [0, 0], sizes = [512, 4], strides = [1, 1]} : vector<512x36xf32> to vector<512x4xf32>
    %41 = arith.addf %39, %40 : vector<512x4xf32>
    %cst_21 = arith.constant 0.000000e+00 : f32
    %42 = vector.broadcast %cst_21 : f32 to vector<512x4xf32>
    %43 = arith.maximumf %41, %42 : vector<512x4xf32>
    %44 = vector.shape_cast %43 : vector<512x4xf32> to vector<2x256x4xf32>
    %cst_22 = arith.constant dense<0.000000e+00> : vector<2x4xf32>
    %45 = vector.multi_reduction <add>, %44, %cst_22 [1] : vector<2x256x4xf32> to vector<2x4xf32>
    %cst_23 = arith.constant 3.906250e-03 : f32
    %46 = vector.broadcast %cst_23 : f32 to vector<2x4xf32>
    %47 = arith.mulf %45, %46 : vector<2x4xf32>
    %c0_24 = arith.constant 0 : index
    %c0_25 = arith.constant 0 : index
    %48 = vector.load %arg7[%c0_24, %c0_25] : memref<4x8xf32, #tpu.memory_space<vmem>>, vector<4x8xf32>
    %cst_26 = arith.constant dense<0.000000e+00> : vector<2x8xf32>
    %49 = tpu.matmul %47, %48, %cst_26 {dimension_numbers = #tpu.dot_dimension_numbers<[1], [0], [0], [1], [0, 0, 1, 1], [], []>} : vector<2x4xf32>, vector<4x8xf32>, vector<2x8xf32> -> vector<2x8xf32>
    %c0_27 = arith.constant 0 : index
    %c0_28 = arith.constant 0 : index
    %50 = vector.load %arg8[%c0_27, %c0_28] : memref<1x8xf32, #tpu.memory_space<vmem>>, vector<1x8xf32>
    %51 = vector.broadcast %50 : vector<1x8xf32> to vector<2x8xf32>
    %52 = arith.addf %49, %51 : vector<2x8xf32>
    %c0_29 = arith.constant 0 : index
    %c0_30 = arith.constant 0 : index
    %53 = vector.load %arg9[%c0_29, %c0_30] : memref<2x8xf32, #tpu.memory_space<vmem>>, vector<2x8xf32>
    tpu.vector_store %arg9[%c0_29, %c0_30], %52 {strides = array<i32>} : memref<2x8xf32, #tpu.memory_space<vmem>>, vector<2x8xf32>,
    return
  }
  func.func @transform_0(%arg0: i32) -> (i32, i32) {
    %c0_i32 = arith.constant 0 : i32
    %c0_i32_0 = arith.constant 0 : i32
    %c0_i32_1 = arith.constant 0 : i32
    return %c0_i32, %c0_i32_0 : i32, i32
  }
  func.func @transform_1(%arg0: i32) -> (i32, i32) {
    %c0_i32 = arith.constant 0 : i32
    %c0_i32_0 = arith.constant 0 : i32
    %c0_i32_1 = arith.constant 0 : i32
    return %c0_i32, %c0_i32_0 : i32, i32
  }
  func.func @transform_2(%arg0: i32) -> (i32, i32) {
    %c0_i32 = arith.constant 0 : i32
    %c0_i32_0 = arith.constant 0 : i32
    %c0_i32_1 = arith.constant 0 : i32
    return %c0_i32, %c0_i32_0 : i32, i32
  }
  func.func @transform_3(%arg0: i32) -> (i32, i32) {
    %c0_i32 = arith.constant 0 : i32
    %c0_i32_0 = arith.constant 0 : i32
    %c0_i32_1 = arith.constant 0 : i32
    return %c0_i32, %c0_i32_0 : i32, i32
  }
  func.func @transform_4(%arg0: i32) -> (i32, i32) {
    %c0_i32 = arith.constant 0 : i32
    %c0_i32_0 = arith.constant 0 : i32
    %c0_i32_1 = arith.constant 0 : i32
    return %c0_i32, %c0_i32_0 : i32, i32
  }
  func.func @transform_5(%arg0: i32) -> (i32, i32) {
    %c0_i32 = arith.constant 0 : i32
    %c0_i32_0 = arith.constant 0 : i32
    %c0_i32_1 = arith.constant 0 : i32
    return %c0_i32, %c0_i32_0 : i32, i32
  }
  func.func @transform_6(%arg0: i32) -> (i32, i32) {
    %c0_i32 = arith.constant 0 : i32
    %c0_i32_0 = arith.constant 0 : i32
    %c0_i32_1 = arith.constant 0 : i32
    return %c0_i32, %c0_i32_0 : i32, i32
  }
  func.func @transform_7(%arg0: i32) -> (i32, i32) {
    %c0_i32 = arith.constant 0 : i32
    %c0_i32_0 = arith.constant 0 : i32
    %c0_i32_1 = arith.constant 0 : i32
    return %c0_i32, %c0_i32_0 : i32, i32
  }
  func.func @transform_8(%arg0: i32) -> (i32, i32) {
    %c0_i32 = arith.constant 0 : i32
    %c0_i32_0 = arith.constant 0 : i32
    %c0_i32_1 = arith.constant 0 : i32
    return %c0_i32, %c0_i32_0 : i32, i32
  }
}

</mosaic_0001>

<bundles_post_ra>
// kernel: tile.38
= control target key start
LH: loop header
LB: loop body
LE: loop exit
PB: predicated region body
PF: predicated region fallthrough
CT: control target
= control target key end

     0   :  { %s46_s0 = inlined_call_operand.vmem [shape: f32[256], index: 0, kind: input, shape index: {}]   ;;  %s47_s1 = inlined_call_operand.vmem [shape: f32[2,1,1,256], index: 1, kind: output, shape index: {}]  }
   0x1   :  { %v4_v0 = vld [vmem:[%s46_s0] ss:$0 sm:$0xff]  ;;  %v15_v1 = vld [vmem:[%s46_s0 + $0x1] ss:$0 sm:$0xff] }
   0x2   :  { %5 = vst [vmem:[%s47_s1] sm:$0x1] %v4_v0 }
   0x3   :  { %14 = vst [vmem:[%s47_s1 + $0x2] sm:$0x1] %v4_v0 }
   0x4   :  { %16 = vst [vmem:[%s47_s1 + $0x1] sm:$0x1] %v15_v1 }
   0x5   :  { %17 = vst [vmem:[%s47_s1 + $0x3] sm:$0x1] %v15_v1 }

// kernel: full_resnet_forward.1
= control target key start
LH: loop header
LB: loop body
LE: loop exit
PB: predicated region body
PF: predicated region fallthrough
CT: control target
= control target key end

     0   :  { %vm296_vm0 = vcmask 1043456   ;;  %v8385_v3 = vmov 0.0   ;;  %s4059_s11 = smov 4   ;;  %s8376_s0 = inlined_call_operand.vmem [shape: f32[512,36], index: 0, kind: input, shape index: {}]   ;;  %s8377_s1 = inlined_call_operand.vmem [shape: f32[512,36], index: 1, kind: input, shape index: {}]   ;;  %s8378_s2 = inlined_call_operand.vmem [shape: f32[36,4], index: 2, kind: input, shape index: {}]   ;;  %s8379_s3 = inlined_call_operand.vmem [shape: f32[36,4], index: 3, kind: input, shape index: {}]   ;;  %s8380_s4 = inlined_call_operand.vmem [shape: f32[1,4], index: 4, kind: input, shape index: {}]   ;;  %s8381_s5 = inlined_call_operand.vmem [shape: f32[1,4], index: 5, kind: input, shape index: {}]   ;;  %s8382_s6 = inlined_call_operand.vmem [shape: f32[4,8], index: 6, kind: input, shape index: {}]   ;;  %s8383_s7 = inlined_call_operand.vmem [shape: f32[1,8], index: 7, kind: input, shape index: {}]   ;;  %s8384_s8 = inlined_call_operand.hbm [shape: f32[2,8], index: 8, kind: output, shape index: {}]  }
   0x1   :  { %v98_v0 = vld [vmem:[%s8378_s2 + $0x20] sm:$0xf]  ;;  %v97_v1 = vld [vmem:[%s8378_s2 + $0x18] sm:$0xff]  ;;  %v96_v2 = vld [vmem:[%s8378_s2 + $0x10] sm:$0xff]  ;;  %903 = vrot.lane.b32.xlu0 %v8385_v3, %s4059_s11 }
   0x2   :  { %3811 = vmatpush.msk.msra.mxu0 %vm296_vm0, %v98_v0  ;;  %3943 = vmatpush.msk.msra.mxu3 %vm296_vm0, %v98_v0  ;;  %v95_v4 = vld [vmem:[%s8378_s2 + $0x8] sm:$0xff] }
   0x4   :  { %312 = vmatpush.msra.mxu0 %v97_v1  ;;  %3944 = vmatpush.msra.mxu3 %v97_v1 }
   0x6   :  { %313 = vmatpush.msra.mxu0 %v96_v2  ;;  %3945 = vmatpush.msra.mxu3 %v96_v2 }
   0x7   :  { %13 = vsyncpa [#allocation3], 0  ;;  %v94_v5 = vld [vmem:[%s8378_s2] sm:$0xff]  ;;  %vm103_vm1 = vcmask 293888   ;;  %s4060_s20 = smov 8   ;;  %v31_v8 = vld [vmem:[%s8376_s0 + $0x8] sm:$0xff] }
   0x8   :  { %314 = vmatpush.msra.mxu0 %v95_v4  ;;  %3946 = vmatpush.msra.mxu3 %v95_v4  ;;  %v30_v6 = vld [vmem:[%s8376_s0] sm:$0xff]  ;;  %v63_v9 = vld [vmem:[%s8376_s0 + $0x108] sm:$0xff]  ;;  %s4061_s24 = smov 12   ;;  %v32_v10 = vld [vmem:[%s8376_s0 + $0x10] sm:$0xff]  ;;  %vm635_vm2 = vcmask 1040384   ;;  %vm762_vm3 = vcmask 1046528  }
   0x9   :  { %v62_v7 = vld [vmem:[%s8376_s0 + $0x100] sm:$0xff]  ;;  %1092 = vrot.lane.b32.xlu0 %v8385_v3, %s4060_s20  ;;  %v64_v11 = vld [vmem:[%s8376_s0 + $0x110] sm:$0xff]  ;;  %v33_v12 = vld [vmem:[%s8376_s0 + $0x18] sm:$0xff]  ;;  %s4065_s28 = smov 24   ;;  %s4066_s29 = smov 32   ;;  %vm2430_vm4 = vcmask 31744  }
   0xa   :  { %315 = vmatpush.msra.mxu0 %v94_v5  ;;  %3947 = vmatpush.msra.mxu3 %v94_v5  ;;  %v65_v13 = vld [vmem:[%s8376_s0 + $0x118] sm:$0xff]  ;;  %v34_v14 = vld [vmem:[%s8376_s0 + $0x20] sm:$0xff]  ;;  %v35_v16 = vld [vmem:[%s8376_s0 + $0x28] sm:$0xff]  ;;  %vm2495_vm5 = vcmask 64512   ;;  %vm2560_vm6 = vcmask 97280   ;;  %vm2690_vm7 = vcmask 162816  }
   0xb   :  { %3812 = vmatmul.msk.f32.vlgmr.msra.gmra.mxu0 %vm103_vm1, %v30_v6  ;;  %3844 = vmatmul.msk.f32.vlgmr.msra.gmra.mxu3 %vm103_vm1, %v62_v7  ;;  %v66_v15 = vld [vmem:[%s8376_s0 + $0x120] sm:$0xff]  ;;  %v67_v17 = vld [vmem:[%s8376_s0 + $0x128] sm:$0xff]  ;;  %v36_v18 = vld [vmem:[%s8376_s0 + $0x30] sm:$0xff]  ;;  %vm2625_vm8 = vcmask 130048   ;;  %vm2755_vm9 = vcmask 195584   ;;  %vm2820_vm10 = vcmask 228352  }
   0xc   :  { %v68_v19 = vld [vmem:[%s8376_s0 + $0x130] sm:$0xff]  ;;  %v37_v20 = vld [vmem:[%s8376_s0 + $0x38] sm:$0xff]  ;;  %v38_v22 = vld [vmem:[%s8376_s0 + $0x40] sm:$0xff]  ;;  %vm2885_vm11 = vcmask 261120   ;;  %vm3766_vm12 = vcmask 1041409   ;;  %vm3793_vm13 = vcmask 58368  }
   0xd   :  { %v69_v21 = vld [vmem:[%s8376_s0 + $0x138] sm:$0xff]  ;;  %v70_v23 = vld [vmem:[%s8376_s0 + $0x140] sm:$0xff]  ;;  %v39_v24 = vld [vmem:[%s8376_s0 + $0x48] sm:$0xff] }
   0xe   :  { %v71_v25 = vld [vmem:[%s8376_s0 + $0x148] sm:$0xff]  ;;  %v40_v26 = vld [vmem:[%s8376_s0 + $0x50] sm:$0xff]  ;;  %v41_v27 = vld [vmem:[%s8376_s0 + $0x58] sm:$0xff] }
   0xf   :  { %v42_v28 = vld [vmem:[%s8376_s0 + $0x60] sm:$0xff]  ;;  %v72_v29 = vld [vmem:[%s8376_s0 + $0x150] sm:$0xff]  ;;  %v43_v30 = vld [vmem:[%s8376_s0 + $0x68] sm:$0xff] }
  0x10   :  { %v73_v31 = vld [vmem:[%s8376_s0 + $0x158] sm:$0xff]  ;;  %v44_v32 = vld [vmem:[%s8376_s0 + $0x70] sm:$0xff]  ;;  %v74_v33 = vld [vmem:[%s8376_s0 + $0x160] sm:$0xff] }
  0x11   :  { %1282 = vrot.lane.b32.xlu0 %v8385_v3, %s4061_s24  ;;  %v45_v34 = vld [vmem:[%s8376_s0 + $0x78] sm:$0xff]  ;;  %v4255_v35 = vld [vmem:[%s8380_s4] ss:$0 sm:$0xff]  ;;  %v47_v45 = vld [vmem:[%s8376_s0 + $0x88] sm:$0xff] }
  0x12   :  { %v46_v37 = vld [vmem:[%s8376_s0 + $0x80] sm:$0xff]  ;;  %v75_v48 = vld [vmem:[%s8376_s0 + $0x168] sm:$0xff]  ;;  %v48_v54 = vld [vmem:[%s8376_s0 + $0x90] sm:$0xff] }
  0x13   :  { %3813 = vmatmul.msk.f32.gmra.mxu0 %vm103_vm1, %v31_v8  ;;  %3845 = vmatmul.msk.f32.gmra.mxu3 %vm103_vm1, %v63_v9  ;;  %v76_v58 = vld [vmem:[%s8376_s0 + $0x170] sm:$0xff]  ;;  %v49_v1 = vld [vmem:[%s8376_s0 + $0x98] sm:$0xff] }
  0x1b   :  { %3814 = vmatmul.msk.f32.gmra.mxu0 %vm103_vm1, %v32_v10  ;;  %3846 = vmatmul.msk.f32.gmra.mxu3 %vm103_vm1, %v64_v11  ;;  %v77_v10 = vld [vmem:[%s8376_s0 + $0x178] sm:$0xff]  ;;  %v50_v11 = vld [vmem:[%s8376_s0 + $0xa0] sm:$0xff] }
  0x23   :  { %3815 = vmatmul.msk.f32.gmra.mxu0 %vm103_vm1, %v33_v12  ;;  %3847 = vmatmul.msk.f32.gmra.mxu3 %vm103_vm1, %v65_v13 }
  0x2b   :  { %3816 = vmatmul.msk.f32.gmra.mxu0 %vm103_vm1, %v34_v14  ;;  %3848 = vmatmul.msk.f32.gmra.mxu3 %vm103_vm1, %v66_v15 }
  0x33   :  { %3817 = vmatmul.msk.f32.gmra.mxu0 %vm103_vm1, %v35_v16  ;;  %3849 = vmatmul.msk.f32.gmra.mxu3 %vm103_vm1, %v67_v17 }
  0x3b   :  { %3818 = vmatmul.msk.f32.gmra.mxu0 %vm103_vm1, %v36_v18  ;;  %3850 = vmatmul.msk.f32.gmra.mxu3 %vm103_vm1, %v68_v19 }
  0x43   :  { %3819 = vmatmul.msk.f32.gmra.mxu0 %vm103_vm1, %v37_v20  ;;  %3851 = vmatmul.msk.f32.gmra.mxu3 %vm103_vm1, %v69_v21 }
  0x4b   :  { %3820 = vmatmul.msk.f32.gmra.mxu0 %vm103_vm1, %v38_v22  ;;  %3852 = vmatmul.msk.f32.gmra.mxu3 %vm103_vm1, %v70_v23  ;;  %v51_v22 = vld [vmem:[%s8376_s0 + $0xa8] sm:$0xff] }
  0x53   :  { %3821 = vmatmul.msk.f32.gmra.mxu0 %vm103_vm1, %v39_v24  ;;  %3853 = vmatmul.msk.f32.gmra.mxu3 %vm103_vm1, %v71_v25 }
  0x5b   :  { %3822 = vmatmul.msk.f32.gmra.mxu0 %vm103_vm1, %v40_v26  ;;  %3854 = vmatmul.msk.f32.gmra.mxu3 %vm103_vm1, %v72_v29 }
  0x63   :  { %3823 = vmatmul.msk.f32.gmra.mxu0 %vm103_vm1, %v41_v27  ;;  %3855 = vmatmul.msk.f32.gmra.mxu3 %vm103_vm1, %v73_v31 }
  0x6b   :  { %3824 = vmatmul.msk.f32.gmra.mxu0 %vm103_vm1, %v42_v28  ;;  %3856 = vmatmul.msk.f32.gmra.mxu3 %vm103_vm1, %v74_v33 }
  0x73   :  { %3825 = vmatmul.msk.f32.gmra.mxu0 %vm103_vm1, %v43_v30  ;;  %3857 = vmatmul.msk.f32.gmra.mxu3 %vm103_vm1, %v75_v48  ;;  %v78_v30 = vld [vmem:[%s8376_s0 + $0x180] sm:$0xff] }
  0x7b   :  { %3826 = vmatmul.msk.f32.gmra.mxu0 %vm103_vm1, %v44_v32  ;;  %3858 = vmatmul.msk.f32.gmra.mxu3 %vm103_vm1, %v76_v58  ;;  %v52_v32 = vld [vmem:[%s8376_s0 + $0xb0] sm:$0xff] }
  0x83   :  { %3827 = vmatmul.msk.f32.gmra.mxu0 %vm103_vm1, %v45_v34  ;;  %3859 = vmatmul.msk.f32.gmra.mxu3 %vm103_vm1, %v77_v10 }
  0x88   :  { %v317_v36 = vpop.f32.mrf.mxu0 }
  0x89   :  { %v318_v38 = vadd.f32 %v4255_v35, %v317_v36 }
  0x8b   :  { %v4261_v39 = vmax.f32 %v318_v38, 0.0  ;;  %3828 = vmatmul.msk.f32.gmra.mxu0 %vm103_vm1, %v46_v37  ;;  %3860 = vmatmul.msk.f32.gmra.mxu3 %vm103_vm1, %v78_v30  ;;  %v79_v37 = vld [vmem:[%s8376_s0 + $0x188] sm:$0xff]  ;;  %v53_v38 = vld [vmem:[%s8376_s0 + $0xb8] sm:$0xff] }
  0x8d   :  { %8728 = vst [vmem:[#allocation5_spill] sm:$0xff] %v4261_v39  ;;  %1094 = vrot.lane.b32.xlu1 %v4261_v39, %s4060_s20  ;;  %v636_v40 = vrot.slane %v4261_v39, 7  ;;  %v763_v46 = vrot.slane %v4261_v39, 1 }
  0x8e   :  { %v413_v41 = vpop.f32.mrf.mxu3 }
  0x8f   :  { %v4268_v42 = vsel %vm635_vm2, 0.0, %v636_v40  ;;  %v414_v44 = vadd.f32 %v4255_v35, %v413_v41  ;;  %v889_v51 = vsel %vm762_vm3, 0.0, %v763_v46 }
  0x90   :  { %v320_v43 = vpop.f32.mrf.mxu0  ;;  %905 = vrot.lane.b32.xlu0 %v4268_v42, %s4059_s11 }
  0x91   :  { %v321_v47 = vadd.f32 %v4255_v35, %v320_v43  ;;  %v4285_v50 = vmax.f32 %v414_v44, 0.0 }
  0x93   :  { %v4281_v49 = vmax.f32 %v321_v47, 0.0  ;;  %3829 = vmatmul.msk.f32.gmra.mxu0 %vm103_vm1, %v47_v45  ;;  %8730 = vst [vmem:[#allocation7_spill] sm:$0xff] %v4285_v50  ;;  %v8387_v15 = vrot.slane %v4285_v50, 7  ;;  %3861 = vmatmul.msk.f32.gmra.mxu3 %vm103_vm1, %v79_v37 }
  0x95   :  { %8729 = vst [vmem:[#allocation6_spill] sm:$0xff] %v4281_v49  ;;  %1096 = vrot.lane.b32.xlu2 %v4281_v49, %s4060_s20  ;;  %1284 = vrot.lane.b32.xlu1 %v889_v51, %s4061_s24  ;;  %v764_v55 = vrot.slane %v4281_v49, 1  ;;  %v637_v56 = vrot.slane %v4281_v49, 7  ;;  %v80_v51 = vld [vmem:[%s8376_s0 + $0x190] sm:$0xff] }
  0x96   :  { %v416_v52 = vpop.f32.mrf.mxu3 }
  0x97   :  { %v4304_v59 = vsel %vm762_vm3, %v763_v46, %v764_v55  ;;  %v4307_v60 = vsel %vm635_vm2, %v636_v40, %v637_v56  ;;  %v417_v63 = vadd.f32 %v4255_v35, %v416_v52  ;;  %v54_v52 = vld [vmem:[%s8376_s0 + $0xc0] sm:$0xff] }
  0x98   :  { %v323_v53 = vpop.f32.mrf.mxu0  ;;  %1158 = vrot.lane.b32.xlu0 %v4285_v50, %s4060_s20  ;;  %8731 = vst [vmem:[#allocation8_spill] sm:$0xff] %v4304_v59 }
  0x99   :  { %v324_v57 = vadd.f32 %v4255_v35, %v323_v53  ;;  %8732 = vst [vmem:[#allocation9_spill] sm:$0xff] %v4307_v60  ;;  %v4325_v4 = vmax.f32 %v417_v63, 0.0 }
  0x9b   :  { %3830 = vmatmul.msk.f32.gmra.mxu0 %vm103_vm1, %v48_v54  ;;  %v4314_v61 = vmax.f32 %v324_v57, 0.0  ;;  %8735 = vst [vmem:[#allocation12_spill] sm:$0xff] %v4325_v4  ;;  %v701_v13 = vrot.slane %v4325_v4, 7  ;;  %3862 = vmatmul.msk.f32.gmra.mxu3 %vm103_vm1, %v80_v51 }
  0x9d   :  { %1286 = vrot.lane.b32.xlu2 %v4304_v59, %s4061_s24  ;;  %907 = vrot.lane.b32.xlu1 %v4307_v60, %s4059_s11  ;;  %8733 = vst [vmem:[#allocation10_spill] sm:$0xff] %v4314_v61  ;;  %v766_v6 = vrot.slane %v4314_v61, 1  ;;  %v4361_v19 = vsel %vm635_vm2, %v8387_v15, %v701_v13  ;;  %v639_v23 = vrot.slane %v4314_v61, 7 }
  0x9e   :  { %v419_v62 = vpop.f32.mrf.mxu3  ;;  %8740 = vst [vmem:[#allocation17_spill] sm:$0xff] %v4361_v19 }
  0x9f   :  { %v420_v0 = vadd.f32 %v4255_v35, %v419_v62  ;;  %v4335_v9 = vsel %vm762_vm3, %v764_v55, %v766_v6  ;;  %v4380_v26 = vsel %vm635_vm2, %v637_v56, %v639_v23 }
  0xa0   :  { %1098 = vrot.lane.b32.xlu0 %v4314_v61, %s4060_s20  ;;  %v326_v5 = vpop.f32.mrf.mxu0  ;;  %8736 = vst [vmem:[#allocation13_spill] sm:$0xff] %v4335_v9 }
  0xa1   :  { %v4323_v2 = vmax.f32 %v420_v0, 0.0  ;;  %v327_v7 = vadd.f32 %v4255_v35, %v326_v5  ;;  %v55_v0 = vld [vmem:[%s8376_s0 + $0xc8] sm:$0xff] }
  0xa3   :  { %8734 = vst [vmem:[#allocation11_spill] sm:$0xff] %v4323_v2  ;;  %3831 = vmatmul.msk.f32.gmra.mxu0 %vm103_vm1, %v49_v1  ;;  %v703_v14 = vrot.slane %v4323_v2, 7  ;;  %v4350_v16 = vmax.f32 %v327_v7, 0.0 }
  0xa5   :  { %1162 = vrot.lane.b32.xlu2 %v4323_v2, %s4060_s20  ;;  %1160 = vrot.lane.b32.xlu1 %v4325_v4, %s4060_s20  ;;  %8737 = vst [vmem:[#allocation14_spill] sm:$0xff] %v4350_v16  ;;  %v4356_v18 = vsel %vm635_vm2, %v701_v13, %v703_v14  ;;  %v641_v21 = vrot.slane %v4350_v16, 7  ;;  %v768_v41 = vrot.slane %v4350_v16, 1  ;;  %v56_v13 = vld [vmem:[%s8376_s0 + $0xd0] sm:$0xff] }
  0xa6   :  { %v422_v8 = vpop.f32.mrf.mxu3  ;;  %8739 = vst [vmem:[#allocation16_spill] sm:$0xff] %v4356_v18 }
  0xa7   :  { %v423_v12 = vadd.f32 %v4255_v35, %v422_v8  ;;  %v4376_v25 = vsel %vm635_vm2, %v639_v23, %v641_v21  ;;  %v4426_v45 = vsel %vm762_vm3, %v766_v6, %v768_v41 }
  0xa8   :  { %1288 = vrot.lane.b32.xlu0 %v4335_v9, %s4061_s24  ;;  %v329_v20 = vpop.f32.mrf.mxu0  ;;  %8741 = vst [vmem:[#allocation18_spill] sm:$0xff] %v4376_v25 }
  0xa9   :  { %v4353_v17 = vmax.f32 %v423_v12, 0.0  ;;  %v330_v27 = vadd.f32 %v4255_v35, %v329_v20  ;;  %8746 = vst [vmem:[#allocation23_spill] sm:$0xff] %v4426_v45  ;;  %v81_v12 = vld [vmem:[%s8376_s0 + $0x198] sm:$0xff] }
  0xaa   :  { %3863 = vmatmul.msk.f32.gmra.mxu3 %vm103_vm1, %v81_v12 }
  0xab   :  { %3832 = vmatmul.msk.f32.gmra.mxu0 %vm103_vm1, %v50_v11  ;;  %8738 = vst [vmem:[#allocation15_spill] sm:$0xff] %v4353_v17  ;;  %v705_v24 = vrot.slane %v4353_v17, 7  ;;  %v4400_v33 = vmax.f32 %v330_v27, 0.0 }
  0xad   :  { %973 = vrot.lane.b32.xlu2 %v4356_v18, %s4059_s11  ;;  %971 = vrot.lane.b32.xlu1 %v4361_v19, %s4059_s11  ;;  %v4388_v28 = vsel %vm635_vm2, %v703_v14, %v705_v24  ;;  %8743 = vst [vmem:[#allocation20_spill] sm:$0xff] %v4400_v33  ;;  %v643_v40 = vrot.slane %v4400_v33, 7  ;;  %v770_v53 = vrot.slane %v4400_v33, 1 }
  0xae   :  { %8742 = vst [vmem:[#allocation19_spill] sm:$0xff] %v4388_v28  ;;  %v425_v36 = vpop.f32.mrf.mxu3 }
  0xaf   :  { %v4423_v44 = vsel %vm635_vm2, %v641_v21, %v643_v40  ;;  %v426_v48 = vadd.f32 %v4255_v35, %v425_v36  ;;  %v4451_v57 = vsel %vm762_vm3, %v768_v41, %v770_v53  ;;  %v4531_v41 = vpop.permute.xlu0 %903 }
  0xb0   :  { %1164 = vrot.lane.b32.xlu0 %v4353_v17, %s4060_s20  ;;  %v332_v29 = vpop.f32.mrf.mxu0  ;;  %8745 = vst [vmem:[#allocation22_spill] sm:$0xff] %v4423_v44 }
  0xb1   :  { %v333_v31 = vadd.f32 %v4255_v35, %v332_v29  ;;  %v4446_v55 = vmax.f32 %v426_v48, 0.0  ;;  %8747 = vst [vmem:[#allocation24_spill] sm:$0xff] %v4451_v57  ;;  %v82_v29 = vld [vmem:[%s8376_s0 + $0x1a0] sm:$0xff] }
  0xb2   :  { %3864 = vmatmul.msk.f32.gmra.mxu3 %vm103_vm1, %v82_v29  ;;  %8758 = vst [vmem:[#allocation35_spill] sm:$0xff] %v4531_v41 }
  0xb3   :  { %3833 = vmatmul.msk.f32.gmra.mxu0 %vm103_vm1, %v51_v22  ;;  %v4403_v34 = vmax.f32 %v333_v31, 0.0  ;;  %v707_v5 = vrot.slane %v4446_v55, 7  ;;  %v57_v31 = vld [vmem:[%s8376_s0 + $0xd8] sm:$0xff] }
  0xb5   :  { %911 = vrot.lane.b32.xlu2 %v4376_v25, %s4059_s11  ;;  %909 = vrot.lane.b32.xlu1 %v4380_v26, %s4059_s11  ;;  %8744 = vst [vmem:[#allocation21_spill] sm:$0xff] %v4403_v34  ;;  %v645_v43 = vrot.slane %v4403_v34, 7  ;;  %v772_v56 = vrot.slane %v4403_v34, 1  ;;  %v4474_v8 = vsel %vm635_vm2, %v705_v24, %v707_v5 }
  0xb6   :  { %v428_v46 = vpop.f32.mrf.mxu3  ;;  %8751 = vst [vmem:[#allocation28_spill] sm:$0xff] %v4474_v8 }
  0xb7   :  { %v4433_v47 = vsel %vm635_vm2, %v643_v40, %v645_v43  ;;  %v429_v62 = vadd.f32 %v4255_v35, %v428_v46  ;;  %v4459_v63 = vsel %vm762_vm3, %v770_v53, %v772_v56  ;;  %v83_v46 = vld [vmem:[%s8376_s0 + $0x1a8] sm:$0xff] }
  0xb8   :  { %975 = vrot.lane.b32.xlu0 %v4388_v28, %s4059_s11  ;;  %v335_v54 = vpop.f32.mrf.mxu0  ;;  %8748 = vst [vmem:[#allocation25_spill] sm:$0xff] %v4459_v63 }
  0xb9   :  { %v4468_v6 = vmax.f32 %v429_v62, 0.0  ;;  %v336_v11 = vadd.f32 %v4255_v35, %v335_v54 }
  0xba   :  { %3865 = vmatmul.msk.f32.gmra.mxu3 %vm103_vm1, %v83_v46 }
  0xbb   :  { %3834 = vmatmul.msk.f32.gmra.mxu0 %vm103_vm1, %v52_v32  ;;  %8749 = vst [vmem:[#allocation26_spill] sm:$0xff] %v4468_v6  ;;  %v709_v14 = vrot.slane %v4468_v6, 7  ;;  %v4492_v21 = vmax.f32 %v336_v11, 0.0 }
  0xbd   :  { %1102 = vrot.lane.b32.xlu2 %v4400_v33, %s4060_s20  ;;  %1100 = vrot.lane.b32.xlu1 %v4350_v16, %s4060_s20  ;;  %8752 = vst [vmem:[#allocation29_spill] sm:$0xff] %v4492_v21  ;;  %v4496_v22 = vsel %vm635_vm2, %v707_v5, %v709_v14  ;;  %v647_v32 = vrot.slane %v4492_v21, 7  ;;  %v774_v51 = vrot.slane %v4492_v21, 1  ;;  %v4564_v5 = vpop.permute.xlu0 %1092 }
  0xbe   :  { %v431_v58 = vpop.f32.mrf.mxu3  ;;  %8753 = vst [vmem:[#allocation30_spill] sm:$0xff] %v4496_v22 }
  0xbf   :  { %v432_v1 = vadd.f32 %v4255_v35, %v431_v58  ;;  %v4550_v54 = vsel %vm762_vm3, %v772_v56, %v774_v51  ;;  %8762 = vst [vmem:[#allocation39_spill] sm:$0xff] %v4564_v5  ;;  %v59_v56 = vld [vmem:[%s8376_s0 + $0xe8] sm:$0xff] }
  0xc0   :  { %1104 = vrot.lane.b32.xlu0 %v4403_v34, %s4060_s20  ;;  %v338_v10 = vpop.f32.mrf.mxu0  ;;  %8760 = vst [vmem:[#allocation37_spill] sm:$0xff] %v4550_v54 }
  0xc1   :  { %v4471_v7 = vmax.f32 %v432_v1, 0.0  ;;  %v339_v24 = vadd.f32 %v4255_v35, %v338_v10 }
  0xc3   :  { %3835 = vmatmul.msk.f32.gmra.mxu0 %vm103_vm1, %v53_v38  ;;  %8750 = vst [vmem:[#allocation27_spill] sm:$0xff] %v4471_v7  ;;  %v711_v20 = vrot.slane %v4471_v7, 7  ;;  %v4519_v36 = vmax.f32 %v339_v24, 0.0  ;;  %v4525_v38 = vsel %vm635_vm2, %v645_v43, %v647_v32  ;;  %v58_v43 = vld [vmem:[%s8376_s0 + $0xe0] sm:$0xff] }
  0xc4   :  { %8757 = vst [vmem:[#allocation34_spill] sm:$0xff] %v4525_v38 }
  0xc5   :  { %913 = vrot.lane.b32.xlu2 %v4423_v44, %s4059_s11  ;;  %1290 = vrot.lane.b32.xlu1 %v4426_v45, %s4061_s24  ;;  %v4505_v23 = vsel %vm635_vm2, %v709_v14, %v711_v20  ;;  %8755 = vst [vmem:[#allocation32_spill] sm:$0xff] %v4519_v36  ;;  %v649_v48 = vrot.slane %v4519_v36, 7  ;;  %v776_v10 = vrot.slane %v4519_v36, 1 }
  0xc6   :  { %8754 = vst [vmem:[#allocation31_spill] sm:$0xff] %v4505_v23  ;;  %v434_v40 = vpop.f32.mrf.mxu3 }
  0xc7   :  { %v4547_v53 = vsel %vm635_vm2, %v647_v32, %v649_v48  ;;  %v4577_v14 = vsel %vm762_vm3, %v774_v51, %v776_v10  ;;  %v60_v32 = vld [vmem:[%s8376_s0 + $0xf0] sm:$0xff] }
  0xc8   :  { %915 = vrot.lane.b32.xlu0 %v4433_v47, %s4059_s11  ;;  %v341_v27 = vpop.f32.mrf.mxu0  ;;  %8759 = vst [vmem:[#allocation36_spill] sm:$0xff] %v4547_v53 }
  0xc9   :  { %v342_v30 = vadd.f32 %v4255_v35, %v341_v27  ;;  %8763 = vst [vmem:[#allocation40_spill] sm:$0xff] %v4577_v14 }
  0xcb   :  { %3836 = vmatmul.msk.f32.gmra.mxu0 %vm103_vm1, %v54_v52  ;;  %v4522_v37 = vmax.f32 %v342_v30, 0.0 }
  0xcd   :  { %1292 = vrot.lane.b32.xlu2 %v4451_v57, %s4061_s24  ;;  %1166 = vrot.lane.b32.xlu1 %v4446_v55, %s4060_s20  ;;  %8756 = vst [vmem:[#allocation33_spill] sm:$0xff] %v4522_v37  ;;  %v8389_v52 = vrot.slane %v4522_v37, 7 }
  0xce   :  { %v437_v58 = vpop.f32.mrf.mxu3 }
  0xcf   :  { %v4559_v62 = vsel %vm635_vm2, %v649_v48, %v8389_v52  ;;  %v438_v27 = vadd.f32 %v4255_v35, %v437_v58 }
  0xd0   :  { %1294 = vrot.lane.b32.xlu0 %v4459_v63, %s4061_s24  ;;  %v344_v11 = vpop.f32.mrf.mxu0 }
  0xd1   :  { %v4604_v48 = vmax.f32 %v438_v27, 0.0  ;;  %v85_v27 = vld [vmem:[%s8376_s0 + $0x1b8] sm:$0xff] }
  0xd3   :  { %3837 = vmatmul.msk.f32.gmra.mxu0 %vm103_vm1, %v55_v0  ;;  %v435_v0 = vadd.f32 %v4255_v35, %v434_v40  ;;  %8767 = vst [vmem:[#allocation44_spill] sm:$0xff] %v4604_v48 }
  0xd5   :  { %1168 = vrot.lane.b32.xlu2 %v4468_v6, %s4060_s20  ;;  %977 = vrot.lane.b32.xlu1 %v4474_v8, %s4059_s11  ;;  %v4572_v12 = vmax.f32 %v435_v0, 0.0 }
  0xd6   :  { %v440_v24 = vpop.f32.mrf.mxu3 }
  0xd7   :  { %v441_v40 = vadd.f32 %v4255_v35, %v440_v24  ;;  %v713_v46 = vrot.slane %v4572_v12, 7 }
  0xd8   :  { %1170 = vrot.lane.b32.xlu0 %v4471_v7, %s4060_s20  ;;  %v347_v51 = vpop.f32.mrf.mxu0 }
  0xd9   :  { %v4607_v58 = vmax.f32 %v441_v40, 0.0  ;;  %v4612_v0 = vsel %vm635_vm2, %v711_v20, %v713_v46  ;;  %v61_v20 = vld [vmem:[%s8376_s0 + $0xf8] sm:$0xff] }
  0xda   :  { %8769 = vst [vmem:[#allocation46_spill] sm:$0xff] %v4612_v0 }
  0xdb   :  { %3838 = vmatmul.msk.f32.gmra.mxu0 %vm103_vm1, %v56_v13  ;;  %v8388_v13 = vrot.slane %v4522_v37, 1  ;;  %8768 = vst [vmem:[#allocation45_spill] sm:$0xff] %v4607_v58 }
  0xdd   :  { %979 = vrot.lane.b32.xlu2 %v4496_v22, %s4059_s11  ;;  %1106 = vrot.lane.b32.xlu1 %v4492_v21, %s4060_s20  ;;  %v4589_v30 = vsel %vm762_vm3, %v776_v10, %v8388_v13 }
  0xde   :  { %8765 = vst [vmem:[#allocation42_spill] sm:$0xff] %v4589_v30 }
  0xe0   :  { %981 = vrot.lane.b32.xlu0 %v4505_v23, %s4059_s11  ;;  %v350_v15 = vpop.f32.mrf.mxu0 }
  0xe1   :  { %v351_v52 = vadd.f32 %v4255_v35, %v350_v15  ;;  %v443_v15 = vpop.f32.mrf.mxu3 }
  0xe3   :  { %3839 = vmatmul.msk.f32.gmra.mxu0 %vm103_vm1, %v57_v31  ;;  %v84_v31 = vld [vmem:[%s8376_s0 + $0x1b0] sm:$0xff] }
  0xe4   :  { %3866 = vmatmul.msk.f32.gmra.mxu3 %vm103_vm1, %v84_v31  ;;  %v715_v31 = vrot.slane %v4604_v48, 7 }
  0xe5   :  { %1108 = vrot.lane.b32.xlu2 %v4519_v36, %s4060_s20  ;;  %917 = vrot.lane.b32.xlu1 %v4525_v38, %s4059_s11 }
  0xe6   :  { %v4640_v3 = vsel %vm635_vm2, %v713_v46, %v715_v31  ;;  %v86_v46 = vld [vmem:[%s8376_s0 + $0x1c0] sm:$0xff] }
  0xe7   :  { %8774 = vst [vmem:[#allocation51_spill] sm:$0xff] %v4640_v3 }
  0xe8   :  { %1110 = vrot.lane.b32.xlu0 %v4522_v37, %s4060_s20  ;;  %v353_v5 = vpop.f32.mrf.mxu0 }
  0xeb   :  { %3840 = vmatmul.msk.f32.gmra.mxu0 %vm103_vm1, %v58_v43  ;;  %v4602_v43 = vpop.permute.xlu0 %1282 }
  0xec   :  { %8766 = vst [vmem:[#allocation43_spill] sm:$0xff] %v4602_v43  ;;  %3867 = vmatmul.msk.f32.gmra.mxu3 %vm103_vm1, %v85_v27 }
  0xed   :  { %919 = vrot.lane.b32.xlu2 %v4547_v53, %s4059_s11  ;;  %1296 = vrot.lane.b32.xlu1 %v4550_v54, %s4061_s24 }
  0xef   :  { %v4562_v1 = vpop.permute.xlu2 %1096 }
  0xf0   :  { %8761 = vst [vmem:[#allocation38_spill] sm:$0xff] %v4562_v1  ;;  %921 = vrot.lane.b32.xlu0 %v4559_v62, %s4059_s11 }
  0xf3   :  { %3841 = vmatmul.msk.f32.gmra.mxu0 %vm103_vm1, %v59_v56  ;;  %v345_v56 = vadd.f32 %v4255_v35, %v344_v11  ;;  %v8390_v11 = vrot.slane %v4607_v58, 7 }
  0xf4   :  { %3868 = vmatmul.msk.f32.gmra.mxu3 %vm103_vm1, %v86_v46 }
  0xf5   :  { %1298 = vrot.lane.b32.xlu2 %v4577_v14, %s4061_s24  ;;  %1172 = vrot.lane.b32.xlu1 %v4572_v12, %s4060_s20  ;;  %v4636_v40 = vmax.f32 %v345_v56, 0.0  ;;  %v4649_v27 = vsel %vm635_vm2, %v715_v31, %v8390_v11  ;;  %v348_v56 = vadd.f32 %v4255_v35, %v347_v51  ;;  %v4668_v11 = vmax.f32 %v351_v52, 0.0 }
  0xf6   :  { %8775 = vst [vmem:[#allocation52_spill] sm:$0xff] %v4649_v27 }
  0xf7   :  { %v4584_v29 = vpop.permute.xlu2 %1286  ;;  %8773 = vst [vmem:[#allocation50_spill] sm:$0xff] %v4636_v40  ;;  %v4666_v51 = vmax.f32 %v348_v56, 0.0  ;;  %v780_v56 = vrot.slane %v4636_v40, 1 }
  0xf8   :  { %8764 = vst [vmem:[#allocation41_spill] sm:$0xff] %v4584_v29  ;;  %1300 = vrot.lane.b32.xlu0 %v4589_v30, %s4061_s24 }
  0xf9   :  { %8779 = vst [vmem:[#allocation56_spill] sm:$0xff] %v4666_v51  ;;  %v655_v52 = vrot.slane %v4666_v51, 7  ;;  %v782_v43 = vrot.slane %v4666_v51, 1 }
  0xfa   :  { %8780 = vst [vmem:[#allocation57_spill] sm:$0xff] %v4668_v11 }
  0xfb   :  { %3842 = vmatmul.msk.f32.gmra.mxu0 %vm103_vm1, %v60_v32 }
  0xfd   :  { %1174 = vrot.lane.b32.xlu2 %v4604_v48, %s4060_s20  ;;  %983 = vrot.lane.b32.xlu1 %v4612_v0, %s4059_s11 }
  0xff   :  { %v4619_v10 = vpop.permute.xlu1 %1094  ;;  %v4621_v24 = vpop.permute.xlu2 %1162 }
 0x100   :  { %8770 = vst [vmem:[#allocation47_spill] sm:$0xff] %v4619_v10  ;;  %1176 = vrot.lane.b32.xlu0 %v4607_v58, %s4060_s20 }
 0x101   :  { %8771 = vst [vmem:[#allocation48_spill] sm:$0xff] %v4621_v24  ;;  %v653_v24 = vrot.slane %v4636_v40, 7 }
 0x102   :  { %v4634_v32 = vpop.permute.xlu0 %905 }
 0x103   :  { %8772 = vst [vmem:[#allocation49_spill] sm:$0xff] %v4634_v32  ;;  %3843 = vmatmul.msk.f32.gmra.mxu0 %vm103_vm1, %v61_v20  ;;  %v4691_v10 = vsel %vm635_vm2, %v653_v24, %v655_v52  ;;  %v8787_v32 = vrot.slane %v4522_v37, 1 }
 0x104   :  { %8786 = vst [vmem:[#allocation62_spill] sm:$0xff] %v4691_v10 }
 0x105   :  { %985 = vrot.lane.b32.xlu2 %v4640_v3, %s4059_s11  ;;  %1112 = vrot.lane.b32.xlu1 %v4636_v40, %s4060_s20  ;;  %v8801_v40 = vrot.slane %v4607_v58, 7 }
 0x107   :  { %v4652_v13 = vpop.permute.xlu1 %1284  ;;  %v4654_v20 = vpop.permute.xlu2 %973 }
 0x108   :  { %8776 = vst [vmem:[#allocation53_spill] sm:$0xff] %v4652_v13  ;;  %987 = vrot.lane.b32.xlu0 %v4649_v27, %s4059_s11 }
 0x109   :  { %8777 = vst [vmem:[#allocation54_spill] sm:$0xff] %v4654_v20  ;;  %v8781_v20 = vrot.slane %v4522_v37, 7 }
 0x10a   :  { %v4664_v31 = vpop.permute.xlu0 %1158 }
 0x10b   :  { %8778 = vst [vmem:[#allocation55_spill] sm:$0xff] %v4664_v31  ;;  %v4673_v1 = vsel %vm635_vm2, %v8781_v20, %v653_v24  ;;  %v8393_v20 = vrot.slane %v4668_v11, 7  ;;  %v444_v24 = vadd.f32 %v4255_v35, %v443_v15  ;;  %v784_v15 = vrot.slane %v4668_v11, 1 }
 0x10c   :  { %8782 = vst [vmem:[#allocation58_spill] sm:$0xff] %v4673_v1 }
 0x10d   :  { %1114 = vrot.lane.b32.xlu2 %v4666_v51, %s4060_s20  ;;  %923 = vrot.lane.b32.xlu1 %v4673_v1, %s4059_s11  ;;  %v4705_v13 = vsel %vm635_vm2, %v655_v52, %v8393_v20  ;;  %v4721_v20 = vmax.f32 %v444_v24, 0.0  ;;  %v4737_v24 = vsel %vm762_vm3, %v782_v43, %v784_v15 }
 0x10e   :  { %8789 = vst [vmem:[#allocation64_spill] sm:$0xff] %v4705_v13 }
 0x10f   :  { %v4679_v29 = vpop.permute.xlu2 %911  ;;  %v4681_v46 = vpop.permute.xlu1 %907  ;;  %8793 = vst [vmem:[#allocation68_spill] sm:$0xff] %v4721_v20  ;;  %v719_v51 = vrot.slane %v4721_v20, 7 }
 0x110   :  { %8783 = vst [vmem:[#allocation59_spill] sm:$0xff] %v4679_v29  ;;  %1116 = vrot.lane.b32.xlu0 %v4668_v11, %s4060_s20  ;;  %v4696_v29 = vsel %vm762_vm3, %v8787_v32, %v780_v56  ;;  %v87_v32 = vld [vmem:[%s8376_s0 + $0x1c8] sm:$0xff] }
 0x111   :  { %8784 = vst [vmem:[#allocation60_spill] sm:$0xff] %v4681_v46  ;;  %v446_v46 = vpop.f32.mrf.mxu3  ;;  %3869 = vmatmul.msk.f32.gmra.mxu3 %vm103_vm1, %v87_v32  ;;  %v4756_v37 = vsel %vm635_vm2, %v8801_v40, %v719_v51 }
 0x112   :  { %v4688_v31 = vpop.permute.xlu0 %1098  ;;  %8788 = vst [vmem:[#allocation63_spill] sm:$0xff] %v4696_v29  ;;  %v447_v39 = vadd.f32 %v4255_v35, %v446_v46 }
 0x113   :  { %8785 = vst [vmem:[#allocation61_spill] sm:$0xff] %v4688_v31 }
 0x114   :  { %8797 = vst [vmem:[#allocation72_spill] sm:$0xff] %v4737_v24 }
 0x115   :  { %925 = vrot.lane.b32.xlu2 %v4691_v10, %s4059_s11  ;;  %1302 = vrot.lane.b32.xlu1 %v4696_v29, %s4061_s24  ;;  %8802 = vst [vmem:[#allocation76_spill] sm:$0xff] %v4756_v37 }
 0x117   :  { %v4708_v31 = vpop.permute.xlu2 %1102  ;;  %v4710_v49 = vpop.permute.xlu1 %1160 }
 0x118   :  { %8790 = vst [vmem:[#allocation65_spill] sm:$0xff] %v4708_v31  ;;  %927 = vrot.lane.b32.xlu0 %v4705_v13, %s4059_s11 }
 0x119   :  { %8791 = vst [vmem:[#allocation66_spill] sm:$0xff] %v4710_v49  ;;  %v4725_v49 = vsel %vm762_vm3, %v780_v56, %v782_v43  ;;  %v449_v31 = vpop.f32.mrf.mxu3  ;;  %v88_v56 = vld [vmem:[%s8376_s0 + $0x1d0] sm:$0xff] }
 0x11a   :  { %v4719_v52 = vpop.permute.xlu0 %1288  ;;  %8794 = vst [vmem:[#allocation69_spill] sm:$0xff] %v4725_v49  ;;  %3870 = vmatmul.msk.f32.gmra.mxu3 %vm103_vm1, %v88_v56 }
 0x11b   :  { %8792 = vst [vmem:[#allocation67_spill] sm:$0xff] %v4719_v52  ;;  %v450_v52 = vadd.f32 %v4255_v35, %v449_v31  ;;  %v354_v31 = vadd.f32 %v4255_v35, %v353_v5 }
 0x11d   :  { %1304 = vrot.lane.b32.xlu2 %v4725_v49, %s4061_s24  ;;  %1178 = vrot.lane.b32.xlu1 %v4721_v20, %s4060_s20  ;;  %v4751_v43 = vmax.f32 %v450_v52, 0.0  ;;  %v89_v52 = vld [vmem:[%s8376_s0 + $0x1d8] sm:$0xff]  ;;  %v4777_v5 = vmax.f32 %v354_v31, 0.0 }
 0x11f   :  { %v4732_v32 = vpop.permute.xlu2 %913  ;;  %v4734_v41 = vpop.permute.xlu1 %971  ;;  %8800 = vst [vmem:[#allocation75_spill] sm:$0xff] %v4751_v43  ;;  %v659_v34 = vrot.slane %v4777_v5, 7 }
 0x120   :  { %8795 = vst [vmem:[#allocation70_spill] sm:$0xff] %v4732_v32  ;;  %1306 = vrot.lane.b32.xlu0 %v4737_v24, %s4061_s24  ;;  %v4749_v32 = vmax.f32 %v447_v39, 0.0 }
 0x121   :  { %8796 = vst [vmem:[#allocation71_spill] sm:$0xff] %v4734_v41  ;;  %v356_v41 = vpop.f32.mrf.mxu0 }
 0x122   :  { %v4747_v46 = vpop.permute.xlu0 %1164  ;;  %8799 = vst [vmem:[#allocation74_spill] sm:$0xff] %v4749_v32  ;;  %v721_v40 = vrot.slane %v4749_v32, 7  ;;  %3871 = vmatmul.msk.f32.gmra.mxu3 %vm103_vm1, %v89_v52  ;;  %v357_v21 = vadd.f32 %v4255_v35, %v356_v41 }
 0x123   :  { %8798 = vst [vmem:[#allocation73_spill] sm:$0xff] %v4747_v46  ;;  %v8412_v46 = vrot.slane %v4751_v43, 7 }
 0x124   :  { %8806 = vst [vmem:[#allocation80_spill] sm:$0xff] %v4777_v5  ;;  %v4802_v16 = vmax.f32 %v357_v21, 0.0 }
 0x125   :  { %1180 = vrot.lane.b32.xlu2 %v4749_v32, %s4060_s20  ;;  %989 = vrot.lane.b32.xlu1 %v4756_v37, %s4059_s11 }
 0x126   :  { %8812 = vst [vmem:[#allocation86_spill] sm:$0xff] %v4802_v16  ;;  %v661_v21 = vrot.slane %v4802_v16, 7 }
 0x127   :  { %v4763_v56 = vpop.permute.xlu2 %1292  ;;  %v4765_v39 = vpop.permute.xlu1 %909 }
 0x128   :  { %8803 = vst [vmem:[#allocation77_spill] sm:$0xff] %v4763_v56  ;;  %1182 = vrot.lane.b32.xlu0 %v4751_v43, %s4060_s20  ;;  %v4780_v56 = vsel %vm635_vm2, %v719_v51, %v721_v40 }
 0x129   :  { %8804 = vst [vmem:[#allocation78_spill] sm:$0xff] %v4765_v39  ;;  %v4789_v39 = vsel %vm635_vm2, %v721_v40, %v8412_v46  ;;  %v359_v52 = vpop.f32.mrf.mxu0  ;;  %v8814_v46 = vrot.slane %v4668_v11, 7  ;;  %v90_v11 = vld [vmem:[%s8376_s0 + $0x1e0] sm:$0xff] }
 0x12a   :  { %v4775_v36 = vpop.permute.xlu0 %975  ;;  %8807 = vst [vmem:[#allocation81_spill] sm:$0xff] %v4780_v56  ;;  %v360_v51 = vadd.f32 %v4255_v35, %v359_v52  ;;  %v452_v52 = vpop.f32.mrf.mxu3  ;;  %3872 = vmatmul.msk.f32.gmra.mxu3 %vm103_vm1, %v90_v11 }
 0x12b   :  { %8805 = vst [vmem:[#allocation79_spill] sm:$0xff] %v4775_v36  ;;  %v4809_v41 = vsel %vm635_vm2, %v8814_v46, %v659_v34  ;;  %v453_v11 = vadd.f32 %v4255_v35, %v452_v52 }
 0x12c   :  { %8808 = vst [vmem:[#allocation82_spill] sm:$0xff] %v4789_v39  ;;  %v4804_v40 = vmax.f32 %v360_v51, 0.0  ;;  %v786_v51 = vrot.slane %v4777_v5, 1 }
 0x12d   :  { %991 = vrot.lane.b32.xlu2 %v4780_v56, %s4059_s11  ;;  %1118 = vrot.lane.b32.xlu1 %v4777_v5, %s4060_s20  ;;  %8815 = vst [vmem:[#allocation88_spill] sm:$0xff] %v4809_v41 }
 0x12e   :  { %8813 = vst [vmem:[#allocation87_spill] sm:$0xff] %v4804_v40  ;;  %v790_v14 = vrot.slane %v4804_v40, 1 }
 0x12f   :  { %v4792_v36 = vpop.permute.xlu2 %1168  ;;  %v4794_v31 = vpop.permute.xlu1 %1100 }
 0x130   :  { %8809 = vst [vmem:[#allocation83_spill] sm:$0xff] %v4792_v36  ;;  %993 = vrot.lane.b32.xlu0 %v4789_v39, %s4059_s11 }
 0x131   :  { %8810 = vst [vmem:[#allocation84_spill] sm:$0xff] %v4794_v31  ;;  %v362_v49 = vpop.f32.mrf.mxu0 }
 0x132   :  { %v4800_v33 = vpop.permute.xlu0 %1104  ;;  %v455_v46 = vpop.f32.mrf.mxu3 }
 0x133   :  { %8811 = vst [vmem:[#allocation85_spill] sm:$0xff] %v4800_v33 }
 0x135   :  { %1120 = vrot.lane.b32.xlu2 %v4802_v16, %s4060_s20  ;;  %929 = vrot.lane.b32.xlu1 %v4809_v41, %s4059_s11 }
 0x137   :  { %v4815_v36 = vpop.permute.xlu2 %979  ;;  %v4817_v31 = vpop.permute.xlu1 %1290 }
 0x138   :  { %8816 = vst [vmem:[#allocation89_spill] sm:$0xff] %v4815_v36  ;;  %1122 = vrot.lane.b32.xlu0 %v4804_v40, %s4060_s20  ;;  %v4831_v36 = vsel %vm635_vm2, %v659_v34, %v661_v21 }
 0x139   :  { %8817 = vst [vmem:[#allocation90_spill] sm:$0xff] %v4817_v31  ;;  %v4834_v31 = vsel %vm762_vm3, %v784_v15, %v786_v51  ;;  %v788_v15 = vrot.slane %v4802_v16, 1  ;;  %v365_v54 = vpop.f32.mrf.mxu0 }
 0x13a   :  { %v4824_v33 = vpop.permute.xlu0 %915  ;;  %8819 = vst [vmem:[#allocation92_spill] sm:$0xff] %v4831_v36 }
 0x13b   :  { %8818 = vst [vmem:[#allocation91_spill] sm:$0xff] %v4824_v33  ;;  %v8821_v33 = vrot.slane %v4804_v40, 7  ;;  %v4862_v52 = vsel %vm762_vm3, %v786_v51, %v788_v15 }
 0x13c   :  { %8820 = vst [vmem:[#allocation93_spill] sm:$0xff] %v4834_v31 }
 0x13d   :  { %931 = vrot.lane.b32.xlu2 %v4831_v36, %s4059_s11  ;;  %1308 = vrot.lane.b32.xlu1 %v4834_v31, %s4061_s24  ;;  %v4843_v5 = vsel %vm635_vm2, %v661_v21, %v8821_v33  ;;  %v4855_v31 = vmax.f32 %v453_v11, 0.0  ;;  %v91_v33 = vld [vmem:[%s8376_s0 + $0x1e8] sm:$0xff]  ;;  %8827 = vst [vmem:[#allocation99_spill] sm:$0xff] %v4862_v52  ;;  %v458_v21 = vpop.f32.mrf.mxu3  ;;  %v456_v11 = vadd.f32 %v4255_v35, %v455_v46 }
 0x13e   :  { %8822 = vst [vmem:[#allocation94_spill] sm:$0xff] %v4843_v5  ;;  %3873 = vmatmul.msk.f32.gmra.mxu3 %vm103_vm1, %v91_v33  ;;  %v459_v51 = vadd.f32 %v4255_v35, %v458_v21 }
 0x13f   :  { %v4846_v61 = vpop.permute.xlu2 %1108  ;;  %v4848_v34 = vpop.permute.xlu1 %1166  ;;  %8826 = vst [vmem:[#allocation98_spill] sm:$0xff] %v4855_v31  ;;  %v725_v33 = vrot.slane %v4855_v31, 7 }
 0x140   :  { %8823 = vst [vmem:[#allocation95_spill] sm:$0xff] %v4846_v61  ;;  %933 = vrot.lane.b32.xlu0 %v4843_v5, %s4059_s11  ;;  %v4885_v46 = vmax.f32 %v459_v51, 0.0 }
 0x141   :  { %8824 = vst [vmem:[#allocation96_spill] sm:$0xff] %v4848_v34 }
 0x142   :  { %v4853_v29 = vpop.permute.xlu0 %1294  ;;  %8833 = vst [vmem:[#allocation105_spill] sm:$0xff] %v4885_v46 }
 0x143   :  { %8825 = vst [vmem:[#allocation97_spill] sm:$0xff] %v4853_v29  ;;  %v4875_v29 = vsel %vm762_vm3, %v788_v15, %v790_v14  ;;  %v363_v15 = vadd.f32 %v4255_v35, %v362_v49 }
 0x144   :  { %8830 = vst [vmem:[#allocation102_spill] sm:$0xff] %v4875_v29 }
 0x145   :  { %1310 = vrot.lane.b32.xlu2 %v4862_v52, %s4061_s24  ;;  %1184 = vrot.lane.b32.xlu1 %v4855_v31, %s4060_s20  ;;  %v4883_v52 = vmax.f32 %v456_v11, 0.0  ;;  %v4907_v57 = vmax.f32 %v363_v15, 0.0 }
 0x147   :  { %v4870_v34 = vpop.permute.xlu2 %919  ;;  %v4872_v61 = vpop.permute.xlu1 %977  ;;  %8832 = vst [vmem:[#allocation104_spill] sm:$0xff] %v4883_v52  ;;  %v727_v51 = vrot.slane %v4883_v52, 7 }
 0x148   :  { %8828 = vst [vmem:[#allocation100_spill] sm:$0xff] %v4870_v34  ;;  %1312 = vrot.lane.b32.xlu0 %v4875_v29, %s4061_s24  ;;  %v8834_v34 = vrot.slane %v4751_v43, 7 }
 0x149   :  { %8829 = vst [vmem:[#allocation101_spill] sm:$0xff] %v4872_v61  ;;  %v4910_v24 = vsel %vm635_vm2, %v725_v33, %v727_v51 }
 0x14a   :  { %v4881_v16 = vpop.permute.xlu0 %1170  ;;  %v4890_v61 = vsel %vm635_vm2, %v8834_v34, %v725_v33  ;;  %v729_v34 = vrot.slane %v4885_v46, 7  ;;  %8839 = vst [vmem:[#allocation110_spill] sm:$0xff] %v4907_v57  ;;  %v665_v33 = vrot.slane %v4907_v57, 7 }
 0x14b   :  { %8831 = vst [vmem:[#allocation103_spill] sm:$0xff] %v4881_v16  ;;  %v461_v16 = vpop.f32.mrf.mxu3 }
 0x14c   :  { %8835 = vst [vmem:[#allocation106_spill] sm:$0xff] %v4890_v61  ;;  %v4917_v49 = vsel %vm635_vm2, %v727_v51, %v729_v34 }
 0x14d   :  { %1186 = vrot.lane.b32.xlu2 %v4883_v52, %s4060_s20  ;;  %995 = vrot.lane.b32.xlu1 %v4890_v61, %s4059_s11  ;;  %8840 = vst [vmem:[#allocation111_spill] sm:$0xff] %v4910_v24 }
 0x14e   :  { %8841 = vst [vmem:[#allocation112_spill] sm:$0xff] %v4917_v49 }
 0x14f   :  { %v4897_v21 = vpop.permute.xlu2 %1298  ;;  %v4899_v11 = vpop.permute.xlu1 %1106 }
 0x150   :  { %8836 = vst [vmem:[#allocation107_spill] sm:$0xff] %v4897_v21  ;;  %1188 = vrot.lane.b32.xlu0 %v4885_v46, %s4060_s20  ;;  %v368_v21 = vpop.f32.mrf.mxu0 }
 0x151   :  { %8837 = vst [vmem:[#allocation108_spill] sm:$0xff] %v4899_v11  ;;  %v366_v11 = vadd.f32 %v4255_v35, %v365_v54  ;;  %v369_v15 = vadd.f32 %v4255_v35, %v368_v21  ;;  %v8847_v54 = vrot.slane %v4804_v40, 7 }
 0x152   :  { %v4905_v29 = vpop.permute.xlu0 %981 }
 0x153   :  { %8838 = vst [vmem:[#allocation109_spill] sm:$0xff] %v4905_v29  ;;  %v4930_v30 = vmax.f32 %v366_v11, 0.0  ;;  %v464_v51 = vpop.f32.mrf.mxu3  ;;  %v4932_v63 = vmax.f32 %v369_v15, 0.0  ;;  %v792_v15 = vrot.slane %v4907_v57, 1 }
 0x155   :  { %997 = vrot.lane.b32.xlu2 %v4910_v24, %s4059_s11  ;;  %1124 = vrot.lane.b32.xlu1 %v4907_v57, %s4060_s20  ;;  %8845 = vst [vmem:[#allocation116_spill] sm:$0xff] %v4930_v30  ;;  %v667_v11 = vrot.slane %v4930_v30, 7 }
 0x156   :  { %8846 = vst [vmem:[#allocation117_spill] sm:$0xff] %v4932_v63 }
 0x157   :  { %v4920_v45 = vpop.permute.xlu2 %1174  ;;  %v4922_v29 = vpop.permute.xlu1 %917 }
 0x158   :  { %8842 = vst [vmem:[#allocation113_spill] sm:$0xff] %v4920_v45  ;;  %999 = vrot.lane.b32.xlu0 %v4917_v49, %s4059_s11  ;;  %v4937_v45 = vsel %vm635_vm2, %v8847_v54, %v665_v33  ;;  %v669_v54 = vrot.slane %v4932_v63, 7  ;;  %v371_v40 = vpop.f32.mrf.mxu0 }
 0x159   :  { %8843 = vst [vmem:[#allocation114_spill] sm:$0xff] %v4922_v29 }
 0x15a   :  { %v4928_v59 = vpop.permute.xlu0 %1110  ;;  %8848 = vst [vmem:[#allocation118_spill] sm:$0xff] %v4937_v45  ;;  %v4969_v57 = vsel %vm635_vm2, %v667_v11, %v669_v54 }
 0x15b   :  { %8844 = vst [vmem:[#allocation115_spill] sm:$0xff] %v4928_v59  ;;  %v92_v59 = vld [vmem:[%s8376_s0 + $0x1f0] sm:$0xff]  ;;  %v467_v24 = vpop.f32.mrf.mxu3 }
 0x15c   :  { %3874 = vmatmul.msk.f32.gmra.mxu3 %vm103_vm1, %v92_v59  ;;  %8854 = vst [vmem:[#allocation124_spill] sm:$0xff] %v4969_v57 }
 0x15d   :  { %1126 = vrot.lane.b32.xlu2 %v4930_v30, %s4060_s20  ;;  %935 = vrot.lane.b32.xlu1 %v4937_v45, %s4059_s11 }
 0x15f   :  { %v4943_v21 = vpop.permute.xlu2 %985  ;;  %v4945_v29 = vpop.permute.xlu1 %1296 }
 0x160   :  { %8849 = vst [vmem:[#allocation119_spill] sm:$0xff] %v4943_v21  ;;  %1128 = vrot.lane.b32.xlu0 %v4932_v63, %s4060_s20  ;;  %v4959_v21 = vsel %vm635_vm2, %v665_v33, %v667_v11  ;;  %v8463_v33 = vrot.slane %v4930_v30, 1  ;;  %v465_v11 = vadd.f32 %v4255_v35, %v464_v51  ;;  %v374_v37 = vpop.f32.mrf.mxu0 }
 0x161   :  { %8850 = vst [vmem:[#allocation120_spill] sm:$0xff] %v4945_v29  ;;  %v4962_v29 = vsel %vm762_vm3, %v790_v14, %v792_v15  ;;  %v468_v14 = vadd.f32 %v4255_v35, %v467_v24 }
 0x162   :  { %v4955_v9 = vpop.permute.xlu0 %921  ;;  %8852 = vst [vmem:[#allocation122_spill] sm:$0xff] %v4959_v21  ;;  %v4996_v24 = vmax.f32 %v465_v11, 0.0 }
 0x163   :  { %8851 = vst [vmem:[#allocation121_spill] sm:$0xff] %v4955_v9  ;;  %v462_v9 = vadd.f32 %v4255_v35, %v461_v16  ;;  %v4985_v3 = vmax.f32 %v468_v14, 0.0  ;;  %v4990_v16 = vsel %vm762_vm3, %v792_v15, %v8463_v33  ;;  %v470_v14 = vpop.f32.mrf.mxu3 }
 0x164   :  { %8853 = vst [vmem:[#allocation123_spill] sm:$0xff] %v4962_v29 }
 0x165   :  { %937 = vrot.lane.b32.xlu2 %v4959_v21, %s4059_s11  ;;  %1314 = vrot.lane.b32.xlu1 %v4962_v29, %s4061_s24  ;;  %v4982_v29 = vmax.f32 %v462_v9, 0.0  ;;  %8859 = vst [vmem:[#allocation129_spill] sm:$0xff] %v4985_v3  ;;  %v735_v15 = vrot.slane %v4985_v3, 7 }
 0x166   :  { %8860 = vst [vmem:[#allocation130_spill] sm:$0xff] %v4990_v16 }
 0x167   :  { %v4972_v61 = vpop.permute.xlu2 %1114  ;;  %v4974_v59 = vpop.permute.xlu1 %1172  ;;  %8858 = vst [vmem:[#allocation128_spill] sm:$0xff] %v4982_v29  ;;  %v731_v51 = vrot.slane %v4982_v29, 7 }
 0x168   :  { %8855 = vst [vmem:[#allocation125_spill] sm:$0xff] %v4972_v61  ;;  %939 = vrot.lane.b32.xlu0 %v4969_v57, %s4059_s11  ;;  %v733_v61 = vrot.slane %v4996_v24, 7 }
 0x169   :  { %8856 = vst [vmem:[#allocation126_spill] sm:$0xff] %v4974_v59 }
 0x16a   :  { %v4980_v56 = vpop.permute.xlu0 %1300  ;;  %8861 = vst [vmem:[#allocation131_spill] sm:$0xff] %v4996_v24  ;;  %v5017_v11 = vsel %vm635_vm2, %v733_v61, %v735_v15 }
 0x16b   :  { %8857 = vst [vmem:[#allocation127_spill] sm:$0xff] %v4980_v56  ;;  %v5010_v56 = vsel %vm635_vm2, %v729_v34, %v731_v51  ;;  %v473_v22 = vpop.f32.mrf.mxu3 }
 0x16c   :  { %8865 = vst [vmem:[#allocation135_spill] sm:$0xff] %v5010_v56  ;;  %v474_v18 = vadd.f32 %v4255_v35, %v473_v22 }
 0x16d   :  { %1316 = vrot.lane.b32.xlu2 %v4990_v16, %s4061_s24  ;;  %1190 = vrot.lane.b32.xlu1 %v4982_v29, %s4060_s20  ;;  %8866 = vst [vmem:[#allocation136_spill] sm:$0xff] %v5017_v11 }
 0x16f   :  { %v4998_v9 = vpop.permute.xlu2 %925  ;;  %v5000_v59 = vpop.permute.xlu1 %983 }
 0x170   :  { %8862 = vst [vmem:[#allocation132_spill] sm:$0xff] %v4998_v9  ;;  %1194 = vrot.lane.b32.xlu0 %v4985_v3, %s4060_s20  ;;  %v372_v9 = vadd.f32 %v4255_v35, %v371_v40  ;;  %v5035_v40 = vsel %vm635_vm2, %v731_v51, %v733_v61 }
 0x171   :  { %8863 = vst [vmem:[#allocation133_spill] sm:$0xff] %v5000_v59  ;;  %v377_v59 = vpop.f32.mrf.mxu0 }
 0x172   :  { %v5006_v33 = vpop.permute.xlu0 %1176  ;;  %v378_v49 = vadd.f32 %v4255_v35, %v377_v59  ;;  %v5029_v0 = vmax.f32 %v372_v9, 0.0  ;;  %8872 = vst [vmem:[#allocation142_spill] sm:$0xff] %v5035_v40 }
 0x173   :  { %8864 = vst [vmem:[#allocation134_spill] sm:$0xff] %v5006_v33 }
 0x174   :  { %8870 = vst [vmem:[#allocation140_spill] sm:$0xff] %v5029_v0  ;;  %v5032_v39 = vmax.f32 %v378_v49, 0.0 }
 0x175   :  { %1192 = vrot.lane.b32.xlu2 %v4996_v24, %s4060_s20  ;;  %1001 = vrot.lane.b32.xlu1 %v5010_v56, %s4059_s11  ;;  %v375_v56 = vadd.f32 %v4255_v35, %v374_v37  ;;  %v671_v37 = vrot.slane %v5029_v0, 7 }
 0x176   :  { %8871 = vst [vmem:[#allocation141_spill] sm:$0xff] %v5032_v39  ;;  %v675_v61 = vrot.slane %v5032_v39, 7 }
 0x177   :  { %v5020_v16 = vpop.permute.xlu2 %1304  ;;  %v5022_v33 = vpop.permute.xlu1 %1112  ;;  %v5041_v59 = vmax.f32 %v375_v56, 0.0 }
 0x178   :  { %8867 = vst [vmem:[#allocation137_spill] sm:$0xff] %v5020_v16  ;;  %1005 = vrot.lane.b32.xlu0 %v5017_v11, %s4059_s11 }
 0x179   :  { %8868 = vst [vmem:[#allocation138_spill] sm:$0xff] %v5022_v33  ;;  %v380_v49 = vpop.f32.mrf.mxu0  ;;  %v5055_v33 = vsel %vm635_vm2, %v669_v54, %v671_v37 }
 0x17a   :  { %v5027_v34 = vpop.permute.xlu0 %987  ;;  %8873 = vst [vmem:[#allocation143_spill] sm:$0xff] %v5041_v59 }
 0x17b   :  { %8869 = vst [vmem:[#allocation139_spill] sm:$0xff] %v5027_v34  ;;  %v673_v34 = vrot.slane %v5041_v59, 7 }
 0x17c   :  { %8877 = vst [vmem:[#allocation147_spill] sm:$0xff] %v5055_v33 }
 0x17d   :  { %1003 = vrot.lane.b32.xlu2 %v5035_v40, %s4059_s11  ;;  %1130 = vrot.lane.b32.xlu1 %v5029_v0, %s4060_s20  ;;  %v5062_v56 = vsel %vm635_vm2, %v673_v34, %v675_v61 }
 0x17e   :  { %8878 = vst [vmem:[#allocation148_spill] sm:$0xff] %v5062_v56 }
 0x17f   :  { %v5043_v16 = vpop.permute.xlu2 %1180  ;;  %v5045_v9 = vpop.permute.xlu1 %923 }
 0x180   :  { %8874 = vst [vmem:[#allocation144_spill] sm:$0xff] %v5043_v16  ;;  %1134 = vrot.lane.b32.xlu0 %v5032_v39, %s4060_s20  ;;  %v476_v16 = vpop.f32.mrf.mxu3 }
 0x181   :  { %8875 = vst [vmem:[#allocation145_spill] sm:$0xff] %v5045_v9  ;;  %v471_v9 = vadd.f32 %v4255_v35, %v470_v14  ;;  %v477_v54 = vadd.f32 %v4255_v35, %v476_v16  ;;  %v383_v27 = vpop.f32.mrf.mxu0  ;;  %v5080_v14 = vsel %vm635_vm2, %v671_v37, %v673_v34 }
 0x182   :  { %v5051_v51 = vpop.permute.xlu0 %1116  ;;  %8884 = vst [vmem:[#allocation154_spill] sm:$0xff] %v5080_v14 }
 0x183   :  { %8876 = vst [vmem:[#allocation146_spill] sm:$0xff] %v5051_v51  ;;  %v5074_v8 = vmax.f32 %v471_v9, 0.0  ;;  %v5077_v19 = vmax.f32 %v477_v54, 0.0 }
 0x185   :  { %1132 = vrot.lane.b32.xlu2 %v5041_v59, %s4060_s20  ;;  %941 = vrot.lane.b32.xlu1 %v5055_v33, %s4059_s11  ;;  %8882 = vst [vmem:[#allocation152_spill] sm:$0xff] %v5074_v8  ;;  %v737_v22 = vrot.slane %v5074_v8, 7  ;;  %v741_v34 = vrot.slane %v5077_v19, 7 }
 0x186   :  { %8883 = vst [vmem:[#allocation153_spill] sm:$0xff] %v5077_v19 }
 0x187   :  { %v5065_v40 = vpop.permute.xlu2 %991  ;;  %v5067_v51 = vpop.permute.xlu1 %1302 }
 0x188   :  { %8879 = vst [vmem:[#allocation149_spill] sm:$0xff] %v5065_v40  ;;  %945 = vrot.lane.b32.xlu0 %v5062_v56, %s4059_s11  ;;  %v5086_v40 = vmax.f32 %v474_v18, 0.0  ;;  %v479_v37 = vpop.f32.mrf.mxu3 }
 0x189   :  { %8880 = vst [vmem:[#allocation150_spill] sm:$0xff] %v5067_v51  ;;  %v5100_v51 = vsel %vm635_vm2, %v735_v15, %v737_v22 }
 0x18a   :  { %v5072_v11 = vpop.permute.xlu0 %927  ;;  %8885 = vst [vmem:[#allocation155_spill] sm:$0xff] %v5086_v40 }
 0x18b   :  { %8881 = vst [vmem:[#allocation151_spill] sm:$0xff] %v5072_v11  ;;  %v739_v11 = vrot.slane %v5086_v40, 7 }
 0x18c   :  { %8889 = vst [vmem:[#allocation159_spill] sm:$0xff] %v5100_v51 }
 0x18d   :  { %943 = vrot.lane.b32.xlu2 %v5080_v14, %s4059_s11  ;;  %1196 = vrot.lane.b32.xlu1 %v5074_v8, %s4060_s20  ;;  %v5107_v18 = vsel %vm635_vm2, %v739_v11, %v741_v34 }
 0x18e   :  { %8890 = vst [vmem:[#allocation160_spill] sm:$0xff] %v5107_v18 }
 0x18f   :  { %v5088_v16 = vpop.permute.xlu2 %1120  ;;  %v5090_v9 = vpop.permute.xlu1 %1178 }
 0x190   :  { %8886 = vst [vmem:[#allocation156_spill] sm:$0xff] %v5088_v16  ;;  %1200 = vrot.lane.b32.xlu0 %v5077_v19, %s4060_s20  ;;  %v381_v16 = vadd.f32 %v4255_v35, %v380_v49  ;;  %v482_v33 = vpop.f32.mrf.mxu3  ;;  %v5125_v49 = vsel %vm635_vm2, %v737_v22, %v739_v11 }
 0x191   :  { %8887 = vst [vmem:[#allocation157_spill] sm:$0xff] %v5090_v9  ;;  %v386_v9 = vpop.f32.mrf.mxu0 }
 0x192   :  { %v5096_v54 = vpop.permute.xlu0 %1306  ;;  %v387_v28 = vadd.f32 %v4255_v35, %v386_v9  ;;  %v5119_v14 = vmax.f32 %v381_v16, 0.0  ;;  %8896 = vst [vmem:[#allocation166_spill] sm:$0xff] %v5125_v49 }
 0x193   :  { %8888 = vst [vmem:[#allocation158_spill] sm:$0xff] %v5096_v54 }
 0x194   :  { %8894 = vst [vmem:[#allocation164_spill] sm:$0xff] %v5119_v14  ;;  %v5122_v21 = vmax.f32 %v387_v28, 0.0  ;;  %v677_v28 = vrot.slane %v5119_v14, 7 }
 0x195   :  { %1198 = vrot.lane.b32.xlu2 %v5086_v40, %s4060_s20  ;;  %1007 = vrot.lane.b32.xlu1 %v5100_v51, %s4059_s11  ;;  %v384_v51 = vadd.f32 %v4255_v35, %v383_v27 }
 0x196   :  { %8895 = vst [vmem:[#allocation165_spill] sm:$0xff] %v5122_v21  ;;  %v681_v27 = vrot.slane %v5122_v21, 7 }
 0x197   :  { %v5110_v23 = vpop.permute.xlu2 %931  ;;  %v5112_v54 = vpop.permute.xlu1 %989  ;;  %v5131_v9 = vmax.f32 %v384_v51, 0.0 }
 0x198   :  { %8891 = vst [vmem:[#allocation161_spill] sm:$0xff] %v5110_v23  ;;  %1011 = vrot.lane.b32.xlu0 %v5107_v18, %s4059_s11  ;;  %v5145_v23 = vsel %vm635_vm2, %v675_v61, %v677_v28  ;;  %v5164_v61 = vld [vmem:[%s8380_s4] ss:$0 sm:$0xff] }
 0x199   :  { %8892 = vst [vmem:[#allocation162_spill] sm:$0xff] %v5112_v54  ;;  %v389_v11 = vpop.f32.mrf.mxu0 }
 0x19a   :  { %v5117_v15 = vpop.permute.xlu0 %1182  ;;  %8897 = vst [vmem:[#allocation167_spill] sm:$0xff] %v5131_v9 }
 0x19b   :  { %8893 = vst [vmem:[#allocation163_spill] sm:$0xff] %v5117_v15  ;;  %v679_v15 = vrot.slane %v5131_v9, 7 }
 0x19c   :  { %8901 = vst [vmem:[#allocation171_spill] sm:$0xff] %v5145_v23 }
 0x19d   :  { %1009 = vrot.lane.b32.xlu2 %v5125_v49, %s4059_s11  ;;  %1136 = vrot.lane.b32.xlu1 %v5119_v14, %s4060_s20  ;;  %v5152_v51 = vsel %vm635_vm2, %v679_v15, %v681_v27 }
 0x19e   :  { %8902 = vst [vmem:[#allocation172_spill] sm:$0xff] %v5152_v51 }
 0x19f   :  { %v5133_v54 = vpop.permute.xlu2 %1310  ;;  %v5135_v16 = vpop.permute.xlu1 %1118 }
 0x1a0   :  { %8898 = vst [vmem:[#allocation168_spill] sm:$0xff] %v5133_v54  ;;  %1140 = vrot.lane.b32.xlu0 %v5122_v21, %s4060_s20  ;;  %v485_v54 = vpop.f32.mrf.mxu3 }
 0x1a1   :  { %8899 = vst [vmem:[#allocation169_spill] sm:$0xff] %v5135_v16  ;;  %v480_v16 = vadd.f32 %v4255_v35, %v479_v37  ;;  %v486_v18 = vadd.f32 %v5164_v61, %v485_v54  ;;  %v483_v35 = vadd.f32 %v5164_v61, %v482_v33  ;;  %v392_v37 = vpop.f32.mrf.mxu0  ;;  %v93_v33 = vld [vmem:[%s8376_s0 + $0x1f8] sm:$0xff] }
 0x1a2   :  { %v5141_v22 = vpop.permute.xlu0 %993  ;;  %3875 = vmatmul.msk.f32.gmra.mxu3 %vm103_vm1, %v93_v33 }
 0x1a3   :  { %8900 = vst [vmem:[#allocation170_spill] sm:$0xff] %v5141_v22  ;;  %v5169_v45 = vmax.f32 %v480_v16, 0.0 }
 0x1a5   :  { %1138 = vrot.lane.b32.xlu2 %v5131_v9, %s4060_s20  ;;  %947 = vrot.lane.b32.xlu1 %v5145_v23, %s4059_s11  ;;  %8906 = vst [vmem:[#allocation176_spill] sm:$0xff] %v5169_v45 }
 0x1a7   :  { %v5155_v49 = vpop.permute.xlu2 %1186  ;;  %v5157_v22 = vpop.permute.xlu1 %929 }
 0x1a8   :  { %8903 = vst [vmem:[#allocation173_spill] sm:$0xff] %v5155_v49  ;;  %951 = vrot.lane.b32.xlu0 %v5152_v51, %s4059_s11  ;;  %v5172_v49 = vmax.f32 %v486_v18, 0.0  ;;  %v5181_v51 = vmax.f32 %v483_v35, 0.0  ;;  %v743_v18 = vrot.slane %v5169_v45, 7 }
 0x1a9   :  { %8904 = vst [vmem:[#allocation174_spill] sm:$0xff] %v5157_v22  ;;  %v5175_v22 = vsel %vm635_vm2, %v677_v28, %v679_v15  ;;  %v488_v28 = vpop.f32.mrf.mxu3  ;;  %v395_v33 = vpop.f32.mrf.mxu0 }
 0x1aa   :  { %v5167_v23 = vpop.permute.xlu0 %1122  ;;  %8907 = vst [vmem:[#allocation177_spill] sm:$0xff] %v5172_v49  ;;  %v747_v15 = vrot.slane %v5172_v49, 7  ;;  %v396_v56 = vadd.f32 %v5164_v61, %v395_v33 }
 0x1ab   :  { %8905 = vst [vmem:[#allocation175_spill] sm:$0xff] %v5167_v23  ;;  %v5199_v23 = vsel %vm635_vm2, %v741_v34, %v743_v18 }
 0x1ac   :  { %8908 = vst [vmem:[#allocation178_spill] sm:$0xff] %v5175_v22  ;;  %v5221_v57 = vmax.f32 %v396_v56, 0.0 }
 0x1ad   :  { %949 = vrot.lane.b32.xlu2 %v5175_v22, %s4059_s11  ;;  %1202 = vrot.lane.b32.xlu1 %v5169_v45, %s4060_s20  ;;  %8909 = vst [vmem:[#allocation179_spill] sm:$0xff] %v5181_v51  ;;  %v390_v22 = vadd.f32 %v5164_v61, %v389_v11 }
 0x1ae   :  { %8913 = vst [vmem:[#allocation183_spill] sm:$0xff] %v5199_v23 }
 0x1af   :  { %v5183_v54 = vpop.permute.xlu2 %997  ;;  %v5185_v16 = vpop.permute.xlu1 %1308  ;;  %v5218_v41 = vmax.f32 %v390_v22, 0.0  ;;  %8919 = vst [vmem:[#allocation189_spill] sm:$0xff] %v5221_v57 }
 0x1b0   :  { %8910 = vst [vmem:[#allocation180_spill] sm:$0xff] %v5183_v54  ;;  %1206 = vrot.lane.b32.xlu0 %v5172_v49, %s4060_s20  ;;  %v745_v54 = vrot.slane %v5181_v51, 7 }
 0x1b1   :  { %8911 = vst [vmem:[#allocation181_spill] sm:$0xff] %v5185_v16  ;;  %v491_v10 = vpop.f32.mrf.mxu3  ;;  %v683_v56 = vrot.slane %v5218_v41, 7 }
 0x1b2   :  { %v5195_v35 = vpop.permute.xlu0 %933  ;;  %v5206_v16 = vsel %vm635_vm2, %v745_v54, %v747_v15  ;;  %8918 = vst [vmem:[#allocation188_spill] sm:$0xff] %v5218_v41  ;;  %v5224_v11 = vsel %vm635_vm2, %v743_v18, %v745_v54 }
 0x1b3   :  { %8912 = vst [vmem:[#allocation182_spill] sm:$0xff] %v5195_v35 }
 0x1b4   :  { %8914 = vst [vmem:[#allocation184_spill] sm:$0xff] %v5206_v16 }
 0x1b5   :  { %1204 = vrot.lane.b32.xlu2 %v5181_v51, %s4060_s20  ;;  %1013 = vrot.lane.b32.xlu1 %v5199_v23, %s4059_s11  ;;  %v393_v23 = vadd.f32 %v5164_v61, %v392_v37  ;;  %8920 = vst [vmem:[#allocation190_spill] sm:$0xff] %v5224_v11  ;;  %v687_v37 = vrot.slane %v5221_v57, 7 }
 0x1b7   :  { %v5209_v36 = vpop.permute.xlu2 %1126  ;;  %v5211_v35 = vpop.permute.xlu1 %1184  ;;  %v5230_v33 = vmax.f32 %v393_v23, 0.0 }
 0x1b8   :  { %8915 = vst [vmem:[#allocation185_spill] sm:$0xff] %v5209_v36  ;;  %1017 = vrot.lane.b32.xlu0 %v5206_v16, %s4059_s11  ;;  %v398_v36 = vpop.f32.mrf.mxu0 }
 0x1b9   :  { %8916 = vst [vmem:[#allocation186_spill] sm:$0xff] %v5211_v35  ;;  %v685_v18 = vrot.slane %v5230_v33, 7 }
 0x1ba   :  { %v5216_v34 = vpop.permute.xlu0 %1312  ;;  %8921 = vst [vmem:[#allocation191_spill] sm:$0xff] %v5230_v33 }
 0x1bb   :  { %8917 = vst [vmem:[#allocation187_spill] sm:$0xff] %v5216_v34  ;;  %v5244_v34 = vsel %vm635_vm2, %v681_v27, %v683_v56  ;;  %v5251_v23 = vsel %vm635_vm2, %v685_v18, %v687_v37 }
 0x1bc   :  { %8925 = vst [vmem:[#allocation195_spill] sm:$0xff] %v5244_v34 }
 0x1bd   :  { %1015 = vrot.lane.b32.xlu2 %v5224_v11, %s4059_s11  ;;  %1142 = vrot.lane.b32.xlu1 %v5218_v41, %s4060_s20  ;;  %8926 = vst [vmem:[#allocation196_spill] sm:$0xff] %v5251_v23 }
 0x1bf   :  { %v5232_v35 = vpop.permute.xlu2 %937  ;;  %v5234_v22 = vpop.permute.xlu1 %995 }
 0x1c0   :  { %8922 = vst [vmem:[#allocation192_spill] sm:$0xff] %v5232_v35  ;;  %1146 = vrot.lane.b32.xlu0 %v5221_v57, %s4060_s20  ;;  %v489_v35 = vadd.f32 %v5164_v61, %v488_v28  ;;  %v401_v16 = vpop.f32.mrf.mxu0  ;;  %v5269_v28 = vsel %vm635_vm2, %v683_v56, %v685_v18 }
 0x1c1   :  { %8923 = vst [vmem:[#allocation193_spill] sm:$0xff] %v5234_v22  ;;  %v494_v22 = vpop.f32.mrf.mxu3 }
 0x1c2   :  { %v5240_v54 = vpop.permute.xlu0 %1188  ;;  %v495_v27 = vadd.f32 %v5164_v61, %v494_v22  ;;  %v5263_v53 = vmax.f32 %v489_v35, 0.0  ;;  %8932 = vst [vmem:[#allocation202_spill] sm:$0xff] %v5269_v28 }
 0x1c3   :  { %8924 = vst [vmem:[#allocation194_spill] sm:$0xff] %v5240_v54 }
 0x1c4   :  { %8930 = vst [vmem:[#allocation200_spill] sm:$0xff] %v5263_v53  ;;  %v5266_v5 = vmax.f32 %v495_v27, 0.0 }
 0x1c5   :  { %1144 = vrot.lane.b32.xlu2 %v5230_v33, %s4060_s20  ;;  %953 = vrot.lane.b32.xlu1 %v5244_v34, %s4059_s11  ;;  %v492_v34 = vadd.f32 %v5164_v61, %v491_v10  ;;  %v749_v10 = vrot.slane %v5263_v53, 7 }
 0x1c6   :  { %8931 = vst [vmem:[#allocation201_spill] sm:$0xff] %v5266_v5  ;;  %v753_v35 = vrot.slane %v5266_v5, 7 }
 0x1c7   :  { %v5254_v11 = vpop.permute.xlu2 %1316  ;;  %v5256_v54 = vpop.permute.xlu1 %1124 }
 0x1c8   :  { %8927 = vst [vmem:[#allocation197_spill] sm:$0xff] %v5254_v11  ;;  %957 = vrot.lane.b32.xlu0 %v5251_v23, %s4059_s11  ;;  %v5275_v11 = vmax.f32 %v492_v34, 0.0  ;;  %v404_v27 = vpop.f32.mrf.mxu0 }
 0x1c9   :  { %8928 = vst [vmem:[#allocation198_spill] sm:$0xff] %v5256_v54  ;;  %v5289_v54 = vsel %vm635_vm2, %v747_v15, %v749_v10 }
 0x1ca   :  { %v5261_v1 = vpop.permute.xlu0 %999  ;;  %8933 = vst [vmem:[#allocation203_spill] sm:$0xff] %v5275_v11  ;;  %v751_v18 = vrot.slane %v5275_v11, 7 }
 0x1cb   :  { %8929 = vst [vmem:[#allocation199_spill] sm:$0xff] %v5261_v1 }
 0x1cc   :  { %8937 = vst [vmem:[#allocation207_spill] sm:$0xff] %v5289_v54  ;;  %v5296_v34 = vsel %vm635_vm2, %v751_v18, %v753_v35  ;;  %v5314_v44 = vsel %vm635_vm2, %v749_v10, %v751_v18 }
 0x1cd   :  { %955 = vrot.lane.b32.xlu2 %v5269_v28, %s4059_s11  ;;  %1208 = vrot.lane.b32.xlu1 %v5263_v53, %s4060_s20  ;;  %8938 = vst [vmem:[#allocation208_spill] sm:$0xff] %v5296_v34  ;;  %v405_v28 = vadd.f32 %v5164_v61, %v404_v27 }
 0x1ce   :  { %8944 = vst [vmem:[#allocation214_spill] sm:$0xff] %v5314_v44 }
 0x1cf   :  { %v5277_v22 = vpop.permute.xlu2 %1192  ;;  %v5279_v1 = vpop.permute.xlu1 %935  ;;  %v5311_v38 = vmax.f32 %v405_v28, 0.0 }
 0x1d0   :  { %8934 = vst [vmem:[#allocation204_spill] sm:$0xff] %v5277_v22  ;;  %1212 = vrot.lane.b32.xlu0 %v5266_v5, %s4060_s20  ;;  %v399_v22 = vadd.f32 %v5164_v61, %v398_v36  ;;  %v407_v36 = vpop.f32.mrf.mxu0 }
 0x1d1   :  { %8935 = vst [vmem:[#allocation205_spill] sm:$0xff] %v5279_v1  ;;  %v693_v28 = vrot.slane %v5311_v38, 7 }
 0x1d2   :  { %v5285_v56 = vpop.permute.xlu0 %1128  ;;  %v5308_v23 = vmax.f32 %v399_v22, 0.0  ;;  %8943 = vst [vmem:[#allocation213_spill] sm:$0xff] %v5311_v38 }
 0x1d3   :  { %8936 = vst [vmem:[#allocation206_spill] sm:$0xff] %v5285_v56 }
 0x1d4   :  { %8942 = vst [vmem:[#allocation212_spill] sm:$0xff] %v5308_v23 }
 0x1d5   :  { %1210 = vrot.lane.b32.xlu2 %v5275_v11, %s4060_s20  ;;  %1019 = vrot.lane.b32.xlu1 %v5289_v54, %s4059_s11  ;;  %v402_v54 = vadd.f32 %v5164_v61, %v401_v16  ;;  %v689_v16 = vrot.slane %v5308_v23, 7 }
 0x1d7   :  { %v5299_v1 = vpop.permute.xlu2 %1003  ;;  %v5301_v56 = vpop.permute.xlu1 %1314  ;;  %v5320_v27 = vmax.f32 %v402_v54, 0.0 }
 0x1d8   :  { %8939 = vst [vmem:[#allocation209_spill] sm:$0xff] %v5299_v1  ;;  %1023 = vrot.lane.b32.xlu0 %v5296_v34, %s4059_s11 }
 0x1d9   :  { %8940 = vst [vmem:[#allocation210_spill] sm:$0xff] %v5301_v56  ;;  %v691_v18 = vrot.slane %v5320_v27, 7  ;;  %v5334_v56 = vsel %vm635_vm2, %v687_v37, %v689_v16 }
 0x1da   :  { %v5306_v15 = vpop.permute.xlu0 %939  ;;  %8945 = vst [vmem:[#allocation215_spill] sm:$0xff] %v5320_v27 }
 0x1db   :  { %8941 = vst [vmem:[#allocation211_spill] sm:$0xff] %v5306_v15  ;;  %v497_v15 = vpop.f32.mrf.mxu3  ;;  %v5341_v54 = vsel %vm635_vm2, %v691_v18, %v693_v28  ;;  %v5357_v60 = vsel %vm635_vm2, %v689_v16, %v691_v18 }
 0x1dc   :  { %8949 = vst [vmem:[#allocation219_spill] sm:$0xff] %v5334_v56 }
 0x1dd   :  { %1021 = vrot.lane.b32.xlu2 %v5314_v44, %s4059_s11  ;;  %1148 = vrot.lane.b32.xlu1 %v5308_v23, %s4060_s20  ;;  %8950 = vst [vmem:[#allocation220_spill] sm:$0xff] %v5341_v54  ;;  %v410_v44 = vpop.f32.mrf.mxu0 }
 0x1de   :  { %v411_v34 = vadd.f32 %v5164_v61, %v410_v44  ;;  %8955 = vst [vmem:[#allocation225_spill] sm:$0xff] %v5357_v60 }
 0x1df   :  { %v5322_v1 = vpop.permute.xlu2 %1132  ;;  %v5324_v22 = vpop.permute.xlu1 %1190 }
 0x1e0   :  { %8946 = vst [vmem:[#allocation216_spill] sm:$0xff] %v5322_v1  ;;  %1152 = vrot.lane.b32.xlu0 %v5311_v38, %s4060_s20 }
 0x1e1   :  { %8947 = vst [vmem:[#allocation217_spill] sm:$0xff] %v5324_v22  ;;  %v498_v22 = vadd.f32 %v5164_v61, %v497_v15  ;;  %v5363_v15 = vmax.f32 %v411_v34, 0.0 }
 0x1e2   :  { %v5330_v10 = vpop.permute.xlu0 %1194 }
 0x1e3   :  { %8948 = vst [vmem:[#allocation218_spill] sm:$0xff] %v5330_v10  ;;  %v5353_v13 = vmax.f32 %v498_v22, 0.0  ;;  %v500_v25 = vpop.f32.mrf.mxu3  ;;  %v8959_v22 = vrot.slane %v4930_v30, 1 }
 0x1e4   :  { %8956 = vst [vmem:[#allocation226_spill] sm:$0xff] %v5363_v15 }
 0x1e5   :  { %1150 = vrot.lane.b32.xlu2 %v5320_v27, %s4060_s20  ;;  %959 = vrot.lane.b32.xlu1 %v5334_v56, %s4059_s11  ;;  %8954 = vst [vmem:[#allocation224_spill] sm:$0xff] %v5353_v13  ;;  %v796_v56 = vrot.slane %v4932_v63, 1  ;;  %v755_v16 = vrot.slane %v5353_v13, 7 }
 0x1e7   :  { %v5344_v1 = vpop.permute.xlu2 %943  ;;  %v5346_v10 = vpop.permute.xlu1 %1001 }
 0x1e8   :  { %8951 = vst [vmem:[#allocation221_spill] sm:$0xff] %v5344_v1  ;;  %963 = vrot.lane.b32.xlu0 %v5341_v54, %s4059_s11  ;;  %v5373_v1 = vsel %vm762_vm3, %v8959_v22, %v796_v56  ;;  %v408_v22 = vadd.f32 %v5164_v61, %v407_v36  ;;  %v802_v36 = vrot.slane %v5032_v39, 1  ;;  %v798_v39 = vrot.slane %v5029_v0, 1 }
 0x1e9   :  { %8952 = vst [vmem:[#allocation222_spill] sm:$0xff] %v5346_v10 }
 0x1ea   :  { %v5350_v37 = vpop.permute.xlu0 %1005  ;;  %8960 = vst [vmem:[#allocation229_spill] sm:$0xff] %v5373_v1  ;;  %v5456_v0 = vsel %vm762_vm3, %v796_v56, %v798_v39 }
 0x1eb   :  { %8953 = vst [vmem:[#allocation223_spill] sm:$0xff] %v5350_v37  ;;  %v501_v37 = vadd.f32 %v5164_v61, %v500_v25  ;;  %v697_v25 = vrot.slane %v5363_v15, 7 }
 0x1ed   :  { %961 = vrot.lane.b32.xlu2 %v5357_v60, %s4059_s11  ;;  %1214 = vrot.lane.b32.xlu1 %v5353_v13, %s4060_s20  ;;  %v5380_v34 = vmax.f32 %v501_v37, 0.0  ;;  %v8966_v37 = vrot.slane %v4285_v50, 7 }
 0x1ef   :  { %v5366_v10 = vpop.permute.xlu2 %1198  ;;  %v5368_v44 = vpop.permute.xlu1 %1130  ;;  %8962 = vst [vmem:[#allocation231_spill] sm:$0xff] %v5380_v34 }
 0x1f0   :  { %8957 = vst [vmem:[#allocation227_spill] sm:$0xff] %v5366_v10  ;;  %1318 = vrot.lane.b32.xlu0 %v5373_v1, %s4061_s24  ;;  %v5384_v10 = vsel %vm635_vm2, %v753_v35, %v755_v16  ;;  %v8563_v35 = vrot.slane %v5380_v34, 7  ;;  %v5405_v1 = vmax.f32 %v408_v22, 0.0 }
 0x1f1   :  { %8958 = vst [vmem:[#allocation228_spill] sm:$0xff] %v5368_v44 }
 0x1f2   :  { %v5378_v18 = vpop.permute.xlu0 %1134  ;;  %8963 = vst [vmem:[#allocation232_spill] sm:$0xff] %v5384_v10 }
 0x1f3   :  { %8961 = vst [vmem:[#allocation230_spill] sm:$0xff] %v5378_v18  ;;  %v5398_v18 = vsel %vm635_vm2, %v697_v25, %v8966_v37  ;;  %v800_v37 = vrot.slane %v5041_v59, 1 }
 0x1f4   :  { %8967 = vst [vmem:[#allocation235_spill] sm:$0xff] %v5398_v18 }
 0x1f5   :  { %1216 = vrot.lane.b32.xlu2 %v5380_v34, %s4060_s20  ;;  %1025 = vrot.lane.b32.xlu1 %v5384_v10, %s4059_s11  ;;  %8969 = vst [vmem:[#allocation237_spill] sm:$0xff] %v5405_v1  ;;  %v5423_v22 = vsel %vm762_vm3, %v800_v37, %v802_v36  ;;  %v5433_v59 = vsel %vm762_vm3, %v798_v39, %v800_v37  ;;  %v814_v37 = vrot.slane %v5221_v57, 1  ;;  %v804_v39 = vrot.slane %v5119_v14, 1 }
 0x1f6   :  { %8973 = vst [vmem:[#allocation241_spill] sm:$0xff] %v5423_v22 }
 0x1f7   :  { %v5391_v44 = vpop.permute.xlu2 %1009  ;;  %v5393_v63 = vpop.permute.xlu1 %941  ;;  %8975 = vst [vmem:[#allocation243_spill] sm:$0xff] %v5433_v59 }
 0x1f8   :  { %8964 = vst [vmem:[#allocation233_spill] sm:$0xff] %v5391_v44  ;;  %969 = vrot.lane.b32.xlu0 %v5398_v18, %s4059_s11  ;;  %v5411_v44 = vsel %vm635_vm2, %v755_v16, %v8563_v35  ;;  %v695_v16 = vrot.slane %v5405_v1, 7 }
 0x1f9   :  { %8965 = vst [vmem:[#allocation234_spill] sm:$0xff] %v5393_v63 }
 0x1fa   :  { %v5403_v30 = vpop.permute.xlu0 %945  ;;  %8970 = vst [vmem:[#allocation238_spill] sm:$0xff] %v5411_v44  ;;  %v5477_v57 = vsel %vm635_vm2, %v695_v16, %v697_v25  ;;  %v810_v25 = vrot.slane %v5218_v41, 1 }
 0x1fb   :  { %8968 = vst [vmem:[#allocation236_spill] sm:$0xff] %v5403_v30 }
 0x1fc   :  { %8985 = vst [vmem:[#allocation253_spill] sm:$0xff] %v5477_v57 }
 0x1fd   :  { %1027 = vrot.lane.b32.xlu2 %v5411_v44, %s4059_s11  ;;  %1154 = vrot.lane.b32.xlu1 %v5405_v1, %s4060_s20  ;;  %v808_v44 = vrot.slane %v5122_v21, 1 }
 0x1ff   :  { %v5418_v63 = vpop.permute.xlu2 %1138  ;;  %v5420_v30 = vpop.permute.xlu1 %1196 }
 0x200   :  { %8971 = vst [vmem:[#allocation239_spill] sm:$0xff] %v5418_v63  ;;  %1324 = vrot.lane.b32.xlu0 %v5423_v22, %s4061_s24  ;;  %v5436_v63 = vsel %vm635_vm2, %v693_v28, %v695_v16  ;;  %v824_v16 = vrot.slane %v5363_v15, 1 }
 0x201   :  { %8972 = vst [vmem:[#allocation240_spill] sm:$0xff] %v5420_v30  ;;  %v806_v30 = vrot.slane %v5131_v9, 1 }
 0x202   :  { %v5428_v35 = vpop.permute.xlu0 %1200  ;;  %8976 = vst [vmem:[#allocation244_spill] sm:$0xff] %v5436_v63 }
 0x203   :  { %8974 = vst [vmem:[#allocation242_spill] sm:$0xff] %v5428_v35  ;;  %v5448_v21 = vsel %vm762_vm3, %v806_v30, %v808_v44 }
 0x204   :  { %8979 = vst [vmem:[#allocation247_spill] sm:$0xff] %v5448_v21 }
 0x205   :  { %1322 = vrot.lane.b32.xlu2 %v5433_v59, %s4061_s24  ;;  %965 = vrot.lane.b32.xlu1 %v5436_v63, %s4059_s11 }
 0x207   :  { %v5443_v22 = vpop.permute.xlu2 %949  ;;  %v5445_v35 = vpop.permute.xlu1 %1007 }
 0x208   :  { %8977 = vst [vmem:[#allocation245_spill] sm:$0xff] %v5443_v22  ;;  %1330 = vrot.lane.b32.xlu0 %v5448_v21, %s4061_s24 }
 0x209   :  { %8978 = vst [vmem:[#allocation246_spill] sm:$0xff] %v5445_v35  ;;  %v812_v35 = vrot.slane %v5230_v33, 1  ;;  %v5480_v33 = vsel %vm762_vm3, %v802_v36, %v804_v39 }
 0x20a   :  { %v5452_v28 = vpop.permute.xlu0 %1011  ;;  %8986 = vst [vmem:[#allocation254_spill] sm:$0xff] %v5480_v33 }
 0x20b   :  { %8980 = vst [vmem:[#allocation248_spill] sm:$0xff] %v5452_v28  ;;  %v5468_v59 = vsel %vm762_vm3, %v812_v35, %v814_v37  ;;  %v820_v28 = vrot.slane %v5311_v38, 1  ;;  %v5501_v38 = vsel %vm762_vm3, %v804_v39, %v806_v30  ;;  %v816_v30 = vrot.slane %v5308_v23, 1 }
 0x20c   :  { %8983 = vst [vmem:[#allocation251_spill] sm:$0xff] %v5468_v59  ;;  %v832_v39 = vrot.slane %v4353_v17, 1 }
 0x20d   :  { %1156 = vrot.lane.b32.xlu2 %v5363_v15, %s4060_s20  ;;  %1320 = vrot.lane.b32.xlu1 %v5456_v0, %s4061_s24  ;;  %v5525_v15 = vsel %vm762_vm3, %v810_v25, %v812_v35  ;;  %v822_v35 = vrot.slane %v5405_v1, 1  ;;  %s4063_s20 = smov 20  }
 0x20e   :  { %8996 = vst [vmem:[#allocation264_spill] sm:$0xff] %v5525_v15 }
 0x20f   :  { %v5463_v22 = vpop.permute.xlu2 %1204  ;;  %v5465_v9 = vpop.permute.xlu1 %1136 }
 0x210   :  { %8981 = vst [vmem:[#allocation249_spill] sm:$0xff] %v5463_v22  ;;  %1336 = vrot.lane.b32.xlu0 %v5468_v59, %s4061_s24  ;;  %v818_v22 = vrot.slane %v5320_v27, 1  ;;  %v5504_v27 = vsel %vm762_vm3, %v808_v44, %v810_v25  ;;  %v838_v25 = vrot.slane %v4471_v7, 1  ;;  %v5573_v7 = vsel %vm762_vm3, %v822_v35, %v824_v16 }
 0x211   :  { %8982 = vst [vmem:[#allocation250_spill] sm:$0xff] %v5465_v9 }
 0x212   :  { %v5473_v56 = vpop.permute.xlu0 %1140  ;;  %8991 = vst [vmem:[#allocation259_spill] sm:$0xff] %v5504_v27  ;;  %v5549_v17 = vsel %vm762_vm3, %v816_v30, %v818_v22 }
 0x213   :  { %8984 = vst [vmem:[#allocation252_spill] sm:$0xff] %v5473_v56  ;;  %v5492_v56 = vsel %vm762_vm3, %v818_v22, %v820_v28  ;;  %v828_v22 = vrot.slane %v4325_v4, 1 }
 0x214   :  { %8989 = vst [vmem:[#allocation257_spill] sm:$0xff] %v5492_v56 }
 0x215   :  { %967 = vrot.lane.b32.xlu2 %v5477_v57, %s4059_s11  ;;  %1326 = vrot.lane.b32.xlu1 %v5480_v33, %s4061_s24  ;;  %9002 = vst [vmem:[#allocation270_spill] sm:$0xff] %v5549_v17  ;;  %s4062_s11 = smov 16  }
 0x216   :  { %9007 = vst [vmem:[#allocation275_spill] sm:$0xff] %v5573_v7 }
 0x217   :  { %v5487_v9 = vpop.permute.xlu2 %1015  ;;  %v5489_v14 = vpop.permute.xlu1 %947 }
 0x218   :  { %8987 = vst [vmem:[#allocation255_spill] sm:$0xff] %v5487_v9  ;;  %1342 = vrot.lane.b32.xlu0 %v5492_v56, %s4061_s24  ;;  %v826_v9 = vrot.slane %v4285_v50, 1  ;;  %v5528_v50 = vsel %vm762_vm3, %v814_v37, %v816_v30  ;;  %v844_v30 = vrot.slane %v4607_v58, 1 }
 0x219   :  { %8988 = vst [vmem:[#allocation256_spill] sm:$0xff] %v5489_v14 }
 0x21a   :  { %v5497_v36 = vpop.permute.xlu0 %951  ;;  %8997 = vst [vmem:[#allocation265_spill] sm:$0xff] %v5528_v50 }
 0x21b   :  { %8990 = vst [vmem:[#allocation258_spill] sm:$0xff] %v5497_v36  ;;  %v5516_v36 = vsel %vm762_vm3, %v824_v16, %v826_v9 }
 0x21c   :  { %8994 = vst [vmem:[#allocation262_spill] sm:$0xff] %v5516_v36 }
 0x21d   :  { %1328 = vrot.lane.b32.xlu2 %v5501_v38, %s4061_s24  ;;  %1332 = vrot.lane.b32.xlu1 %v5504_v27, %s4061_s24 }
 0x21f   :  { %v5511_v14 = vpop.permute.xlu2 %1144  ;;  %v5513_v41 = vpop.permute.xlu1 %1202 }
 0x220   :  { %8992 = vst [vmem:[#allocation260_spill] sm:$0xff] %v5511_v14  ;;  %1348 = vrot.lane.b32.xlu0 %v5516_v36, %s4061_s24 }
 0x221   :  { %8993 = vst [vmem:[#allocation261_spill] sm:$0xff] %v5513_v41  ;;  %v830_v41 = vrot.slane %v4323_v2, 1  ;;  %v5552_v2 = vsel %vm762_vm3, %v820_v28, %v822_v35  ;;  %v850_v35 = vrot.slane %v4751_v43, 1 }
 0x222   :  { %v5521_v44 = vpop.permute.xlu0 %1206  ;;  %9003 = vst [vmem:[#allocation271_spill] sm:$0xff] %v5552_v2 }
 0x223   :  { %8995 = vst [vmem:[#allocation263_spill] sm:$0xff] %v5521_v44  ;;  %v5540_v44 = vsel %vm762_vm3, %v830_v41, %v832_v39  ;;  %v5597_v58 = vsel %vm762_vm3, %v828_v22, %v830_v41  ;;  %v840_v41 = vrot.slane %v4572_v12, 1 }
 0x224   :  { %9000 = vst [vmem:[#allocation268_spill] sm:$0xff] %v5540_v44 }
 0x225   :  { %1334 = vrot.lane.b32.xlu2 %v5525_v15, %s4061_s24  ;;  %1338 = vrot.lane.b32.xlu1 %v5528_v50, %s4061_s24  ;;  %9013 = vst [vmem:[#allocation281_spill] sm:$0xff] %v5597_v58 }
 0x227   :  { %v5535_v14 = vpop.permute.xlu2 %955  ;;  %v5537_v23 = vpop.permute.xlu1 %1013 }
 0x228   :  { %8998 = vst [vmem:[#allocation266_spill] sm:$0xff] %v5535_v14  ;;  %1354 = vrot.lane.b32.xlu0 %v5540_v44, %s4061_s24 }
 0x229   :  { %8999 = vst [vmem:[#allocation267_spill] sm:$0xff] %v5537_v23  ;;  %v836_v23 = vrot.slane %v4468_v6, 1  ;;  %v5576_v6 = vsel %vm762_vm3, %v826_v9, %v828_v22  ;;  %v834_v9 = vrot.slane %v4446_v55, 1  ;;  %v856_v22 = vrot.slane %v4885_v46, 1 }
 0x22a   :  { %v5545_v37 = vpop.permute.xlu0 %1017  ;;  %9008 = vst [vmem:[#allocation276_spill] sm:$0xff] %v5576_v6 }
 0x22b   :  { %9001 = vst [vmem:[#allocation269_spill] sm:$0xff] %v5545_v37  ;;  %v5564_v37 = vsel %vm762_vm3, %v836_v23, %v838_v25  ;;  %v5621_v43 = vsel %vm762_vm3, %v834_v9, %v836_v23  ;;  %v846_v23 = vrot.slane %v4721_v20, 1 }
 0x22d   :  { %1340 = vrot.lane.b32.xlu2 %v5549_v17, %s4061_s24  ;;  %1344 = vrot.lane.b32.xlu1 %v5552_v2, %s4061_s24 }
 0x22f   :  { %v5559_v14 = vpop.permute.xlu2 %1210  ;;  %v5561_v1 = vpop.permute.xlu1 %1142 }
 0x230   :  { %9004 = vst [vmem:[#allocation272_spill] sm:$0xff] %v5559_v14  ;;  %1360 = vrot.lane.b32.xlu0 %v5564_v37, %s4061_s24  ;;  %v842_v14 = vrot.slane %v4604_v48, 1  ;;  %v5600_v48 = vsel %vm762_vm3, %v832_v39, %v834_v9  ;;  %v862_v9 = vrot.slane %v4985_v3, 1 }
 0x231   :  { %9005 = vst [vmem:[#allocation273_spill] sm:$0xff] %v5561_v1 }
 0x232   :  { %v5569_v28 = vpop.permute.xlu0 %1146  ;;  %v5645_v46 = vsel %vm762_vm3, %v840_v41, %v842_v14 }
 0x233   :  { %9006 = vst [vmem:[#allocation274_spill] sm:$0xff] %v5569_v28  ;;  %v5588_v28 = vsel %vm762_vm3, %v842_v14, %v844_v30  ;;  %v852_v14 = vrot.slane %v4855_v31, 1 }
 0x234   :  { %9011 = vst [vmem:[#allocation279_spill] sm:$0xff] %v5588_v28 }
 0x235   :  { %1346 = vrot.lane.b32.xlu2 %v5573_v7, %s4061_s24  ;;  %1350 = vrot.lane.b32.xlu1 %v5576_v6, %s4061_s24  ;;  %9022 = vst [vmem:[#allocation290_spill] sm:$0xff] %v5645_v46 }
 0x237   :  { %v5583_v1 = vpop.permute.xlu2 %1021  ;;  %v5585_v4 = vpop.permute.xlu1 %953 }
 0x238   :  { %9009 = vst [vmem:[#allocation277_spill] sm:$0xff] %v5583_v1  ;;  %1366 = vrot.lane.b32.xlu0 %v5588_v28, %s4061_s24  ;;  %v848_v1 = vrot.slane %v4749_v32, 1  ;;  %v5624_v32 = vsel %vm762_vm3, %v838_v25, %v840_v41  ;;  %v868_v41 = vrot.slane %v5077_v19, 1 }
 0x239   :  { %9010 = vst [vmem:[#allocation278_spill] sm:$0xff] %v5585_v4 }
 0x23a   :  { %v5593_v16 = vpop.permute.xlu0 %957  ;;  %v5669_v3 = vsel %vm762_vm3, %v846_v23, %v848_v1 }
 0x23b   :  { %9012 = vst [vmem:[#allocation280_spill] sm:$0xff] %v5593_v16  ;;  %v5612_v16 = vsel %vm762_vm3, %v848_v1, %v850_v35  ;;  %v858_v1 = vrot.slane %v4982_v29, 1  ;;  %v880_v29 = vrot.slane %v5266_v5, 1 }
 0x23c   :  { %9016 = vst [vmem:[#allocation284_spill] sm:$0xff] %v5612_v16 }
 0x23d   :  { %1352 = vrot.lane.b32.xlu2 %v5597_v58, %s4061_s24  ;;  %1356 = vrot.lane.b32.xlu1 %v5600_v48, %s4061_s24  ;;  %9028 = vst [vmem:[#allocation296_spill] sm:$0xff] %v5669_v3 }
 0x23f   :  { %v5607_v4 = vpop.permute.xlu2 %1150  ;;  %v5609_v28 = vpop.permute.xlu1 %1208 }
 0x240   :  { %9014 = vst [vmem:[#allocation282_spill] sm:$0xff] %v5607_v4  ;;  %1372 = vrot.lane.b32.xlu0 %v5612_v16, %s4061_s24 }
 0x241   :  { %9015 = vst [vmem:[#allocation283_spill] sm:$0xff] %v5609_v28  ;;  %v854_v28 = vrot.slane %v4883_v52, 1  ;;  %v5648_v52 = vsel %vm762_vm3, %v844_v30, %v846_v23  ;;  %v874_v23 = vrot.slane %v5172_v49, 1 }
 0x242   :  { %v5617_v39 = vpop.permute.xlu0 %1212  ;;  %9023 = vst [vmem:[#allocation291_spill] sm:$0xff] %v5648_v52 }
 0x243   :  { %9017 = vst [vmem:[#allocation285_spill] sm:$0xff] %v5617_v39  ;;  %v5636_v39 = vsel %vm762_vm3, %v854_v28, %v856_v22  ;;  %v5693_v19 = vsel %vm762_vm3, %v852_v14, %v854_v28  ;;  %v503_v28 = vpop.f32.mrf.mxu3 }
 0x244   :  { %9020 = vst [vmem:[#allocation288_spill] sm:$0xff] %v5636_v39  ;;  %v504_v49 = vadd.f32 %v5164_v61, %v503_v28 }
 0x245   :  { %1358 = vrot.lane.b32.xlu2 %v5621_v43, %s4061_s24  ;;  %1362 = vrot.lane.b32.xlu1 %v5624_v32, %s4061_s24  ;;  %9034 = vst [vmem:[#allocation302_spill] sm:$0xff] %v5693_v19 }
 0x247   :  { %v5631_v4 = vpop.permute.xlu2 %961  ;;  %v5633_v16 = vpop.permute.xlu1 %1019 }
 0x248   :  { %9018 = vst [vmem:[#allocation286_spill] sm:$0xff] %v5631_v4  ;;  %1378 = vrot.lane.b32.xlu0 %v5636_v39, %s4061_s24 }
 0x249   :  { %9019 = vst [vmem:[#allocation287_spill] sm:$0xff] %v5633_v16  ;;  %v860_v16 = vrot.slane %v4996_v24, 1  ;;  %v5672_v24 = vsel %vm762_vm3, %v850_v35, %v852_v14 }
 0x24a   :  { %v5641_v25 = vpop.permute.xlu0 %1023  ;;  %9029 = vst [vmem:[#allocation297_spill] sm:$0xff] %v5672_v24 }
 0x24b   :  { %9021 = vst [vmem:[#allocation289_spill] sm:$0xff] %v5641_v25  ;;  %v5660_v25 = vsel %vm762_vm3, %v860_v16, %v862_v9 }
 0x24c   :  { %9026 = vst [vmem:[#allocation294_spill] sm:$0xff] %v5660_v25 }
 0x24d   :  { %1364 = vrot.lane.b32.xlu2 %v5645_v46, %s4061_s24  ;;  %1368 = vrot.lane.b32.xlu1 %v5648_v52, %s4061_s24  ;;  %v9154_v52 = vld [vmem:[#allocation142_spill] sm:$0xff]  ;;  %v9207_v46 = vld [vmem:[#allocation241_spill] sm:$0xff] }
 0x24f   :  { %v5655_v4 = vpop.permute.xlu2 %1216  ;;  %v5657_v39 = vpop.permute.xlu1 %1148 }
 0x250   :  { %9024 = vst [vmem:[#allocation292_spill] sm:$0xff] %v5655_v4  ;;  %1384 = vrot.lane.b32.xlu0 %v5660_v25, %s4061_s24  ;;  %v866_v4 = vrot.slane %v5086_v40, 1  ;;  %v5696_v40 = vsel %vm762_vm3, %v856_v22, %v858_v1  ;;  %v864_v22 = vrot.slane %v5074_v8, 1 }
 0x251   :  { %9025 = vst [vmem:[#allocation293_spill] sm:$0xff] %v5657_v39 }
 0x252   :  { %v5665_v30 = vpop.permute.xlu0 %1152  ;;  %9035 = vst [vmem:[#allocation303_spill] sm:$0xff] %v5696_v40 }
 0x253   :  { %9027 = vst [vmem:[#allocation295_spill] sm:$0xff] %v5665_v30  ;;  %v5684_v30 = vsel %vm762_vm3, %v866_v4, %v868_v41 }
 0x254   :  { %9032 = vst [vmem:[#allocation300_spill] sm:$0xff] %v5684_v30 }
 0x255   :  { %1370 = vrot.lane.b32.xlu2 %v5669_v3, %s4061_s24  ;;  %1374 = vrot.lane.b32.xlu1 %v5672_v24, %s4061_s24 }
 0x257   :  { %v5679_v39 = vpop.permute.xlu2 %1027  ;;  %v5681_v25 = vpop.permute.xlu1 %959 }
 0x258   :  { %9030 = vst [vmem:[#allocation298_spill] sm:$0xff] %v5679_v39  ;;  %1390 = vrot.lane.b32.xlu0 %v5684_v30, %s4061_s24  ;;  %v872_v39 = vrot.slane %v5181_v51, 1  ;;  %v5718_v51 = vsel %vm762_vm3, %v858_v1, %v860_v16 }
 0x259   :  { %9031 = vst [vmem:[#allocation299_spill] sm:$0xff] %v5681_v25 }
 0x25a   :  { %v5689_v35 = vpop.permute.xlu0 %963  ;;  %9040 = vst [vmem:[#allocation308_spill] sm:$0xff] %v5718_v51 }
 0x25b   :  { %9033 = vst [vmem:[#allocation301_spill] sm:$0xff] %v5689_v35  ;;  %v5708_v35 = vsel %vm762_vm3, %v872_v39, %v874_v23 }
 0x25c   :  { %9038 = vst [vmem:[#allocation306_spill] sm:$0xff] %v5708_v35 }
 0x25d   :  { %1376 = vrot.lane.b32.xlu2 %v5693_v19, %s4061_s24  ;;  %1380 = vrot.lane.b32.xlu1 %v5696_v40, %s4061_s24 }
 0x25f   :  { %v5703_v25 = vpop.permute.xlu2 %1322  ;;  %v5705_v30 = vpop.permute.xlu1 %1214 }
 0x260   :  { %9036 = vst [vmem:[#allocation304_spill] sm:$0xff] %v5703_v25  ;;  %1396 = vrot.lane.b32.xlu0 %v5708_v35, %s4061_s24  ;;  %v878_v35 = vrot.slane %v5275_v11, 1  ;;  %v5728_v25 = vmax.f32 %v504_v49, 0.0  ;;  %v5744_v11 = vsel %vm762_vm3, %v864_v22, %v866_v4 }
 0x261   :  { %9037 = vst [vmem:[#allocation305_spill] sm:$0xff] %v5705_v30  ;;  %v5721_v30 = vsel %vm762_vm3, %v862_v9, %v864_v22  ;;  %v870_v9 = vrot.slane %v5169_v45, 1 }
 0x262   :  { %v5713_v14 = vpop.permute.xlu0 %1318  ;;  %9041 = vst [vmem:[#allocation309_spill] sm:$0xff] %v5721_v30  ;;  %v5735_v16 = vsel %vm762_vm3, %v878_v35, %v880_v29  ;;  %v8662_v5 = vrot.slane %v5728_v25, 1 }
 0x263   :  { %9039 = vst [vmem:[#allocation307_spill] sm:$0xff] %v5713_v14  ;;  %v5747_v49 = vsel %vm762_vm3, %v868_v41, %v870_v9  ;;  %v876_v41 = vrot.slane %v5263_v53, 1 }
 0x264   :  { %9042 = vst [vmem:[#allocation310_spill] sm:$0xff] %v5728_v25 }
 0x265   :  { %1382 = vrot.lane.b32.xlu2 %v5718_v51, %s4061_s24  ;;  %1386 = vrot.lane.b32.xlu1 %v5721_v30, %s4061_s24  ;;  %9045 = vst [vmem:[#allocation313_spill] sm:$0xff] %v5735_v16  ;;  %v9089_v51 = vld [vmem:[#allocation148_spill] sm:$0xff] }
 0x266   :  { %9047 = vst [vmem:[#allocation315_spill] sm:$0xff] %v5744_v11 }
 0x267   :  { %v5730_v8 = vpop.permute.xlu2 %1156  ;;  %v5732_v28 = vpop.permute.xlu1 %1025  ;;  %9048 = vst [vmem:[#allocation316_spill] sm:$0xff] %v5747_v49 }
 0x268   :  { %9043 = vst [vmem:[#allocation311_spill] sm:$0xff] %v5730_v8  ;;  %1402 = vrot.lane.b32.xlu0 %v5735_v16, %s4061_s24 }
 0x269   :  { %9044 = vst [vmem:[#allocation312_spill] sm:$0xff] %v5732_v28  ;;  %v884_v28 = vrot.slane %v5380_v34, 1 }
 0x26a   :  { %v5740_v1 = vpop.permute.xlu0 %969 }
 0x26b   :  { %9046 = vst [vmem:[#allocation314_spill] sm:$0xff] %v5740_v1  ;;  %v5761_v4 = vsel %vm762_vm3, %v884_v28, %v8662_v5 }
 0x26c   :  { %9051 = vst [vmem:[#allocation319_spill] sm:$0xff] %v5761_v4 }
 0x26d   :  { %1388 = vrot.lane.b32.xlu2 %v5744_v11, %s4061_s24  ;;  %1392 = vrot.lane.b32.xlu1 %v5747_v49, %s4061_s24  ;;  %v5769_v49 = vsel %vm762_vm3, %v870_v9, %v872_v39  ;;  %v5772_v11 = vsel %vm762_vm3, %v874_v23, %v876_v41  ;;  %v882_v39 = vrot.slane %v5353_v13, 1  ;;  %v5788_v23 = vsel %vm762_vm3, %v876_v41, %v878_v35 }
 0x26e   :  { %9053 = vst [vmem:[#allocation321_spill] sm:$0xff] %v5769_v49 }
 0x26f   :  { %v5754_v16 = vpop.permute.xlu2 %967  ;;  %v5756_v45 = vpop.permute.xlu1 %1154  ;;  %9054 = vst [vmem:[#allocation322_spill] sm:$0xff] %v5772_v11  ;;  %v5806_v35 = vsel %vm762_vm3, %v882_v39, %v884_v28  ;;  %v9068_v28 = vld [vmem:[#allocation18_spill] sm:$0xff] }
 0x270   :  { %9049 = vst [vmem:[#allocation317_spill] sm:$0xff] %v5754_v16  ;;  %1408 = vrot.lane.b32.xlu0 %v5761_v4, %s4061_s24  ;;  %v5791_v4 = vsel %vm762_vm3, %v880_v29, %v882_v39  ;;  %v9148_v16 = vld [vmem:[#allocation111_spill] sm:$0xff] }
 0x271   :  { %9050 = vst [vmem:[#allocation318_spill] sm:$0xff] %v5756_v45 }
 0x272   :  { %v5766_v22 = vpop.permute.xlu0 %1324  ;;  %9058 = vst [vmem:[#allocation326_spill] sm:$0xff] %v5788_v23 }
 0x273   :  { %9052 = vst [vmem:[#allocation320_spill] sm:$0xff] %v5766_v22 }
 0x274   :  { %9059 = vst [vmem:[#allocation327_spill] sm:$0xff] %v5791_v4 }
 0x275   :  { %1394 = vrot.lane.b32.xlu2 %v5769_v49, %s4061_s24  ;;  %1398 = vrot.lane.b32.xlu1 %v5772_v11, %s4061_s24  ;;  %9063 = vst [vmem:[#allocation331_spill] sm:$0xff] %v5806_v35 }
 0x277   :  { %v5778_v5 = vpop.permute.xlu2 %1328  ;;  %v5780_v45 = vpop.permute.xlu1 %965 }
 0x278   :  { %9055 = vst [vmem:[#allocation323_spill] sm:$0xff] %v5778_v5  ;;  %1478 = vrot.lane.b32.xlu0 %v4380_v26, %s4062_s11  ;;  %v9080_v5 = vld [vmem:[#allocation58_spill] sm:$0xff] }
 0x279   :  { %9056 = vst [vmem:[#allocation324_spill] sm:$0xff] %v5780_v45 }
 0x27a   :  { %v5785_v9 = vpop.permute.xlu0 %1330 }
 0x27b   :  { %9057 = vst [vmem:[#allocation325_spill] sm:$0xff] %v5785_v9  ;;  %v9077_v9 = vld [vmem:[#allocation94_spill] sm:$0xff] }
 0x27d   :  { %1400 = vrot.lane.b32.xlu2 %v5788_v23, %s4061_s24  ;;  %1404 = vrot.lane.b32.xlu1 %v5791_v4, %s4061_s24 }
 0x27f   :  { %v5797_v45 = vpop.permute.xlu2 %1334  ;;  %v5799_v53 = vpop.permute.xlu1 %1320 }
 0x280   :  { %9060 = vst [vmem:[#allocation328_spill] sm:$0xff] %v5797_v45  ;;  %1484 = vrot.lane.b32.xlu0 %v4433_v47, %s4062_s11  ;;  %v9073_v45 = vld [vmem:[#allocation22_spill] sm:$0xff] }
 0x281   :  { %9061 = vst [vmem:[#allocation329_spill] sm:$0xff] %v5799_v53  ;;  %v9086_v53 = vld [vmem:[#allocation88_spill] sm:$0xff] }
 0x282   :  { %v5803_v13 = vpop.permute.xlu0 %1336 }
 0x283   :  { %9062 = vst [vmem:[#allocation330_spill] sm:$0xff] %v5803_v13  ;;  %v9067_v13 = vld [vmem:[#allocation9_spill] sm:$0xff] }
 0x285   :  { %1406 = vrot.lane.b32.xlu2 %v5806_v35, %s4061_s24  ;;  %1474 = vrot.lane.b32.xlu1 %v4268_v42, %s4062_s11  ;;  %v9071_v42 = vld [vmem:[#allocation64_spill] sm:$0xff]  ;;  %s4064_s24 = smov 28  }
 0x287   :  { %v5812_v29 = vpop.permute.xlu2 %1340  ;;  %v5814_v41 = vpop.permute.xlu1 %1326 }
 0x288   :  { %9064 = vst [vmem:[#allocation332_spill] sm:$0xff] %v5812_v29  ;;  %1490 = vrot.lane.b32.xlu0 %v4559_v62, %s4062_s11 }
 0x289   :  { %9065 = vst [vmem:[#allocation333_spill] sm:$0xff] %v5814_v41  ;;  %v9083_v41 = vld [vmem:[#allocation124_spill] sm:$0xff] }
 0x28a   :  { %v5818_v4 = vpop.permute.xlu0 %1342 }
 0x28b   :  { %9066 = vst [vmem:[#allocation334_spill] sm:$0xff] %v5818_v4  ;;  %v9074_v4 = vld [vmem:[#allocation34_spill] sm:$0xff] }
 0x28d   :  { %1476 = vrot.lane.b32.xlu2 %v9067_v13, %s4062_s11  ;;  %1480 = vrot.lane.b32.xlu1 %v9068_v28, %s4062_s11 }
 0x28f   :  { %v5824_v39 = vpop.permute.xlu2 %1346  ;;  %v5826_v35 = vpop.permute.xlu1 %1332 }
 0x290   :  { %9069 = vst [vmem:[#allocation9_spill] sm:$0xff] %v5824_v39  ;;  %1496 = vrot.lane.b32.xlu0 %v9071_v42, %s4062_s11 }
 0x291   :  { %9070 = vst [vmem:[#allocation18_spill] sm:$0xff] %v5826_v35  ;;  %v9079_v35 = vld [vmem:[#allocation36_spill] sm:$0xff] }
 0x292   :  { %v5830_v29 = vpop.permute.xlu0 %1348 }
 0x293   :  { %9072 = vst [vmem:[#allocation64_spill] sm:$0xff] %v5830_v29 }
 0x295   :  { %1482 = vrot.lane.b32.xlu2 %v9073_v45, %s4062_s11  ;;  %1486 = vrot.lane.b32.xlu1 %v9074_v4, %s4062_s11 }
 0x297   :  { %v5836_v23 = vpop.permute.xlu2 %1352  ;;  %v5838_v13 = vpop.permute.xlu1 %1338 }
 0x298   :  { %9075 = vst [vmem:[#allocation22_spill] sm:$0xff] %v5836_v23  ;;  %1502 = vrot.lane.b32.xlu0 %v9077_v9, %s4062_s11  ;;  %v9101_v23 = vld [vmem:[#allocation196_spill] sm:$0xff] }
 0x299   :  { %9076 = vst [vmem:[#allocation34_spill] sm:$0xff] %v5838_v13  ;;  %v9085_v13 = vld [vmem:[#allocation62_spill] sm:$0xff] }
 0x29a   :  { %v5842_v39 = vpop.permute.xlu0 %1354 }
 0x29b   :  { %9078 = vst [vmem:[#allocation94_spill] sm:$0xff] %v5842_v39  ;;  %v9097_v39 = vld [vmem:[#allocation122_spill] sm:$0xff] }
 0x29d   :  { %1488 = vrot.lane.b32.xlu2 %v9079_v35, %s4062_s11  ;;  %1492 = vrot.lane.b32.xlu1 %v9080_v5, %s4062_s11 }
 0x29f   :  { %v5848_v11 = vpop.permute.xlu2 %1358  ;;  %v5850_v49 = vpop.permute.xlu1 %1344 }
 0x2a0   :  { %9081 = vst [vmem:[#allocation36_spill] sm:$0xff] %v5848_v11  ;;  %1508 = vrot.lane.b32.xlu0 %v9083_v41, %s4062_s11  ;;  %v9095_v11 = vld [vmem:[#allocation172_spill] sm:$0xff] }
 0x2a1   :  { %9082 = vst [vmem:[#allocation58_spill] sm:$0xff] %v5850_v49  ;;  %v9091_v49 = vld [vmem:[#allocation92_spill] sm:$0xff] }
 0x2a2   :  { %v5854_v22 = vpop.permute.xlu0 %1360  ;;  %v9141_v41 = vld [vmem:[#allocation136_spill] sm:$0xff] }
 0x2a3   :  { %9084 = vst [vmem:[#allocation335_spill] sm:$0xff] %v5854_v22  ;;  %v9092_v22 = vld [vmem:[#allocation118_spill] sm:$0xff] }
 0x2a5   :  { %1494 = vrot.lane.b32.xlu2 %v9085_v13, %s4062_s11  ;;  %1498 = vrot.lane.b32.xlu1 %v9086_v53, %s4062_s11 }
 0x2a7   :  { %v5860_v14 = vpop.permute.xlu2 %1364  ;;  %v5862_v30 = vpop.permute.xlu1 %1350 }
 0x2a8   :  { %9087 = vst [vmem:[#allocation62_spill] sm:$0xff] %v5860_v14  ;;  %1514 = vrot.lane.b32.xlu0 %v9089_v51, %s4062_s11 }
 0x2a9   :  { %9088 = vst [vmem:[#allocation88_spill] sm:$0xff] %v5862_v30 }
 0x2aa   :  { %v5866_v40 = vpop.permute.xlu0 %1366 }
 0x2ab   :  { %9090 = vst [vmem:[#allocation336_spill] sm:$0xff] %v5866_v40  ;;  %v9098_v40 = vld [vmem:[#allocation147_spill] sm:$0xff] }
 0x2ad   :  { %1500 = vrot.lane.b32.xlu2 %v9091_v49, %s4062_s11  ;;  %1504 = vrot.lane.b32.xlu1 %v9092_v22, %s4062_s11 }
 0x2af   :  { %v5872_v19 = vpop.permute.xlu2 %1370  ;;  %v5874_v31 = vpop.permute.xlu1 %1356 }
 0x2b0   :  { %9093 = vst [vmem:[#allocation92_spill] sm:$0xff] %v5872_v19  ;;  %1520 = vrot.lane.b32.xlu0 %v9095_v11, %s4062_s11 }
 0x2b1   :  { %9094 = vst [vmem:[#allocation118_spill] sm:$0xff] %v5874_v31  ;;  %v9103_v31 = vld [vmem:[#allocation154_spill] sm:$0xff] }
 0x2b2   :  { %v5878_v14 = vpop.permute.xlu0 %1372 }
 0x2b3   :  { %9096 = vst [vmem:[#allocation337_spill] sm:$0xff] %v5878_v14  ;;  %v9104_v14 = vld [vmem:[#allocation171_spill] sm:$0xff] }
 0x2b5   :  { %1506 = vrot.lane.b32.xlu2 %v9097_v39, %s4062_s11  ;;  %1510 = vrot.lane.b32.xlu1 %v9098_v40, %s4062_s11 }
 0x2b7   :  { %v5884_v51 = vpop.permute.xlu2 %1376  ;;  %v5886_v24 = vpop.permute.xlu1 %1362 }
 0x2b8   :  { %9099 = vst [vmem:[#allocation338_spill] sm:$0xff] %v5884_v51  ;;  %1526 = vrot.lane.b32.xlu0 %v9101_v23, %s4062_s11 }
 0x2b9   :  { %9100 = vst [vmem:[#allocation339_spill] sm:$0xff] %v5886_v24  ;;  %v9108_v24 = vld [vmem:[#allocation178_spill] sm:$0xff] }
 0x2ba   :  { %v5890_v19 = vpop.permute.xlu0 %1378 }
 0x2bb   :  { %9102 = vst [vmem:[#allocation340_spill] sm:$0xff] %v5890_v19  ;;  %v9109_v19 = vld [vmem:[#allocation195_spill] sm:$0xff] }
 0x2bd   :  { %1512 = vrot.lane.b32.xlu2 %v9103_v31, %s4062_s11  ;;  %1516 = vrot.lane.b32.xlu1 %v9104_v14, %s4062_s11  ;;  %v9136_v14 = vld [vmem:[#allocation112_spill] sm:$0xff] }
 0x2bf   :  { %v5896_v11 = vpop.permute.xlu2 %1382  ;;  %v5898_v3 = vpop.permute.xlu1 %1368 }
 0x2c0   :  { %9105 = vst [vmem:[#allocation341_spill] sm:$0xff] %v5896_v11  ;;  %1532 = vrot.lane.b32.xlu0 %v5341_v54, %s4062_s11 }
 0x2c1   :  { %9106 = vst [vmem:[#allocation342_spill] sm:$0xff] %v5898_v3  ;;  %v9113_v3 = vld [vmem:[#allocation202_spill] sm:$0xff] }
 0x2c2   :  { %v5902_v51 = vpop.permute.xlu0 %1384 }
 0x2c3   :  { %9107 = vst [vmem:[#allocation343_spill] sm:$0xff] %v5902_v51  ;;  %v9114_v51 = vld [vmem:[#allocation219_spill] sm:$0xff] }
 0x2c5   :  { %1518 = vrot.lane.b32.xlu2 %v9108_v24, %s4062_s11  ;;  %1522 = vrot.lane.b32.xlu1 %v9109_v19, %s4062_s11  ;;  %v9117_v19 = vld [vmem:[#allocation19_spill] sm:$0xff] }
 0x2c7   :  { %v5908_v23 = vpop.permute.xlu2 %1388  ;;  %v5910_v31 = vpop.permute.xlu1 %1374 }
 0x2c8   :  { %9110 = vst [vmem:[#allocation344_spill] sm:$0xff] %v5908_v23  ;;  %1538 = vrot.lane.b32.xlu0 %v5398_v18, %s4062_s11 }
 0x2c9   :  { %9111 = vst [vmem:[#allocation345_spill] sm:$0xff] %v5910_v31  ;;  %v9121_v31 = vld [vmem:[#allocation31_spill] sm:$0xff] }
 0x2ca   :  { %v5914_v11 = vpop.permute.xlu0 %1390 }
 0x2cb   :  { %9112 = vst [vmem:[#allocation346_spill] sm:$0xff] %v5914_v11 }
 0x2cd   :  { %1524 = vrot.lane.b32.xlu2 %v9113_v3, %s4062_s11  ;;  %1528 = vrot.lane.b32.xlu1 %v9114_v51, %s4062_s11 }
 0x2cf   :  { %v5920_v54 = vpop.permute.xlu2 %1394  ;;  %v5922_v24 = vpop.permute.xlu1 %1380 }
 0x2d0   :  { %9115 = vst [vmem:[#allocation347_spill] sm:$0xff] %v5920_v54  ;;  %1544 = vrot.lane.b32.xlu0 %v9117_v19, %s4062_s11 }
 0x2d1   :  { %9116 = vst [vmem:[#allocation348_spill] sm:$0xff] %v5922_v24 }
 0x2d2   :  { %v5926_v23 = vpop.permute.xlu0 %1396 }
 0x2d3   :  { %9118 = vst [vmem:[#allocation19_spill] sm:$0xff] %v5926_v23  ;;  %v9123_v23 = vld [vmem:[#allocation17_spill] sm:$0xff] }
 0x2d5   :  { %1530 = vrot.lane.b32.xlu2 %v5357_v60, %s4062_s11  ;;  %1534 = vrot.lane.b32.xlu1 %v5436_v63, %s4062_s11  ;;  %v9126_v63 = vld [vmem:[#allocation52_spill] sm:$0xff] }
 0x2d7   :  { %v5932_v11 = vpop.permute.xlu2 %1400  ;;  %v5934_v18 = vpop.permute.xlu1 %1386 }
 0x2d8   :  { %9119 = vst [vmem:[#allocation349_spill] sm:$0xff] %v5932_v11  ;;  %1550 = vrot.lane.b32.xlu0 %v9121_v31, %s4062_s11 }
 0x2d9   :  { %9120 = vst [vmem:[#allocation350_spill] sm:$0xff] %v5934_v18  ;;  %v9128_v18 = vld [vmem:[#allocation16_spill] sm:$0xff] }
 0x2da   :  { %v5938_v54 = vpop.permute.xlu0 %1402 }
 0x2db   :  { %9122 = vst [vmem:[#allocation31_spill] sm:$0xff] %v5938_v54  ;;  %v9129_v54 = vld [vmem:[#allocation28_spill] sm:$0xff] }
 0x2dd   :  { %1536 = vrot.lane.b32.xlu2 %v5477_v57, %s4062_s11  ;;  %1540 = vrot.lane.b32.xlu1 %v9123_v23, %s4062_s11  ;;  %v9131_v23 = vld [vmem:[#allocation82_spill] sm:$0xff] }
 0x2df   :  { %v5944_v24 = vpop.permute.xlu2 %1406  ;;  %v5946_v60 = vpop.permute.xlu1 %1392 }
 0x2e0   :  { %9124 = vst [vmem:[#allocation351_spill] sm:$0xff] %v5944_v24  ;;  %1556 = vrot.lane.b32.xlu0 %v9126_v63, %s4062_s11 }
 0x2e1   :  { %9125 = vst [vmem:[#allocation352_spill] sm:$0xff] %v5946_v60  ;;  %v9132_v60 = vld [vmem:[#allocation30_spill] sm:$0xff] }
 0x2e2   :  { %v5950_v11 = vpop.permute.xlu0 %1408 }
 0x2e3   :  { %9127 = vst [vmem:[#allocation353_spill] sm:$0xff] %v5950_v11  ;;  %v9133_v11 = vld [vmem:[#allocation46_spill] sm:$0xff] }
 0x2e5   :  { %1542 = vrot.lane.b32.xlu2 %v9128_v18, %s4062_s11  ;;  %1546 = vrot.lane.b32.xlu1 %v9129_v54, %s4062_s11 }
 0x2e7   :  { %v5956_v51 = vpop.permute.xlu2 %1476  ;;  %v5958_v57 = vpop.permute.xlu1 %1398 }
 0x2e8   :  { %9130 = vst [vmem:[#allocation28_spill] sm:$0xff] %v5958_v57  ;;  %1562 = vrot.lane.b32.xlu0 %v9131_v23, %s4062_s11  ;;  %v9138_v57 = vld [vmem:[#allocation51_spill] sm:$0xff]  ;;  %v9139_v23 = vld [vmem:[#allocation76_spill] sm:$0xff] }
 0x2ea   :  { %v5962_v24 = vpop.permute.xlu0 %1478 }
 0x2ed   :  { %1548 = vrot.lane.b32.xlu2 %v9132_v60, %s4062_s11  ;;  %1552 = vrot.lane.b32.xlu1 %v9133_v11, %s4062_s11 }
 0x2ef   :  { %v5968_v3 = vpop.permute.xlu2 %1482  ;;  %v5970_v18 = vpop.permute.xlu1 %1404 }
 0x2f0   :  { %9134 = vst [vmem:[#allocation30_spill] sm:$0xff] %v5968_v3  ;;  %1568 = vrot.lane.b32.xlu0 %v9136_v14, %s4062_s11  ;;  %v9144_v14 = vld [vmem:[#allocation106_spill] sm:$0xff] }
 0x2f1   :  { %9135 = vst [vmem:[#allocation46_spill] sm:$0xff] %v5970_v18  ;;  %v9143_v18 = vld [vmem:[#allocation81_spill] sm:$0xff] }
 0x2f2   :  { %v5974_v20 = vpop.permute.xlu0 %1484 }
 0x2f3   :  { %9137 = vst [vmem:[#allocation354_spill] sm:$0xff] %v5974_v20 }
 0x2f5   :  { %1554 = vrot.lane.b32.xlu2 %v9138_v57, %s4062_s11  ;;  %1558 = vrot.lane.b32.xlu1 %v9139_v23, %s4062_s11  ;;  %v9146_v23 = vld [vmem:[#allocation160_spill] sm:$0xff]  ;;  %v9201_v57 = vld [vmem:[#allocation229_spill] sm:$0xff] }
 0x2f7   :  { %v5980_v30 = vpop.permute.xlu2 %1488  ;;  %v5982_v1 = vpop.permute.xlu1 %1474 }
 0x2f8   :  { %9140 = vst [vmem:[#allocation355_spill] sm:$0xff] %v5980_v30  ;;  %1574 = vrot.lane.b32.xlu0 %v9141_v41, %s4062_s11  ;;  %v9149_v41 = vld [vmem:[#allocation135_spill] sm:$0xff] }
 0x2fa   :  { %v5986_v40 = vpop.permute.xlu0 %1490 }
 0x2fb   :  { %9142 = vst [vmem:[#allocation356_spill] sm:$0xff] %v5986_v40 }
 0x2fd   :  { %1560 = vrot.lane.b32.xlu2 %v9143_v18, %s4062_s11  ;;  %1564 = vrot.lane.b32.xlu1 %v9144_v14, %s4062_s11  ;;  %v9152_v14 = vld [vmem:[#allocation184_spill] sm:$0xff] }
 0x2ff   :  { %v5992_v29 = vpop.permute.xlu2 %1494  ;;  %v5994_v8 = vpop.permute.xlu1 %1480 }
 0x300   :  { %9145 = vst [vmem:[#allocation357_spill] sm:$0xff] %v5992_v29  ;;  %1580 = vrot.lane.b32.xlu0 %v9146_v23, %s4062_s11  ;;  %v9155_v23 = vld [vmem:[#allocation159_spill] sm:$0xff] }
 0x302   :  { %v5998_v30 = vpop.permute.xlu0 %1496 }
 0x303   :  { %9147 = vst [vmem:[#allocation358_spill] sm:$0xff] %v5998_v30 }
 0x305   :  { %1566 = vrot.lane.b32.xlu2 %v9148_v16, %s4062_s11  ;;  %1570 = vrot.lane.b32.xlu1 %v9149_v41, %s4062_s11  ;;  %v9158_v41 = vld [vmem:[#allocation208_spill] sm:$0xff] }
 0x307   :  { %v6004_v40 = vpop.permute.xlu2 %1500  ;;  %v6006_v18 = vpop.permute.xlu1 %1486 }
 0x308   :  { %9150 = vst [vmem:[#allocation359_spill] sm:$0xff] %v6004_v40  ;;  %1586 = vrot.lane.b32.xlu0 %v9152_v14, %s4062_s11  ;;  %v9160_v14 = vld [vmem:[#allocation166_spill] sm:$0xff] }
 0x309   :  { %9151 = vst [vmem:[#allocation360_spill] sm:$0xff] %v6006_v18  ;;  %v891_v18 = vrot.slane %v5728_v25, 7  ;;  %v9167_v25 = vld [vmem:[#allocation190_spill] sm:$0xff] }
 0x30a   :  { %v6010_v29 = vpop.permute.xlu0 %1502 }
 0x30b   :  { %9153 = vst [vmem:[#allocation361_spill] sm:$0xff] %v6010_v29  ;;  %v9161_v29 = vld [vmem:[#allocation183_spill] sm:$0xff] }
 0x30d   :  { %1572 = vrot.lane.b32.xlu2 %v9154_v52, %s4062_s11  ;;  %1576 = vrot.lane.b32.xlu1 %v9155_v23, %s4062_s11 }
 0x30f   :  { %v6016_v30 = vpop.permute.xlu2 %1506  ;;  %v6018_v16 = vpop.permute.xlu1 %1492 }
 0x310   :  { %9156 = vst [vmem:[#allocation362_spill] sm:$0xff] %v6016_v30  ;;  %1592 = vrot.lane.b32.xlu0 %v9158_v41, %s4062_s11  ;;  %v9164_v30 = vrot.slane %v5380_v34, 7 }
 0x311   :  { %9157 = vst [vmem:[#allocation363_spill] sm:$0xff] %v6018_v16 }
 0x312   :  { %v6022_v40 = vpop.permute.xlu0 %1508  ;;  %v6036_v16 = vsel %vm635_vm2, %v9164_v30, %v891_v18  ;;  %v9171_v30 = vld [vmem:[#allocation13_spill] sm:$0xff] }
 0x313   :  { %9159 = vst [vmem:[#allocation364_spill] sm:$0xff] %v6022_v40 }
 0x314   :  { %9165 = vst [vmem:[#allocation367_spill] sm:$0xff] %v6036_v16 }
 0x315   :  { %1578 = vrot.lane.b32.xlu2 %v9160_v14, %s4062_s11  ;;  %1582 = vrot.lane.b32.xlu1 %v9161_v29, %s4062_s11  ;;  %v9168_v14 = vld [vmem:[#allocation207_spill] sm:$0xff]  ;;  %v506_v29 = vpop.f32.mrf.mxu3 }
 0x316   :  { %v507_v34 = vadd.f32 %v5164_v61, %v506_v29 }
 0x317   :  { %v6029_v52 = vpop.permute.xlu2 %1512  ;;  %v6031_v23 = vpop.permute.xlu1 %1498 }
 0x318   :  { %9162 = vst [vmem:[#allocation365_spill] sm:$0xff] %v6029_v52  ;;  %1598 = vrot.lane.b32.xlu0 %v6036_v16, %s4062_s11 }
 0x319   :  { %9163 = vst [vmem:[#allocation366_spill] sm:$0xff] %v6031_v23 }
 0x31a   :  { %v6040_v41 = vpop.permute.xlu0 %1514 }
 0x31b   :  { %9166 = vst [vmem:[#allocation368_spill] sm:$0xff] %v6040_v41  ;;  %v9173_v41 = vld [vmem:[#allocation214_spill] sm:$0xff] }
 0x31d   :  { %1584 = vrot.lane.b32.xlu2 %v9167_v25, %s4062_s11  ;;  %1588 = vrot.lane.b32.xlu1 %v9168_v14, %s4062_s11  ;;  %v6059_v14 = vmax.f32 %v507_v34, 0.0 }
 0x31f   :  { %v6046_v52 = vpop.permute.xlu2 %1518  ;;  %v6048_v40 = vpop.permute.xlu1 %1504  ;;  %9174 = vst [vmem:[#allocation371_spill] sm:$0xff] %v6059_v14 }
 0x320   :  { %9169 = vst [vmem:[#allocation369_spill] sm:$0xff] %v6046_v52  ;;  %1669 = vrot.lane.b32.xlu0 %v9171_v30, %s4063_s20  ;;  %v8710_v30 = vrot.slane %v6059_v14, 7  ;;  %v9185_v14 = vld [vmem:[#allocation8_spill] sm:$0xff] }
 0x321   :  { %9170 = vst [vmem:[#allocation370_spill] sm:$0xff] %v6048_v40  ;;  %v9177_v40 = vld [vmem:[#allocation25_spill] sm:$0xff] }
 0x322   :  { %v6053_v16 = vpop.permute.xlu0 %1520  ;;  %v6073_v29 = vsel %vm635_vm2, %v891_v18, %v8710_v30  ;;  %v9186_v18 = vld [vmem:[#allocation23_spill] sm:$0xff] }
 0x323   :  { %9172 = vst [vmem:[#allocation13_spill] sm:$0xff] %v6053_v16 }
 0x324   :  { %9179 = vst [vmem:[#allocation374_spill] sm:$0xff] %v6073_v29 }
 0x325   :  { %1590 = vrot.lane.b32.xlu2 %v9173_v41, %s4062_s11  ;;  %1594 = vrot.lane.b32.xlu1 %v5384_v10, %s4062_s11  ;;  %v9180_v10 = vld [vmem:[#allocation238_spill] sm:$0xff] }
 0x327   :  { %v6061_v25 = vpop.permute.xlu2 %1524  ;;  %v6063_v52 = vpop.permute.xlu1 %1510 }
 0x328   :  { %9175 = vst [vmem:[#allocation372_spill] sm:$0xff] %v6061_v25  ;;  %1675 = vrot.lane.b32.xlu0 %v9177_v40, %s4063_s20  ;;  %v9183_v25 = vld [vmem:[#allocation42_spill] sm:$0xff] }
 0x329   :  { %9176 = vst [vmem:[#allocation373_spill] sm:$0xff] %v6063_v52  ;;  %v9195_v52 = vld [vmem:[#allocation102_spill] sm:$0xff] }
 0x32a   :  { %v6068_v61 = vpop.permute.xlu0 %1526 }
 0x32b   :  { %9178 = vst [vmem:[#allocation25_spill] sm:$0xff] %v6068_v61  ;;  %v9191_v61 = vld [vmem:[#allocation24_spill] sm:$0xff] }
 0x32d   :  { %1596 = vrot.lane.b32.xlu2 %v9180_v10, %s4062_s11  ;;  %1600 = vrot.lane.b32.xlu1 %v6073_v29, %s4062_s11  ;;  %v9189_v29 = vld [vmem:[#allocation72_spill] sm:$0xff] }
 0x32f   :  { %v6079_v34 = vpop.permute.xlu2 %1530  ;;  %v6081_v41 = vpop.permute.xlu1 %1516 }
 0x330   :  { %9181 = vst [vmem:[#allocation375_spill] sm:$0xff] %v6079_v34  ;;  %1681 = vrot.lane.b32.xlu0 %v9183_v25, %s4063_s20 }
 0x331   :  { %9182 = vst [vmem:[#allocation376_spill] sm:$0xff] %v6081_v41 }
 0x332   :  { %v6085_v16 = vpop.permute.xlu0 %1532 }
 0x333   :  { %9184 = vst [vmem:[#allocation42_spill] sm:$0xff] %v6085_v16  ;;  %v9192_v16 = vld [vmem:[#allocation37_spill] sm:$0xff] }
 0x335   :  { %1667 = vrot.lane.b32.xlu2 %v9185_v14, %s4063_s20  ;;  %1671 = vrot.lane.b32.xlu1 %v9186_v18, %s4063_s20 }
 0x337   :  { %v6091_v30 = vpop.permute.xlu2 %1536  ;;  %v6093_v10 = vpop.permute.xlu1 %1522 }
 0x338   :  { %9187 = vst [vmem:[#allocation8_spill] sm:$0xff] %v6091_v30  ;;  %1687 = vrot.lane.b32.xlu0 %v9189_v29, %s4063_s20 }
 0x339   :  { %9188 = vst [vmem:[#allocation23_spill] sm:$0xff] %v6093_v10  ;;  %v9197_v10 = vld [vmem:[#allocation40_spill] sm:$0xff] }
 0x33a   :  { %v6097_v34 = vpop.permute.xlu0 %1538 }
 0x33b   :  { %9190 = vst [vmem:[#allocation72_spill] sm:$0xff] %v6097_v34  ;;  %v9198_v34 = vld [vmem:[#allocation63_spill] sm:$0xff] }
 0x33d   :  { %1673 = vrot.lane.b32.xlu2 %v9191_v61, %s4063_s20  ;;  %1677 = vrot.lane.b32.xlu1 %v9192_v16, %s4063_s20 }
 0x33f   :  { %v6103_v41 = vpop.permute.xlu2 %1542  ;;  %v6105_v14 = vpop.permute.xlu1 %1528 }
 0x340   :  { %9193 = vst [vmem:[#allocation24_spill] sm:$0xff] %v6103_v41  ;;  %1693 = vrot.lane.b32.xlu0 %v9195_v52, %s4063_s20 }
 0x341   :  { %9194 = vst [vmem:[#allocation37_spill] sm:$0xff] %v6105_v14  ;;  %v9203_v14 = vld [vmem:[#allocation69_spill] sm:$0xff] }
 0x342   :  { %v6109_v30 = vpop.permute.xlu0 %1544 }
 0x343   :  { %9196 = vst [vmem:[#allocation102_spill] sm:$0xff] %v6109_v30  ;;  %v9204_v30 = vld [vmem:[#allocation93_spill] sm:$0xff] }
 0x345   :  { %1679 = vrot.lane.b32.xlu2 %v9197_v10, %s4063_s20  ;;  %1683 = vrot.lane.b32.xlu1 %v9198_v34, %s4063_s20 }
 0x347   :  { %v6115_v23 = vpop.permute.xlu2 %1548  ;;  %v6117_v39 = vpop.permute.xlu1 %1534 }
 0x348   :  { %9199 = vst [vmem:[#allocation40_spill] sm:$0xff] %v6115_v23  ;;  %1699 = vrot.lane.b32.xlu0 %v9201_v57, %s4063_s20 }
 0x349   :  { %9200 = vst [vmem:[#allocation63_spill] sm:$0xff] %v6117_v39  ;;  %v9209_v39 = vld [vmem:[#allocation99_spill] sm:$0xff] }
 0x34a   :  { %v6121_v41 = vpop.permute.xlu0 %1550 }
 0x34b   :  { %9202 = vst [vmem:[#allocation377_spill] sm:$0xff] %v6121_v41  ;;  %v9210_v41 = vld [vmem:[#allocation123_spill] sm:$0xff] }
 0x34d   :  { %1685 = vrot.lane.b32.xlu2 %v9203_v14, %s4063_s20  ;;  %1689 = vrot.lane.b32.xlu1 %v9204_v30, %s4063_s20 }
 0x34f   :  { %v6127_v20 = vpop.permute.xlu2 %1554  ;;  %v6129_v63 = vpop.permute.xlu1 %1540 }
 0x350   :  { %9205 = vst [vmem:[#allocation69_spill] sm:$0xff] %v6127_v20  ;;  %1705 = vrot.lane.b32.xlu0 %v9207_v46, %s4063_s20 }
 0x351   :  { %9206 = vst [vmem:[#allocation93_spill] sm:$0xff] %v6129_v63  ;;  %v9214_v63 = vld [vmem:[#allocation130_spill] sm:$0xff] }
 0x352   :  { %v6133_v23 = vpop.permute.xlu0 %1556 }
 0x353   :  { %9208 = vst [vmem:[#allocation378_spill] sm:$0xff] %v6133_v23 }
 0x355   :  { %1691 = vrot.lane.b32.xlu2 %v9209_v39, %s4063_s20  ;;  %1695 = vrot.lane.b32.xlu1 %v9210_v41, %s4063_s20 }
 0x357   :  { %v6139_v57 = vpop.permute.xlu2 %1560  ;;  %v6141_v3 = vpop.permute.xlu1 %1546 }
 0x358   :  { %9211 = vst [vmem:[#allocation99_spill] sm:$0xff] %v6139_v57  ;;  %1711 = vrot.lane.b32.xlu0 %v5448_v21, %s4063_s20 }
 0x359   :  { %9212 = vst [vmem:[#allocation123_spill] sm:$0xff] %v6141_v3  ;;  %v9218_v3 = vld [vmem:[#allocation243_spill] sm:$0xff] }
 0x35a   :  { %v6145_v20 = vpop.permute.xlu0 %1562 }
 0x35b   :  { %9213 = vst [vmem:[#allocation379_spill] sm:$0xff] %v6145_v20 }
 0x35d   :  { %1697 = vrot.lane.b32.xlu2 %v9214_v63, %s4063_s20  ;;  %1701 = vrot.lane.b32.xlu1 %v5456_v0, %s4063_s20 }
 0x35f   :  { %v6151_v23 = vpop.permute.xlu2 %1566  ;;  %v6153_v46 = vpop.permute.xlu1 %1552 }
 0x360   :  { %9215 = vst [vmem:[#allocation130_spill] sm:$0xff] %v6151_v23  ;;  %1717 = vrot.lane.b32.xlu0 %v5468_v59, %s4063_s20 }
 0x361   :  { %9216 = vst [vmem:[#allocation380_spill] sm:$0xff] %v6153_v46 }
 0x362   :  { %v6157_v57 = vpop.permute.xlu0 %1568 }
 0x363   :  { %9217 = vst [vmem:[#allocation381_spill] sm:$0xff] %v6157_v57 }
 0x365   :  { %1703 = vrot.lane.b32.xlu2 %v9218_v3, %s4063_s20  ;;  %1707 = vrot.lane.b32.xlu1 %v5480_v33, %s4063_s20 }
 0x367   :  { %v6163_v20 = vpop.permute.xlu2 %1572  ;;  %v6165_v21 = vpop.permute.xlu1 %1558 }
 0x368   :  { %9219 = vst [vmem:[#allocation243_spill] sm:$0xff] %v6163_v20  ;;  %1723 = vrot.lane.b32.xlu0 %v5492_v56, %s4063_s20 }
 0x369   :  { %9220 = vst [vmem:[#allocation382_spill] sm:$0xff] %v6165_v21 }
 0x36a   :  { %v6169_v23 = vpop.permute.xlu0 %1574 }
 0x36b   :  { %9221 = vst [vmem:[#allocation383_spill] sm:$0xff] %v6169_v23 }
 0x36d   :  { %1709 = vrot.lane.b32.xlu2 %v5501_v38, %s4063_s20  ;;  %1713 = vrot.lane.b32.xlu1 %v5504_v27, %s4063_s20 }
 0x36f   :  { %v6175_v57 = vpop.permute.xlu2 %1578  ;;  %v6177_v59 = vpop.permute.xlu1 %1564 }
 0x370   :  { %9222 = vst [vmem:[#allocation384_spill] sm:$0xff] %v6175_v57  ;;  %1729 = vrot.lane.b32.xlu0 %v5516_v36, %s4063_s20 }
 0x371   :  { %9223 = vst [vmem:[#allocation385_spill] sm:$0xff] %v6177_v59  ;;  %v9240_v59 = vld [vmem:[#allocation21_spill] sm:$0xff] }
 0x372   :  { %v6181_v20 = vpop.permute.xlu0 %1580 }
 0x373   :  { %9224 = vst [vmem:[#allocation386_spill] sm:$0xff] %v6181_v20 }
 0x375   :  { %1715 = vrot.lane.b32.xlu2 %v5525_v15, %s4063_s20  ;;  %1719 = vrot.lane.b32.xlu1 %v5528_v50, %s4063_s20 }
 0x377   :  { %v6187_v23 = vpop.permute.xlu2 %1584  ;;  %v6189_v56 = vpop.permute.xlu1 %1570 }
 0x378   :  { %9225 = vst [vmem:[#allocation387_spill] sm:$0xff] %v6187_v23  ;;  %1735 = vrot.lane.b32.xlu0 %v5540_v44, %s4063_s20 }
 0x379   :  { %9226 = vst [vmem:[#allocation388_spill] sm:$0xff] %v6189_v56 }
 0x37a   :  { %v6193_v57 = vpop.permute.xlu0 %1586 }
 0x37b   :  { %9227 = vst [vmem:[#allocation389_spill] sm:$0xff] %v6193_v57 }
 0x37d   :  { %1721 = vrot.lane.b32.xlu2 %v5549_v17, %s4063_s20  ;;  %1725 = vrot.lane.b32.xlu1 %v5552_v2, %s4063_s20 }
 0x37f   :  { %v6199_v20 = vpop.permute.xlu2 %1590  ;;  %v6201_v36 = vpop.permute.xlu1 %1576 }
 0x380   :  { %9228 = vst [vmem:[#allocation390_spill] sm:$0xff] %v6199_v20  ;;  %1741 = vrot.lane.b32.xlu0 %v5564_v37, %s4063_s20  ;;  %v9233_v20 = vld [vmem:[#allocation10_spill] sm:$0xff] }
 0x381   :  { %9229 = vst [vmem:[#allocation391_spill] sm:$0xff] %v6201_v36 }
 0x382   :  { %v6205_v23 = vpop.permute.xlu0 %1592 }
 0x383   :  { %9230 = vst [vmem:[#allocation392_spill] sm:$0xff] %v6205_v23 }
 0x385   :  { %1727 = vrot.lane.b32.xlu2 %v5573_v7, %s4063_s20  ;;  %1731 = vrot.lane.b32.xlu1 %v5576_v6, %s4063_s20 }
 0x387   :  { %v6211_v57 = vpop.permute.xlu2 %1596  ;;  %v6213_v44 = vpop.permute.xlu1 %1582 }
 0x388   :  { %9231 = vst [vmem:[#allocation393_spill] sm:$0xff] %v6211_v57  ;;  %2052 = vrot.lane.b32.xlu0 %v9233_v20, %s4064_s24  ;;  %v9236_v57 = vld [vmem:[#allocation14_spill] sm:$0xff] }
 0x389   :  { %9232 = vst [vmem:[#allocation394_spill] sm:$0xff] %v6213_v44 }
 0x38a   :  { %v6217_v36 = vpop.permute.xlu0 %1598 }
 0x38b   :  { %9234 = vst [vmem:[#allocation10_spill] sm:$0xff] %v6217_v36 }
 0x38d   :  { %1733 = vrot.lane.b32.xlu2 %v5597_v58, %s4063_s20  ;;  %1737 = vrot.lane.b32.xlu1 %v5600_v48, %s4063_s20  ;;  %v9238_v58 = vld [vmem:[#allocation20_spill] sm:$0xff] }
 0x38f   :  { %v6223_v23 = vpop.permute.xlu2 %1667  ;;  %v6225_v56 = vpop.permute.xlu1 %1588 }
 0x390   :  { %9235 = vst [vmem:[#allocation395_spill] sm:$0xff] %v6225_v56  ;;  %2054 = vrot.lane.b32.xlu0 %v9236_v57, %s4064_s24 }
 0x392   :  { %v6229_v44 = vpop.permute.xlu0 %1669 }
 0x395   :  { %1739 = vrot.lane.b32.xlu2 %v5621_v43, %s4063_s20  ;;  %1743 = vrot.lane.b32.xlu1 %v5624_v32, %s4063_s20 }
 0x397   :  { %v6235_v36 = vpop.permute.xlu2 %1673  ;;  %v6237_v6 = vpop.permute.xlu1 %1594 }
 0x398   :  { %9237 = vst [vmem:[#allocation14_spill] sm:$0xff] %v6237_v6  ;;  %2056 = vrot.lane.b32.xlu0 %v9238_v58, %s4064_s24 }
 0x39a   :  { %v6241_v2 = vpop.permute.xlu0 %1675 }
 0x39d   :  { %1860 = vrot.lane.b32.xlu2 %v4380_v26, %s4065_s28  ;;  %2241 = vrot.lane.b32.xlu1 %v9186_v18, %s4066_s29  ;;  %v9241_v18 = vld [vmem:[#allocation29_spill] sm:$0xff] }
 0x39f   :  { %v6247_v56 = vpop.permute.xlu2 %1679  ;;  %v6249_v7 = vpop.permute.xlu1 %1600 }
 0x3a0   :  { %9239 = vst [vmem:[#allocation20_spill] sm:$0xff] %v6249_v7  ;;  %2058 = vrot.lane.b32.xlu0 %v9240_v59, %s4064_s24 }
 0x3a2   :  { %v6253_v6 = vpop.permute.xlu0 %1681 }
 0x3a5   :  { %1862 = vrot.lane.b32.xlu2 %v9068_v28, %s4065_s28  ;;  %2243 = vrot.lane.b32.xlu1 %v9191_v61, %s4066_s29  ;;  %v9243_v61 = vld [vmem:[#allocation32_spill] sm:$0xff] }
 0x3a7   :  { %v6259_v26 = vpop.permute.xlu2 %1685  ;;  %v6261_v50 = vpop.permute.xlu1 %1671 }
 0x3a8   :  { %2060 = vrot.lane.b32.xlu0 %v9241_v18, %s4064_s24 }
 0x3aa   :  { %v6265_v17 = vpop.permute.xlu0 %1687 }
 0x3ad   :  { %1864 = vrot.lane.b32.xlu2 %v9073_v45, %s4065_s28  ;;  %2245 = vrot.lane.b32.xlu1 %v9177_v40, %s4066_s29  ;;  %v9246_v40 = vld [vmem:[#allocation33_spill] sm:$0xff] }
 0x3af   :  { %v6271_v7 = vpop.permute.xlu2 %1691  ;;  %v6273_v28 = vpop.permute.xlu1 %1677 }
 0x3b0   :  { %9242 = vst [vmem:[#allocation21_spill] sm:$0xff] %v6271_v7  ;;  %2062 = vrot.lane.b32.xlu0 %v9243_v61, %s4064_s24  ;;  %v9278_v7 = vld [vmem:[#allocation43_spill] sm:$0xff] }
 0x3b2   :  { %v6277_v21 = vpop.permute.xlu0 %1693 }
 0x3b3   :  { %9244 = vst [vmem:[#allocation29_spill] sm:$0xff] %v6277_v21  ;;  %v9276_v21 = vld [vmem:[#allocation39_spill] sm:$0xff] }
 0x3b5   :  { %1866 = vrot.lane.b32.xlu2 %v4433_v47, %s4065_s28  ;;  %2247 = vrot.lane.b32.xlu1 %v9192_v16, %s4066_s29  ;;  %v9249_v16 = vld [vmem:[#allocation50_spill] sm:$0xff] }
 0x3b7   :  { %v6283_v27 = vpop.permute.xlu2 %1697  ;;  %v6285_v45 = vpop.permute.xlu1 %1683 }
 0x3b8   :  { %9245 = vst [vmem:[#allocation32_spill] sm:$0xff] %v6283_v27  ;;  %2064 = vrot.lane.b32.xlu0 %v9246_v40, %s4064_s24 }
 0x3ba   :  { %v6289_v15 = vpop.permute.xlu0 %1699 }
 0x3bb   :  { %9247 = vst [vmem:[#allocation33_spill] sm:$0xff] %v6289_v15 }
 0x3bd   :  { %1868 = vrot.lane.b32.xlu2 %v9074_v4, %s4065_s28  ;;  %2249 = vrot.lane.b32.xlu1 %v9197_v10, %s4066_s29  ;;  %v9253_v10 = vld [vmem:[#allocation56_spill] sm:$0xff] }
 0x3bf   :  { %v6295_v46 = vpop.permute.xlu2 %1703  ;;  %v6297_v47 = vpop.permute.xlu1 %1689 }
 0x3c0   :  { %9248 = vst [vmem:[#allocation396_spill] sm:$0xff] %v6295_v46  ;;  %2066 = vrot.lane.b32.xlu0 %v9249_v16, %s4064_s24 }
 0x3c2   :  { %v6301_v27 = vpop.permute.xlu0 %1705 }
 0x3c3   :  { %9250 = vst [vmem:[#allocation50_spill] sm:$0xff] %v6301_v27 }
 0x3c5   :  { %1870 = vrot.lane.b32.xlu2 %v9079_v35, %s4065_s28  ;;  %2251 = vrot.lane.b32.xlu1 %v9183_v25, %s4066_s29  ;;  %v9257_v25 = vld [vmem:[#allocation15_spill] sm:$0xff] }
 0x3c7   :  { %v6307_v15 = vpop.permute.xlu2 %1709  ;;  %v6309_v4 = vpop.permute.xlu1 %1695 }
 0x3c8   :  { %9251 = vst [vmem:[#allocation397_spill] sm:$0xff] %v6307_v15  ;;  %2068 = vrot.lane.b32.xlu0 %v9253_v10, %s4064_s24 }
 0x3c9   :  { %9252 = vst [vmem:[#allocation398_spill] sm:$0xff] %v6309_v4 }
 0x3ca   :  { %v6313_v46 = vpop.permute.xlu0 %1711 }
 0x3cb   :  { %9254 = vst [vmem:[#allocation56_spill] sm:$0xff] %v6313_v46 }
 0x3cd   :  { %1872 = vrot.lane.b32.xlu2 %v4559_v62, %s4065_s28  ;;  %2253 = vrot.lane.b32.xlu1 %v9198_v34, %s4066_s29  ;;  %v9261_v34 = vld [vmem:[#allocation57_spill] sm:$0xff] }
 0x3cf   :  { %v6319_v27 = vpop.permute.xlu2 %1715  ;;  %v6321_v35 = vpop.permute.xlu1 %1701 }
 0x3d0   :  { %9255 = vst [vmem:[#allocation399_spill] sm:$0xff] %v6319_v27  ;;  %2118 = vrot.lane.b32.xlu0 %v9257_v25, %s4064_s24 }
 0x3d1   :  { %9256 = vst [vmem:[#allocation400_spill] sm:$0xff] %v6321_v35  ;;  %v9274_v35 = vld [vmem:[#allocation5_spill] sm:$0xff] }
 0x3d2   :  { %v6325_v15 = vpop.permute.xlu0 %1717 }
 0x3d3   :  { %9258 = vst [vmem:[#allocation15_spill] sm:$0xff] %v6325_v15 }
 0x3d5   :  { %1874 = vrot.lane.b32.xlu2 %v9080_v5, %s4065_s28  ;;  %2255 = vrot.lane.b32.xlu1 %v9203_v14, %s4066_s29 }
 0x3d7   :  { %v6331_v46 = vpop.permute.xlu2 %1721  ;;  %v6333_v62 = vpop.permute.xlu1 %1707 }
 0x3d8   :  { %9259 = vst [vmem:[#allocation401_spill] sm:$0xff] %v6331_v46  ;;  %2070 = vrot.lane.b32.xlu0 %v9261_v34, %s4064_s24 }
 0x3d9   :  { %9260 = vst [vmem:[#allocation402_spill] sm:$0xff] %v6333_v62 }
 0x3da   :  { %v6337_v27 = vpop.permute.xlu0 %1723 }
 0x3db   :  { %9262 = vst [vmem:[#allocation57_spill] sm:$0xff] %v6337_v27 }
 0x3dd   :  { %1876 = vrot.lane.b32.xlu2 %v9085_v13, %s4065_s28  ;;  %2257 = vrot.lane.b32.xlu1 %v9189_v29, %s4066_s29  ;;  %v9267_v29 = vld [vmem:[#allocation80_spill] sm:$0xff] }
 0x3df   :  { %v6343_v15 = vpop.permute.xlu2 %1727  ;;  %v6345_v5 = vpop.permute.xlu1 %1713 }
 0x3e0   :  { %9263 = vst [vmem:[#allocation403_spill] sm:$0xff] %v6343_v15  ;;  %2120 = vrot.lane.b32.xlu0 %v4446_v55, %s4064_s24  ;;  %v3082_v15 = vld [vmem:[%s8379_s3 + $0x20] sm:$0xf] }
 0x3e1   :  { %9264 = vst [vmem:[#allocation404_spill] sm:$0xff] %v6345_v5  ;;  %3876 = vmatpush.msk.msra.mxu1 %vm296_vm0, %v3082_v15  ;;  %3948 = vmatpush.msk.msra.mxu2 %vm296_vm0, %v3082_v15  ;;  %v9271_v5 = vld [vmem:[#allocation86_spill] sm:$0xff] }
 0x3e2   :  { %v6349_v14 = vpop.permute.xlu0 %1729 }
 0x3e3   :  { %9265 = vst [vmem:[#allocation405_spill] sm:$0xff] %v6349_v14 }
 0x3e5   :  { %1926 = vrot.lane.b32.xlu2 %v9117_v19, %s4065_s28  ;;  %1878 = vrot.lane.b32.xlu1 %v9071_v42, %s4065_s28  ;;  %v3081_v19 = vld [vmem:[%s8379_s3 + $0x18] sm:$0xff]  ;;  %v3080_v42 = vld [vmem:[%s8379_s3 + $0x10] sm:$0xff] }
 0x3e6   :  { %3294 = vmatpush.msra.mxu1 %v3081_v19  ;;  %3949 = vmatpush.msra.mxu2 %v3081_v19  ;;  %v3079_v19 = vld [vmem:[%s8379_s3 + $0x8] sm:$0xff] }
 0x3e7   :  { %v6355_v27 = vpop.permute.xlu2 %1733  ;;  %v6357_v13 = vpop.permute.xlu1 %1719 }
 0x3e8   :  { %9266 = vst [vmem:[#allocation406_spill] sm:$0xff] %v6357_v13  ;;  %2072 = vrot.lane.b32.xlu0 %v9267_v29, %s4064_s24  ;;  %3295 = vmatpush.msra.mxu1 %v3080_v42  ;;  %v9269_v13 = vld [vmem:[#allocation26_spill] sm:$0xff] }
 0x3e9   :  { %3950 = vmatpush.msra.mxu2 %v3080_v42 }
 0x3ea   :  { %v6366_v14 = vpop.permute.xlu0 %1735  ;;  %3296 = vmatpush.msra.mxu1 %v3079_v19 }
 0x3eb   :  { %3951 = vmatpush.msra.mxu2 %v3079_v19 }
 0x3ed   :  { %2307 = vrot.lane.b32.xlu2 %v5600_v48, %s4066_s29  ;;  %2259 = vrot.lane.b32.xlu1 %v9204_v30, %s4066_s29  ;;  %v3078_v48 = vld [vmem:[%s8379_s3] sm:$0xff] }
 0x3ee   :  { %3297 = vmatpush.msra.mxu1 %v3078_v48  ;;  %3952 = vmatpush.msra.mxu2 %v3078_v48 }
 0x3ef   :  { %v6378_v15 = vpop.permute.xlu2 %1739  ;;  %v6380_v46 = vpop.permute.xlu1 %1725 }
 0x3f0   :  { %9268 = vst [vmem:[#allocation80_spill] sm:$0xff] %v6380_v46  ;;  %2122 = vrot.lane.b32.xlu0 %v9269_v13, %s4064_s24 }
 0x3f2   :  { %v6390_v30 = vpop.permute.xlu0 %1741 }
 0x3f5   :  { %1928 = vrot.lane.b32.xlu2 %v9129_v54, %s4065_s28  ;;  %1880 = vrot.lane.b32.xlu1 %v9086_v53, %s4065_s28  ;;  %v9272_v54 = vld [vmem:[#allocation27_spill] sm:$0xff] }
 0x3f7   :  { %v1861_v42 = vpop.permute.xlu2 %1860  ;;  %v6396_v46 = vpop.permute.xlu1 %1731 }
 0x3f8   :  { %9270 = vst [vmem:[#allocation26_spill] sm:$0xff] %v6396_v46  ;;  %2074 = vrot.lane.b32.xlu0 %v9271_v5, %s4064_s24  ;;  %v9273_v46 = vld [vmem:[#allocation35_spill] sm:$0xff] }
 0x3f9   :  { %v2431_v4 = vsel %vm2430_vm4, %v9274_v35, %v9273_v46 }
 0x3fa   :  { %v2053_v62 = vpop.permute.xlu0 %2052  ;;  %v2496_v5 = vsel %vm2495_vm5, %v2431_v4, %v9276_v21 }
 0x3fb   :  { %v2561_v35 = vsel %vm2560_vm6, %v2496_v5, %v9278_v7  ;;  %v2950_v7 = vld [vmem:[%s8377_s1] sm:$0xff]  ;;  %v9279_v5 = vld [vmem:[#allocation6_spill] sm:$0xff] }
 0x3fd   :  { %2309 = vrot.lane.b32.xlu2 %v5621_v43, %s4066_s29  ;;  %2261 = vrot.lane.b32.xlu1 %v9209_v39, %s4066_s29 }
 0x3ff   :  { %v1863_v19 = vpop.permute.xlu2 %1862  ;;  %v6404_v48 = vpop.permute.xlu1 %1737 }
 0x400   :  { %2124 = vrot.lane.b32.xlu0 %v9272_v54, %s4064_s24  ;;  %v9277_v54 = vld [vmem:[#allocation87_spill] sm:$0xff] }
 0x402   :  { %v2055_v53 = vpop.permute.xlu0 %2054 }
 0x405   :  { %1930 = vrot.lane.b32.xlu2 %v9132_v60, %s4065_s28  ;;  %1882 = vrot.lane.b32.xlu1 %v9091_v49, %s4065_s28  ;;  %v2626_v60 = vsel %vm2625_vm8, %v2561_v35, %v5982_v1  ;;  %v2432_v1 = vsel %vm2430_vm4, %v9279_v5, %v9273_v46 }
 0x406   :  { %v2691_v49 = vsel %vm2690_vm7, %v2626_v60, %v6223_v23 }
 0x407   :  { %v1865_v43 = vpop.permute.xlu2 %1864  ;;  %v6415_v39 = vpop.permute.xlu1 %1743  ;;  %v2756_v4 = vsel %vm2755_vm9, %v2691_v49, %v1861_v42  ;;  %v2497_v42 = vsel %vm2495_vm5, %v2432_v1, %v9276_v21 }
 0x408   :  { %9275 = vst [vmem:[#allocation35_spill] sm:$0xff] %v6415_v39  ;;  %2076 = vrot.lane.b32.xlu0 %v9277_v54, %s4064_s24  ;;  %v2821_v35 = vsel %vm2820_vm10, %v2756_v4, %v2053_v62  ;;  %v9280_v54 = vld [vmem:[#allocation53_spill] sm:$0xff] }
 0x409   :  { %v2562_v39 = vsel %vm2560_vm6, %v2497_v42, %v9280_v54  ;;  %v9281_v62 = vld [vmem:[#allocation49_spill] sm:$0xff]  ;;  %v2952_v42 = vld [vmem:[%s8377_s1 + $0x10] sm:$0xff] }
 0x40a   :  { %v2057_v33 = vpop.permute.xlu0 %2056  ;;  %v2627_v46 = vsel %vm2625_vm8, %v2562_v39, %v5956_v51  ;;  %v2433_v4 = vsel %vm2430_vm4, %v9233_v20, %v9281_v62  ;;  %v2951_v54 = vld [vmem:[%s8377_s1 + $0x8] sm:$0xff]  ;;  %v9282_v20 = vld [vmem:[#allocation47_spill] sm:$0xff] }
 0x40b   :  { %v2692_v5 = vsel %vm2690_vm7, %v2627_v46, %v6229_v44  ;;  %v2498_v1 = vsel %vm2495_vm5, %v2433_v4, %v9282_v20  ;;  %v9285_v46 = vld [vmem:[#allocation60_spill] sm:$0xff] }
 0x40c   :  { %v2757_v21 = vsel %vm2755_vm9, %v2692_v5, %v1863_v19  ;;  %v2434_v62 = vsel %vm2430_vm4, %v9236_v57, %v9285_v46 }
 0x40d   :  { %2311 = vrot.lane.b32.xlu2 %v5564_v37, %s4066_s29  ;;  %2263 = vrot.lane.b32.xlu1 %v9195_v52, %s4066_s29  ;;  %v2822_v51 = vsel %vm2820_vm10, %v2757_v21, %v2055_v53  ;;  %v9287_v21 = vld [vmem:[#allocation38_spill] sm:$0xff] }
 0x40f   :  { %v1867_v23 = vpop.permute.xlu2 %1866  ;;  %v2242_v60 = vpop.permute.xlu1 %2241 }
 0x410   :  { %v2886_v37 = vsel %vm2885_vm11, %v2821_v35, %v2242_v60  ;;  %2126 = vrot.lane.b32.xlu0 %v4572_v12, %s4064_s24  ;;  %v9284_v60 = vld [vmem:[#allocation41_spill] sm:$0xff] }
 0x411   :  { %v3014_v52 = vmul.f32 %v2950_v7, %v2886_v37  ;;  %v2563_v19 = vsel %vm2560_vm6, %v2498_v1, %v9284_v60  ;;  %v2953_v1 = vld [vmem:[%s8377_s1 + $0x18] sm:$0xff] }
 0x412   :  { %v2059_v49 = vpop.permute.xlu0 %2058  ;;  %v2628_v53 = vsel %vm2625_vm8, %v2563_v19, %v5962_v24 }
 0x413   :  { %3877 = vmatmul.msk.f32.vlgmr.msra.gmra.mxu1 %vm103_vm1, %v3014_v52  ;;  %v2693_v37 = vsel %vm2690_vm7, %v2628_v53, %v6261_v50  ;;  %v9291_v53 = vld [vmem:[#allocation61_spill] sm:$0xff] }
 0x414   :  { %v2758_v52 = vsel %vm2755_vm9, %v2693_v37, %v1865_v43  ;;  %v2499_v43 = vsel %vm2495_vm5, %v2434_v62, %v9287_v21  ;;  %v9294_v62 = vld [vmem:[#allocation290_spill] sm:$0xff] }
 0x415   :  { %1932 = vrot.lane.b32.xlu2 %v9121_v31, %s4065_s28  ;;  %1884 = vrot.lane.b32.xlu1 %v9077_v9, %s4065_s28  ;;  %v9283_v31 = vld [vmem:[#allocation110_spill] sm:$0xff]  ;;  %v2823_v24 = vsel %vm2820_vm10, %v2758_v52, %v2057_v33 }
 0x416   :  { %v9292_v52 = vld [vmem:[#allocation90_spill] sm:$0xff] }
 0x417   :  { %v1869_v39 = vpop.permute.xlu2 %1868  ;;  %v2244_v7 = vpop.permute.xlu1 %2243 }
 0x418   :  { %v2887_v44 = vsel %vm2885_vm11, %v2822_v51, %v2244_v7  ;;  %2078 = vrot.lane.b32.xlu0 %v9283_v31, %s4064_s24  ;;  %v9288_v51 = vld [vmem:[#allocation67_spill] sm:$0xff] }
 0x419   :  { %v3015_v35 = vmul.f32 %v2951_v54, %v2887_v44  ;;  %v2564_v7 = vsel %vm2560_vm6, %v2499_v43, %v9288_v51  ;;  %v9289_v44 = vld [vmem:[#allocation78_spill] sm:$0xff]  ;;  %v9296_v51 = vld [vmem:[#allocation84_spill] sm:$0xff] }
 0x41a   :  { %v2061_v9 = vpop.permute.xlu0 %2060  ;;  %v2629_v57 = vsel %vm2625_vm8, %v2564_v7, %v5994_v8 }
 0x41b   :  { %3878 = vmatmul.msk.f32.gmra.mxu1 %vm103_vm1, %v3015_v35  ;;  %v2694_v33 = vsel %vm2690_vm7, %v2629_v57, %v6235_v36  ;;  %v2435_v35 = vsel %vm2430_vm4, %v9238_v58, %v9289_v44  ;;  %v9293_v58 = vld [vmem:[#allocation30_spill] sm:$0xff] }
 0x41c   :  { %v2759_v20 = vsel %vm2755_vm9, %v2694_v33, %v1867_v23  ;;  %v2500_v23 = vsel %vm2495_vm5, %v2435_v35, %v9291_v53  ;;  %v9300_v35 = vld [vmem:[#allocation51_spill] sm:$0xff] }
 0x41d   :  { %2313 = vrot.lane.b32.xlu2 %v5624_v32, %s4066_s29  ;;  %2265 = vrot.lane.b32.xlu1 %v9210_v41, %s4066_s29  ;;  %v9286_v32 = vld [vmem:[#allocation44_spill] sm:$0xff]  ;;  %v2824_v8 = vsel %vm2820_vm10, %v2759_v20, %v2059_v49  ;;  %v9298_v20 = vld [vmem:[#allocation77_spill] sm:$0xff] }
 0x41f   :  { %v1871_v4 = vpop.permute.xlu2 %1870  ;;  %v2246_v50 = vpop.permute.xlu1 %2245 }
 0x420   :  { %v2888_v5 = vsel %vm2885_vm11, %v2823_v24, %v2246_v50  ;;  %2128 = vrot.lane.b32.xlu0 %v9286_v32, %s4064_s24  ;;  %v2954_v50 = vld [vmem:[%s8377_s1 + $0x20] sm:$0xff] }
 0x421   :  { %v3016_v41 = vmul.f32 %v2952_v42, %v2888_v5  ;;  %v2565_v42 = vsel %vm2560_vm6, %v2500_v23, %v9292_v52  ;;  %v9295_v5 = vld [vmem:[#allocation59_spill] sm:$0xff] }
 0x422   :  { %v2063_v54 = vpop.permute.xlu0 %2062  ;;  %v2630_v49 = vsel %vm2625_vm8, %v2565_v42, %v9293_v58  ;;  %v9303_v58 = vld [vmem:[#allocation291_spill] sm:$0xff] }
 0x423   :  { %3879 = vmatmul.msk.f32.gmra.mxu1 %vm103_vm1, %v3016_v41  ;;  %v2695_v46 = vsel %vm2690_vm7, %v2630_v49, %v6241_v2  ;;  %v2436_v41 = vsel %vm2430_vm4, %v9240_v59, %v9295_v5  ;;  %v9299_v59 = vld [vmem:[#allocation354_spill] sm:$0xff] }
 0x424   :  { %v2760_v24 = vsel %vm2755_vm9, %v2695_v46, %v1869_v39  ;;  %v2501_v7 = vsel %vm2495_vm5, %v2436_v41, %v9296_v51  ;;  %v9304_v46 = vld [vmem:[#allocation65_spill] sm:$0xff] }
 0x425   :  { %1934 = vrot.lane.b32.xlu2 %v9133_v11, %s4065_s28  ;;  %1886 = vrot.lane.b32.xlu1 %v9092_v22, %s4065_s28  ;;  %v9290_v11 = vld [vmem:[#allocation116_spill] sm:$0xff]  ;;  %v2825_v21 = vsel %vm2820_vm10, %v2760_v24, %v2061_v9 }
 0x427   :  { %v1873_v60 = vpop.permute.xlu2 %1872  ;;  %v2248_v36 = vpop.permute.xlu1 %2247 }
 0x428   :  { %v2889_v19 = vsel %vm2885_vm11, %v2824_v8, %v2248_v36  ;;  %2080 = vrot.lane.b32.xlu0 %v9290_v11, %s4064_s24  ;;  %v9301_v8 = vld [vmem:[#allocation122_spill] sm:$0xff] }
 0x429   :  { %v3017_v22 = vmul.f32 %v2953_v1, %v2889_v19  ;;  %v2566_v1 = vsel %vm2560_vm6, %v2501_v7, %v9298_v20  ;;  %v2955_v19 = vld [vmem:[%s8377_s1 + $0x28] sm:$0xff]  ;;  %v2956_v7 = vld [vmem:[%s8377_s1 + $0x30] sm:$0xff]  ;;  %v9311_v20 = vld [vmem:[#allocation12_spill] sm:$0xff] }
 0x42a   :  { %v2065_v37 = vpop.permute.xlu0 %2064  ;;  %v2631_v9 = vsel %vm2625_vm8, %v2566_v1, %v9299_v59 }
 0x42b   :  { %3880 = vmatmul.msk.f32.gmra.mxu1 %vm103_vm1, %v3017_v22  ;;  %v2696_v44 = vsel %vm2690_vm7, %v2631_v9, %v6273_v28  ;;  %v9302_v22 = vld [vmem:[#allocation70_spill] sm:$0xff] }
 0x42c   :  { %v2761_v36 = vsel %vm2755_vm9, %v2696_v44, %v1871_v4  ;;  %v2437_v53 = vsel %vm2430_vm4, %v9241_v18, %v9302_v22  ;;  %v9306_v18 = vld [vmem:[#allocation360_spill] sm:$0xff] }
 0x42d   :  { %2315 = vrot.lane.b32.xlu2 %v9294_v62, %s4066_s29  ;;  %2267 = vrot.lane.b32.xlu1 %v9214_v63, %s4066_s29  ;;  %v9297_v63 = vld [vmem:[#allocation52_spill] sm:$0xff]  ;;  %v2826_v23 = vsel %vm2820_vm10, %v2761_v36, %v2063_v54  ;;  %v2502_v4 = vsel %vm2495_vm5, %v2437_v53, %v9304_v46  ;;  %v9313_v36 = vld [vmem:[#allocation311_spill] sm:$0xff] }
 0x42e   :  { %v9314_v22 = vld [vmem:[#allocation120_spill] sm:$0xff] }
 0x42f   :  { %v1875_v43 = vpop.permute.xlu2 %1874  ;;  %v2250_v2 = vpop.permute.xlu1 %2249 }
 0x430   :  { %v2890_v57 = vsel %vm2885_vm11, %v2825_v21, %v2250_v2  ;;  %1938 = vrot.lane.b32.xlu0 %v9297_v63, %s4065_s28  ;;  %v9307_v21 = vld [vmem:[#allocation279_spill] sm:$0xff]  ;;  %v9308_v2 = vld [vmem:[#allocation229_spill] sm:$0xff] }
 0x431   :  { %v3018_v39 = vmul.f32 %v2954_v50, %v2890_v57  ;;  %v9305_v50 = vld [vmem:[#allocation97_spill] sm:$0xff]  ;;  %v9309_v57 = vld [vmem:[#allocation91_spill] sm:$0xff] }
 0x432   :  { %v2067_v33 = vpop.permute.xlu0 %2066  ;;  %v2567_v5 = vsel %vm2560_vm6, %v2502_v4, %v9305_v50  ;;  %v2438_v63 = vsel %vm2430_vm4, %v9243_v61, %v9309_v57  ;;  %v9318_v4 = vld [vmem:[#allocation114_spill] sm:$0xff] }
 0x433   :  { %3881 = vmatmul.msk.f32.gmra.mxu1 %vm103_vm1, %v3018_v39  ;;  %v2632_v54 = vsel %vm2625_vm8, %v2567_v5, %v9306_v18  ;;  %v9310_v39 = vld [vmem:[#allocation317_spill] sm:$0xff]  ;;  %v2439_v50 = vsel %vm2430_vm4, %v9246_v40, %v9318_v4 }
 0x434   :  { %v2697_v41 = vsel %vm2690_vm7, %v2632_v54, %v6247_v56  ;;  %v2464_v56 = vsel %vm2430_vm4, %v9311_v20, %v9310_v39  ;;  %v9319_v54 = vld [vmem:[#allocation45_spill] sm:$0xff]  ;;  %v9321_v39 = vld [vmem:[#allocation147_spill] sm:$0xff] }
 0x435   :  { %1936 = vrot.lane.b32.xlu2 %v9300_v35, %s4065_s28  ;;  %1888 = vrot.lane.b32.xlu1 %v9301_v8, %s4065_s28  ;;  %v2762_v51 = vsel %vm2755_vm9, %v2697_v41, %v1873_v60  ;;  %v9312_v35 = vld [vmem:[#allocation85_spill] sm:$0xff]  ;;  %v2529_v61 = vsel %vm2495_vm5, %v2464_v56, %v9313_v36 }
 0x436   :  { %v2827_v1 = vsel %vm2820_vm10, %v2762_v51, %v2065_v37  ;;  %v2503_v8 = vsel %vm2495_vm5, %v2438_v63, %v9312_v35  ;;  %v2983_v40 = vld [vmem:[%s8377_s1 + $0x108] sm:$0xff] }
 0x437   :  { %v1877_v52 = vpop.permute.xlu2 %1876  ;;  %v2252_v28 = vpop.permute.xlu1 %2251  ;;  %v2568_v53 = vsel %vm2560_vm6, %v2503_v8, %v9314_v22  ;;  %v9324_v8 = vld [vmem:[#allocation124_spill] sm:$0xff]  ;;  %v9325_v36 = vld [vmem:[#allocation117_spill] sm:$0xff]  ;;  %v9326_v22 = vld [vmem:[#allocation314_spill] sm:$0xff] }
 0x438   :  { %v2891_v42 = vsel %vm2885_vm11, %v2826_v23, %v2252_v28  ;;  %2319 = vrot.lane.b32.xlu0 %v9303_v58, %s4066_s29  ;;  %v9315_v23 = vld [vmem:[#allocation64_spill] sm:$0xff]  ;;  %v9316_v28 = vld [vmem:[#allocation355_spill] sm:$0xff] }
 0x439   :  { %v3019_v49 = vmul.f32 %v2955_v19, %v2891_v42  ;;  %v2594_v37 = vsel %vm2560_vm6, %v2529_v61, %v9315_v23  ;;  %v2633_v42 = vsel %vm2625_vm8, %v2568_v53, %v9316_v28  ;;  %v9327_v53 = vld [vmem:[#allocation11_spill] sm:$0xff] }
 0x43a   :  { %v2069_v24 = vpop.permute.xlu0 %2068  ;;  %v2698_v5 = vsel %vm2690_vm7, %v2633_v42, %v6253_v6  ;;  %v2957_v6 = vld [vmem:[%s8377_s1 + $0x38] sm:$0xff]  ;;  %v2465_v23 = vsel %vm2430_vm4, %v9327_v53, %v9326_v22 }
 0x43b   :  { %3882 = vmatmul.msk.f32.gmra.mxu1 %vm103_vm1, %v3019_v49  ;;  %v9317_v49 = vld [vmem:[#allocation93_spill] sm:$0xff]  ;;  %v2763_v41 = vsel %vm2755_vm9, %v2698_v5, %v1875_v43 }
 0x43c   :  { %v2659_v46 = vsel %vm2625_vm8, %v2594_v37, %v9317_v49 }
 0x43d   :  { %2317 = vrot.lane.b32.xlu2 %v9307_v21, %s4066_s29  ;;  %2269 = vrot.lane.b32.xlu1 %v9308_v2, %s4066_s29  ;;  %v2724_v18 = vsel %vm2690_vm7, %v2659_v46, %v6355_v27  ;;  %v2828_v27 = vsel %vm2820_vm10, %v2763_v41, %v2067_v33  ;;  %v9328_v46 = vld [vmem:[#allocation55_spill] sm:$0xff]  ;;  %v9331_v41 = vld [vmem:[#allocation100_spill] sm:$0xff] }
 0x43f   :  { %v1927_v59 = vpop.permute.xlu2 %1926  ;;  %v2254_v9 = vpop.permute.xlu1 %2253 }
 0x440   :  { %v2892_v44 = vsel %vm2885_vm11, %v2827_v1, %v2254_v9  ;;  %1747 = vrot.lane.b32.xlu0 %v9307_v21, %s4063_s20  ;;  %v2789_v21 = vsel %vm2755_vm9, %v2724_v18, %v1927_v59  ;;  %v9322_v9 = vld [vmem:[#allocation107_spill] sm:$0xff]  ;;  %v9330_v18 = vld [vmem:[#allocation24_spill] sm:$0xff] }
 0x441   :  { %v3020_v60 = vmul.f32 %v2956_v7, %v2892_v44  ;;  %v9320_v7 = vld [vmem:[#allocation108_spill] sm:$0xff] }
 0x442   :  { %v2119_v19 = vpop.permute.xlu0 %2118  ;;  %v2504_v57 = vsel %vm2495_vm5, %v2439_v50, %v9320_v7  ;;  %v9323_v44 = vld [vmem:[#allocation356_spill] sm:$0xff] }
 0x443   :  { %3883 = vmatmul.msk.f32.gmra.mxu1 %vm103_vm1, %v3020_v60  ;;  %v2854_v2 = vsel %vm2820_vm10, %v2789_v21, %v2119_v19  ;;  %v2569_v33 = vsel %vm2560_vm6, %v2504_v57, %v9322_v9  ;;  %v2958_v19 = vld [vmem:[%s8377_s1 + $0x40] sm:$0xff]  ;;  %v2440_v21 = vsel %vm2430_vm4, %v9249_v16, %v9331_v41  ;;  %v9333_v16 = vld [vmem:[#allocation95_spill] sm:$0xff] }
 0x444   :  { %v2634_v60 = vsel %vm2625_vm8, %v2569_v33, %v9323_v44  ;;  %v9329_v50 = vld [vmem:[#allocation88_spill] sm:$0xff]  ;;  %v2505_v7 = vsel %vm2495_vm5, %v2440_v21, %v9333_v16  ;;  %v9335_v57 = vld [vmem:[#allocation127_spill] sm:$0xff] }
 0x445   :  { %1745 = vrot.lane.b32.xlu2 %v9294_v62, %s4063_s20  ;;  %2130 = vrot.lane.b32.xlu1 %v9319_v54, %s4064_s24  ;;  %v2699_v35 = vsel %vm2690_vm7, %v2634_v60, %v6285_v45  ;;  %v9337_v44 = vld [vmem:[#allocation68_spill] sm:$0xff] }
 0x446   :  { %v2764_v61 = vsel %vm2755_vm9, %v2699_v35, %v1877_v52  ;;  %v2530_v52 = vsel %vm2495_vm5, %v2465_v23, %v9328_v46  ;;  %v9338_v60 = vld [vmem:[#allocation296_spill] sm:$0xff]  ;;  %v2959_v35 = vld [vmem:[%s8377_s1 + $0x48] sm:$0xff] }
 0x447   :  { %v2308_v62 = vpop.permute.xlu2 %2307  ;;  %v2256_v51 = vpop.permute.xlu1 %2255  ;;  %v2829_v37 = vsel %vm2820_vm10, %v2764_v61, %v2069_v24  ;;  %v2595_v5 = vsel %vm2560_vm6, %v2530_v52, %v9329_v50  ;;  %v9342_v46 = vld [vmem:[#allocation22_spill] sm:$0xff]  ;;  %v2985_v41 = vld [vmem:[%s8377_s1 + $0x118] sm:$0xff] }
 0x448   :  { %v2919_v43 = vsel %vm2885_vm11, %v2854_v2, %v2308_v62  ;;  %v2893_v63 = vsel %vm2885_vm11, %v2828_v27, %v2256_v51  ;;  %1892 = vrot.lane.b32.xlu0 %v9321_v39, %s4065_s28  ;;  %v2660_v24 = vsel %vm2625_vm8, %v2595_v5, %v9330_v18  ;;  %v2984_v27 = vld [vmem:[%s8377_s1 + $0x110] sm:$0xff]  ;;  %v9345_v18 = vld [vmem:[#allocation140_spill] sm:$0xff] }
 0x449   :  { %v3047_v56 = vmul.f32 %v2983_v40, %v2919_v43  ;;  %v3021_v1 = vmul.f32 %v2957_v6, %v2893_v63  ;;  %v9332_v40 = vld [vmem:[#allocation76_spill] sm:$0xff]  ;;  %v2570_v43 = vsel %vm2560_vm6, %v2505_v7, %v9335_v57  ;;  %v9336_v39 = vld [vmem:[#allocation363_spill] sm:$0xff] }
 0x44a   :  { %v2071_v59 = vpop.permute.xlu0 %2070 }
 0x44b   :  { %3884 = vmatmul.msk.f32.gmra.mxu1 %vm103_vm1, %v3021_v1  ;;  %3910 = vmatmul.msk.f32.vlgmr.msra.gmra.mxu2 %vm103_vm1, %v3047_v56  ;;  %v2635_v56 = vsel %vm2625_vm8, %v2570_v43, %v9336_v39  ;;  %v9350_v43 = vld [vmem:[#allocation81_spill] sm:$0xff]  ;;  %v2960_v39 = vld [vmem:[%s8377_s1 + $0x50] sm:$0xff] }
 0x44c   :  { %v2700_v9 = vsel %vm2690_vm7, %v2635_v56, %v6259_v26  ;;  %v9352_v56 = vld [vmem:[#allocation54_spill] sm:$0xff] }
 0x44d   :  { %1890 = vrot.lane.b32.xlu2 %v9324_v8, %s4065_s28  ;;  %2082 = vrot.lane.b32.xlu1 %v9325_v36, %s4064_s24  ;;  %v9339_v8 = vld [vmem:[#allocation71_spill] sm:$0xff] }
 0x44e   :  { %v2466_v61 = vsel %vm2430_vm4, %v9257_v25, %v9339_v8  ;;  %v9343_v25 = vld [vmem:[#allocation102_spill] sm:$0xff] }
 0x44f   :  { %v1929_v28 = vpop.permute.xlu2 %1928  ;;  %v2258_v45 = vpop.permute.xlu1 %2257 }
 0x450   :  { %v2894_v42 = vsel %vm2885_vm11, %v2829_v37, %v2258_v45  ;;  %2273 = vrot.lane.b32.xlu0 %v9218_v3, %s4066_s29  ;;  %v2725_v3 = vsel %vm2690_vm7, %v2660_v24, %v6366_v14  ;;  %v9340_v37 = vld [vmem:[#allocation143_spill] sm:$0xff]  ;;  %v9341_v45 = vld [vmem:[#allocation66_spill] sm:$0xff] }
 0x451   :  { %v3022_v49 = vmul.f32 %v2958_v19, %v2894_v42  ;;  %v2790_v6 = vsel %vm2755_vm9, %v2725_v3, %v1929_v28  ;;  %v2531_v42 = vsel %vm2495_vm5, %v2466_v61, %v9341_v45  ;;  %v9353_v61 = vld [vmem:[#allocation297_spill] sm:$0xff] }
 0x452   :  { %v2121_v4 = vpop.permute.xlu0 %2120  ;;  %v2596_v52 = vsel %vm2560_vm6, %v2531_v42, %v9342_v46  ;;  %v9356_v42 = vld [vmem:[#allocation94_spill] sm:$0xff] }
 0x453   :  { %3885 = vmatmul.msk.f32.gmra.mxu1 %vm103_vm1, %v3022_v49  ;;  %v2855_v2 = vsel %vm2820_vm10, %v2790_v6, %v2121_v4  ;;  %v2661_v4 = vsel %vm2625_vm8, %v2596_v52, %v9343_v25  ;;  %v9358_v52 = vld [vmem:[#allocation284_spill] sm:$0xff]  ;;  %v9359_v25 = vld [vmem:[#allocation241_spill] sm:$0xff] }
 0x454   :  { %v2726_v5 = vsel %vm2690_vm7, %v2661_v4, %v6404_v48  ;;  %v9360_v4 = vld [vmem:[#allocation138_spill] sm:$0xff] }
 0x455   :  { %2271 = vrot.lane.b32.xlu2 %v5456_v0, %s4066_s29  ;;  %1940 = vrot.lane.b32.xlu1 %v9332_v40, %s4065_s28  ;;  %v9334_v0 = vld [vmem:[#allocation74_spill] sm:$0xff] }
 0x457   :  { %v2310_v62 = vpop.permute.xlu2 %2309  ;;  %v1879_v51 = vpop.permute.xlu1 %1878 }
 0x458   :  { %v2920_v14 = vsel %vm2885_vm11, %v2855_v2, %v2310_v62  ;;  %2134 = vrot.lane.b32.xlu0 %v9334_v0, %s4064_s24  ;;  %v2765_v33 = vsel %vm2755_vm9, %v2700_v9, %v1879_v51  ;;  %v9348_v2 = vld [vmem:[#allocation150_spill] sm:$0xff]  ;;  %v9349_v51 = vld [vmem:[#allocation357_spill] sm:$0xff]  ;;  %v2467_v9 = vsel %vm2430_vm4, %v4446_v55, %v9352_v56 }
 0x459   :  { %v3048_v63 = vmul.f32 %v2984_v27, %v2920_v14  ;;  %v2830_v26 = vsel %vm2820_vm10, %v2765_v33, %v2071_v59  ;;  %v9344_v59 = vld [vmem:[#allocation121_spill] sm:$0xff]  ;;  %v9347_v27 = vld [vmem:[#allocation82_spill] sm:$0xff] }
 0x45a   :  { %v2073_v1 = vpop.permute.xlu0 %2072  ;;  %v2441_v50 = vsel %vm2430_vm4, %v9253_v10, %v9344_v59  ;;  %v9346_v10 = vld [vmem:[#allocation115_spill] sm:$0xff] }
 0x45b   :  { %3911 = vmatmul.msk.f32.gmra.mxu2 %vm103_vm1, %v3048_v63  ;;  %v2506_v6 = vsel %vm2495_vm5, %v2441_v50, %v9346_v10  ;;  %v9351_v63 = vld [vmem:[#allocation154_spill] sm:$0xff]  ;;  %v2986_v50 = vld [vmem:[%s8377_s1 + $0x120] sm:$0xff] }
 0x45c   :  { %v9362_v10 = vld [vmem:[#allocation358_spill] sm:$0xff] }
 0x45d   :  { %2132 = vrot.lane.b32.xlu2 %v9337_v44, %s4064_s24  ;;  %2321 = vrot.lane.b32.xlu1 %v9338_v60, %s4066_s29 }
 0x45f   :  { %v1931_v19 = vpop.permute.xlu2 %1930  ;;  %v2260_v22 = vpop.permute.xlu1 %2259 }
 0x460   :  { %v2895_v23 = vsel %vm2885_vm11, %v2830_v26, %v2260_v22  ;;  %2086 = vrot.lane.b32.xlu0 %v9340_v37, %s4064_s24  ;;  %v2791_v24 = vsel %vm2755_vm9, %v2726_v5, %v1931_v19  ;;  %v9354_v26 = vld [vmem:[#allocation48_spill] sm:$0xff] }
 0x461   :  { %v3023_v28 = vmul.f32 %v2959_v35, %v2895_v23  ;;  %v2532_v22 = vsel %vm2495_vm5, %v2467_v9, %v9354_v26  ;;  %v9370_v26 = vld [vmem:[#allocation148_spill] sm:$0xff] }
 0x462   :  { %v2123_v49 = vpop.permute.xlu0 %2122  ;;  %v2597_v55 = vsel %vm2560_vm6, %v2532_v22, %v9356_v42  ;;  %v9371_v22 = vld [vmem:[#allocation141_spill] sm:$0xff] }
 0x463   :  { %3886 = vmatmul.msk.f32.gmra.mxu1 %vm103_vm1, %v3023_v28  ;;  %v2856_v21 = vsel %vm2820_vm10, %v2791_v24, %v2123_v49  ;;  %v9355_v28 = vld [vmem:[#allocation145_spill] sm:$0xff] }
 0x464   :  { %v2442_v45 = vsel %vm2430_vm4, %v9261_v34, %v9355_v28  ;;  %v2987_v28 = vld [vmem:[%s8377_s1 + $0x128] sm:$0xff] }
 0x465   :  { %2084 = vrot.lane.b32.xlu2 %v9345_v18, %s4064_s24  ;;  %1749 = vrot.lane.b32.xlu1 %v9303_v58, %s4063_s20  ;;  %v2571_v58 = vsel %vm2560_vm6, %v2506_v6, %v9348_v2  ;;  %v2507_v34 = vsel %vm2495_vm5, %v2442_v45, %v9360_v4 }
 0x466   :  { %v2636_v16 = vsel %vm2625_vm8, %v2571_v58, %v9349_v51  ;;  %v9363_v58 = vld [vmem:[#allocation75_spill] sm:$0xff] }
 0x467   :  { %v2312_v3 = vpop.permute.xlu2 %2311  ;;  %v1881_v40 = vpop.permute.xlu1 %1880  ;;  %v2701_v14 = vsel %vm2690_vm7, %v2636_v16, %v6265_v17  ;;  %v9364_v51 = vld [vmem:[#allocation79_spill] sm:$0xff] }
 0x468   :  { %v2921_v48 = vsel %vm2885_vm11, %v2856_v21, %v2312_v3  ;;  %1944 = vrot.lane.b32.xlu0 %v9347_v27, %s4065_s28  ;;  %v2766_v57 = vsel %vm2755_vm9, %v2701_v14, %v1881_v40  ;;  %v9361_v21 = vld [vmem:[#allocation137_spill] sm:$0xff]  ;;  %v2468_v16 = vsel %vm2430_vm4, %v9269_v13, %v9364_v51  ;;  %v9368_v13 = vld [vmem:[#allocation40_spill] sm:$0xff] }
 0x469   :  { %v3049_v62 = vmul.f32 %v2985_v41, %v2921_v48  ;;  %v2831_v17 = vsel %vm2820_vm10, %v2766_v57, %v2073_v1  ;;  %v9357_v1 = vld [vmem:[#allocation123_spill] sm:$0xff]  ;;  %v2572_v3 = vsel %vm2560_vm6, %v2507_v34, %v9361_v21 }
 0x46a   :  { %v2075_v7 = vpop.permute.xlu0 %2074  ;;  %v2662_v49 = vsel %vm2625_vm8, %v2597_v55, %v9357_v1  ;;  %v2637_v6 = vsel %vm2625_vm8, %v2572_v3, %v9362_v10  ;;  %v9379_v21 = vld [vmem:[#allocation27_spill] sm:$0xff] }
 0x46b   :  { %3912 = vmatmul.msk.f32.gmra.mxu2 %vm103_vm1, %v3049_v62  ;;  %v2727_v46 = vsel %vm2690_vm7, %v2662_v49, %v6378_v15  ;;  %v2702_v27 = vsel %vm2690_vm7, %v2637_v6, %v6297_v47  ;;  %v2961_v62 = vld [vmem:[%s8377_s1 + $0x58] sm:$0xff]  ;;  %v9373_v49 = vld [vmem:[#allocation158_spill] sm:$0xff] }
 0x46d   :  { %1942 = vrot.lane.b32.xlu2 %v9350_v43, %s4065_s28  ;;  %1894 = vrot.lane.b32.xlu1 %v9351_v63, %s4065_s28  ;;  %v9365_v63 = vld [vmem:[#allocation171_spill] sm:$0xff] }
 0x46f   :  { %v1933_v33 = vpop.permute.xlu2 %1932  ;;  %v2262_v35 = vpop.permute.xlu1 %2261 }
 0x470   :  { %v2896_v8 = vsel %vm2885_vm11, %v2831_v17, %v2262_v35  ;;  %2325 = vrot.lane.b32.xlu0 %v9353_v61, %s4066_s29  ;;  %v2792_v59 = vsel %vm2755_vm9, %v2727_v46, %v1933_v33  ;;  %v9367_v33 = vld [vmem:[#allocation118_spill] sm:$0xff] }
 0x471   :  { %v3024_v19 = vmul.f32 %v2960_v39, %v2896_v8  ;;  %v9366_v39 = vld [vmem:[#allocation73_spill] sm:$0xff] }
 0x472   :  { %v2125_v23 = vpop.permute.xlu0 %2124  ;;  %v2533_v56 = vsel %vm2495_vm5, %v2468_v16, %v9366_v39  ;;  %v9381_v16 = vld [vmem:[#allocation96_spill] sm:$0xff]  ;;  %v9385_v39 = vld [vmem:[#allocation86_spill] sm:$0xff] }
 0x473   :  { %3887 = vmatmul.msk.f32.gmra.mxu1 %vm103_vm1, %v3024_v19  ;;  %v2857_v5 = vsel %vm2820_vm10, %v2792_v59, %v2125_v23  ;;  %v2598_v17 = vsel %vm2560_vm6, %v2533_v56, %v9367_v33  ;;  %v9375_v59 = vld [vmem:[#allocation21_spill] sm:$0xff] }
 0x474   :  { %v2663_v35 = vsel %vm2625_vm8, %v2598_v17, %v9368_v13  ;;  %v9387_v17 = vld [vmem:[#allocation98_spill] sm:$0xff] }
 0x475   :  { %2323 = vrot.lane.b32.xlu2 %v9358_v52, %s4066_s29  ;;  %2275 = vrot.lane.b32.xlu1 %v9359_v25, %s4066_s29  ;;  %v2728_v19 = vsel %vm2690_vm7, %v2663_v35, %v6390_v30  ;;  %v9374_v25 = vld [vmem:[#allocation366_spill] sm:$0xff] }
 0x476   :  { %v9388_v13 = vld [vmem:[#allocation302_spill] sm:$0xff] }
 0x477   :  { %v2314_v24 = vpop.permute.xlu2 %2313  ;;  %v1883_v41 = vpop.permute.xlu1 %1882 }
 0x478   :  { %v2922_v15 = vsel %vm2885_vm11, %v2857_v5, %v2314_v24  ;;  %1753 = vrot.lane.b32.xlu0 %v9358_v52, %s4063_s20  ;;  %v2767_v2 = vsel %vm2755_vm9, %v2702_v27, %v1883_v41  ;;  %v9376_v24 = vld [vmem:[#allocation254_spill] sm:$0xff]  ;;  %v2962_v41 = vld [vmem:[%s8377_s1 + $0x60] sm:$0xff] }
 0x479   :  { %v3050_v40 = vmul.f32 %v2986_v50, %v2922_v15  ;;  %v2832_v47 = vsel %vm2820_vm10, %v2767_v2, %v2075_v7  ;;  %v9369_v7 = vld [vmem:[#allocation132_spill] sm:$0xff]  ;;  %v9378_v15 = vld [vmem:[#allocation101_spill] sm:$0xff] }
 0x47a   :  { %v2077_v48 = vpop.permute.xlu0 %2076  ;;  %v2443_v8 = vsel %vm2430_vm4, %v9267_v29, %v9369_v7  ;;  %v9372_v29 = vld [vmem:[#allocation125_spill] sm:$0xff]  ;;  %v2469_v3 = vsel %vm2430_vm4, %v9379_v21, %v9378_v15  ;;  %v9380_v2 = vld [vmem:[#allocation104_spill] sm:$0xff]  ;;  %v2988_v7 = vld [vmem:[%s8377_s1 + $0x130] sm:$0xff] }
 0x47b   :  { %3913 = vmatmul.msk.f32.gmra.mxu2 %vm103_vm1, %v3050_v40  ;;  %v2508_v1 = vsel %vm2495_vm5, %v2443_v8, %v9372_v29  ;;  %v9391_v29 = vld [vmem:[#allocation181_spill] sm:$0xff]  ;;  %v9395_v21 = vld [vmem:[#allocation112_spill] sm:$0xff] }
 0x47c   :  { %v2573_v46 = vsel %vm2560_vm6, %v2508_v1, %v9373_v49  ;;  %v9392_v49 = vld [vmem:[#allocation359_spill] sm:$0xff] }
 0x47d   :  { %1751 = vrot.lane.b32.xlu2 %v9338_v60, %s4063_s20  ;;  %2136 = vrot.lane.b32.xlu1 %v9363_v58, %s4064_s24  ;;  %v2638_v4 = vsel %vm2625_vm8, %v2573_v46, %v9374_v25  ;;  %v9393_v25 = vld [vmem:[#allocation29_spill] sm:$0xff] }
 0x47e   :  { %v2703_v50 = vsel %vm2690_vm7, %v2638_v4, %v9375_v59 }
 0x47f   :  { %v1935_v14 = vpop.permute.xlu2 %1934  ;;  %v2264_v57 = vpop.permute.xlu1 %2263 }
 0x480   :  { %v2897_v43 = vsel %vm2885_vm11, %v2832_v47, %v2264_v57  ;;  %1898 = vrot.lane.b32.xlu0 %v9365_v63, %s4065_s28  ;;  %v2793_v23 = vsel %vm2755_vm9, %v2728_v19, %v1935_v14  ;;  %v2534_v14 = vsel %vm2495_vm5, %v2469_v3, %v9381_v16  ;;  %v9382_v57 = vld [vmem:[#allocation36_spill] sm:$0xff]  ;;  %v9383_v63 = vld [vmem:[#allocation377_spill] sm:$0xff] }
 0x481   :  { %v3025_v60 = vmul.f32 %v2961_v62, %v2897_v43  ;;  %v2599_v43 = vsel %vm2560_vm6, %v2534_v14, %v9382_v57  ;;  %v9400_v16 = vld [vmem:[#allocation169_spill] sm:$0xff] }
 0x482   :  { %v2127_v9 = vpop.permute.xlu0 %2126 }
 0x483   :  { %3888 = vmatmul.msk.f32.gmra.mxu1 %vm103_vm1, %v3025_v60  ;;  %v2858_v45 = vsel %vm2820_vm10, %v2793_v23, %v2127_v9  ;;  %v9384_v60 = vld [vmem:[#allocation151_spill] sm:$0xff]  ;;  %v9389_v23 = vld [vmem:[#allocation146_spill] sm:$0xff] }
 0x484   :  { %v2444_v56 = vsel %vm2430_vm4, %v9385_v39, %v9384_v60  ;;  %v9386_v9 = vld [vmem:[#allocation35_spill] sm:$0xff]  ;;  %v9403_v60 = vld [vmem:[#allocation361_spill] sm:$0xff] }
 0x485   :  { %1896 = vrot.lane.b32.xlu2 %v9370_v26, %s4065_s28  ;;  %2088 = vrot.lane.b32.xlu1 %v9371_v22, %s4064_s24 }
 0x487   :  { %v2316_v42 = vpop.permute.xlu2 %2315  ;;  %v1885_v55 = vpop.permute.xlu1 %1884 }
 0x488   :  { %v2923_v30 = vsel %vm2885_vm11, %v2858_v45, %v2316_v42  ;;  %2279 = vrot.lane.b32.xlu0 %v5501_v38, %s4066_s29  ;;  %v2768_v5 = vsel %vm2755_vm9, %v2703_v50, %v1885_v55  ;;  %v9377_v38 = vld [vmem:[#allocation106_spill] sm:$0xff]  ;;  %v9390_v42 = vld [vmem:[#allocation167_spill] sm:$0xff]  ;;  %v9394_v50 = vld [vmem:[#allocation164_spill] sm:$0xff] }
 0x489   :  { %v3051_v52 = vmul.f32 %v2987_v28, %v2923_v30  ;;  %v2833_v10 = vsel %vm2820_vm10, %v2768_v5, %v2077_v48  ;;  %v2664_v48 = vsel %vm2625_vm8, %v2599_v43, %v9383_v63  ;;  %v2509_v28 = vsel %vm2495_vm5, %v2444_v56, %v9389_v23  ;;  %v2963_v5 = vld [vmem:[%s8377_s1 + $0x68] sm:$0xff]  ;;  %v9401_v43 = vld [vmem:[#allocation303_spill] sm:$0xff]  ;;  %v9402_v63 = vld [vmem:[#allocation168_spill] sm:$0xff] }
 0x48a   :  { %v2079_v34 = vpop.permute.xlu0 %2078  ;;  %v2729_v33 = vsel %vm2690_vm7, %v2664_v48, %v9386_v9  ;;  %v2574_v1 = vsel %vm2560_vm6, %v2509_v28, %v9391_v29  ;;  %v9407_v29 = vld [vmem:[#allocation89_spill] sm:$0xff] }
 0x48b   :  { %3914 = vmatmul.msk.f32.gmra.mxu2 %vm103_vm1, %v3051_v52  ;;  %v2639_v46 = vsel %vm2625_vm8, %v2574_v1, %v9392_v49  ;;  %v2470_v1 = vsel %vm2430_vm4, %v4572_v12, %v9407_v29  ;;  %v2965_v29 = vld [vmem:[%s8377_s1 + $0x78] sm:$0xff] }
 0x48c   :  { %v2704_v4 = vsel %vm2690_vm7, %v2639_v46, %v9393_v25  ;;  %v9408_v25 = vld [vmem:[#allocation83_spill] sm:$0xff] }
 0x48d   :  { %2277 = vrot.lane.b32.xlu2 %v9376_v24, %s4066_s29  ;;  %1946 = vrot.lane.b32.xlu1 %v9377_v38, %s4065_s28 }
 0x48f   :  { %v1937_v40 = vpop.permute.xlu2 %1936  ;;  %v2266_v6 = vpop.permute.xlu1 %2265 }
 0x490   :  { %v2898_v27 = vsel %vm2885_vm11, %v2833_v10, %v2266_v6  ;;  %2140 = vrot.lane.b32.xlu0 %v9380_v2, %s4064_s24  ;;  %v6844_v62 = vpop.f32.mrf.mxu1  ;;  %v2794_v35 = vsel %vm2755_vm9, %v2729_v33, %v1937_v40  ;;  %v9396_v6 = vld [vmem:[#allocation174_spill] sm:$0xff] }
 0x491   :  { %v3026_v51 = vmul.f32 %v2962_v41, %v2898_v27  ;;  %v9397_v27 = vld [vmem:[#allocation87_spill] sm:$0xff]  ;;  %v9404_v33 = vld [vmem:[#allocation398_spill] sm:$0xff] }
 0x492   :  { %v2129_v47 = vpop.permute.xlu0 %2128 }
 0x493   :  { %3889 = vmatmul.msk.f32.gmra.mxu1 %vm103_vm1, %v3026_v51  ;;  %v2859_v8 = vsel %vm2820_vm10, %v2794_v35, %v2129_v47  ;;  %v9398_v51 = vld [vmem:[#allocation111_spill] sm:$0xff] }
 0x495   :  { %2138 = vrot.lane.b32.xlu2 %v9387_v17, %s4064_s24  ;;  %2327 = vrot.lane.b32.xlu1 %v9388_v13, %s4066_s29 }
 0x497   :  { %v2318_v19 = vpop.permute.xlu2 %2317  ;;  %v1887_v26 = vpop.permute.xlu1 %1886 }
 0x498   :  { %v2924_v45 = vsel %vm2885_vm11, %v2859_v8, %v2318_v19  ;;  %2092 = vrot.lane.b32.xlu0 %v9390_v42, %s4064_s24  ;;  %v6872_v55 = vpop.f32.mrf.mxu1  ;;  %v2769_v59 = vsel %vm2755_vm9, %v2704_v4, %v1887_v26  ;;  %v9405_v8 = vld [vmem:[#allocation288_spill] sm:$0xff]  ;;  %v9406_v19 = vld [vmem:[#allocation247_spill] sm:$0xff]  ;;  %v2535_v4 = vsel %vm2495_vm5, %v2470_v1, %v9408_v25 }
 0x499   :  { %v3052_v30 = vmul.f32 %v2988_v7, %v2924_v45  ;;  %v2834_v38 = vsel %vm2820_vm10, %v2769_v59, %v2079_v34  ;;  %v9399_v34 = vld [vmem:[#allocation178_spill] sm:$0xff]  ;;  %v9409_v59 = vld [vmem:[#allocation335_spill] sm:$0xff] }
 0x49a   :  { %v2081_v52 = vpop.permute.xlu0 %2080  ;;  %v2964_v26 = vld [vmem:[%s8377_s1 + $0x70] sm:$0xff] }
 0x49b   :  { %3915 = vmatmul.msk.f32.gmra.mxu2 %vm103_vm1, %v3052_v30 }
 0x49d   :  { %2090 = vrot.lane.b32.xlu2 %v9394_v50, %s4064_s24  ;;  %1755 = vrot.lane.b32.xlu1 %v9353_v61, %s4063_s20  ;;  %v2445_v61 = vsel %vm2430_vm4, %v9397_v27, %v9396_v6  ;;  %v2989_v27 = vld [vmem:[%s8377_s1 + $0x138] sm:$0xff] }
 0x49e   :  { %v2510_v14 = vsel %vm2495_vm5, %v2445_v61, %v9400_v16  ;;  %v9412_v61 = vld [vmem:[#allocation161_spill] sm:$0xff] }
 0x49f   :  { %v1746_v24 = vpop.permute.xlu2 %1745  ;;  %v2268_v41 = vpop.permute.xlu1 %2267  ;;  %v2575_v48 = vsel %vm2560_vm6, %v2510_v14, %v9402_v63  ;;  %v9415_v63 = vld [vmem:[#allocation187_spill] sm:$0xff] }
 0x4a0   :  { %v2899_v15 = vsel %vm2885_vm11, %v2834_v38, %v2268_v41  ;;  %1950 = vrot.lane.b32.xlu0 %v9395_v21, %s4065_s28  ;;  %v6893_v3 = vpop.f32.mrf.mxu1  ;;  %v2640_v39 = vsel %vm2625_vm8, %v2575_v48, %v9403_v60  ;;  %v9410_v38 = vld [vmem:[#allocation380_spill] sm:$0xff]  ;;  %v9411_v41 = vld [vmem:[#allocation105_spill] sm:$0xff]  ;;  %v9416_v60 = vld [vmem:[#allocation370_spill] sm:$0xff] }
 0x4a1   :  { %v3027_v40 = vmul.f32 %v2963_v5, %v2899_v15  ;;  %v2705_v35 = vsel %vm2690_vm7, %v2640_v39, %v9404_v33  ;;  %v9417_v39 = vld [vmem:[#allocation172_spill] sm:$0xff]  ;;  %v9418_v33 = vld [vmem:[#allocation165_spill] sm:$0xff] }
 0x4a2   :  { %v1939_v10 = vpop.permute.xlu0 %1938 }
 0x4a3   :  { %3890 = vmatmul.msk.f32.gmra.mxu1 %vm103_vm1, %v3027_v40 }
 0x4a5   :  { %1948 = vrot.lane.b32.xlu2 %v9398_v51, %s4065_s28  ;;  %1900 = vrot.lane.b32.xlu1 %v9399_v34, %s4065_s28  ;;  %v2446_v51 = vsel %vm2430_vm4, %v9283_v31, %v9412_v61 }
 0x4a7   :  { %v1891_v47 = vpop.permute.xlu2 %1890  ;;  %v1889_v57 = vpop.permute.xlu1 %1888 }
 0x4a8   :  { %2331 = vrot.lane.b32.xlu0 %v9401_v43, %s4066_s29  ;;  %v6911_v56 = vpop.f32.mrf.mxu1  ;;  %v2770_v7 = vsel %vm2755_vm9, %v2705_v35, %v1889_v57 }
 0x4a9   :  { %v2835_v28 = vsel %vm2820_vm10, %v2770_v7, %v2081_v52  ;;  %v2600_v52 = vsel %vm2560_vm6, %v2535_v4, %v9409_v59  ;;  %v9420_v7 = vld [vmem:[#allocation32_spill] sm:$0xff]  ;;  %v9423_v4 = vld [vmem:[#allocation210_spill] sm:$0xff] }
 0x4aa   :  { %v2320_v9 = vpop.permute.xlu0 %2319  ;;  %v2665_v12 = vsel %vm2625_vm8, %v2600_v52, %v9410_v38  ;;  %v9424_v38 = vld [vmem:[#allocation362_spill] sm:$0xff] }
 0x4ab   :  { %v2730_v15 = vsel %vm2690_vm7, %v2665_v12, %v1746_v24 }
 0x4ac   :  { %v2795_v21 = vsel %vm2755_vm9, %v2730_v15, %v1939_v10  ;;  %v9414_v10 = vld [vmem:[#allocation156_spill] sm:$0xff]  ;;  %v9425_v15 = vld [vmem:[#allocation33_spill] sm:$0xff] }
 0x4ad   :  { %2329 = vrot.lane.b32.xlu2 %v9405_v8, %s4066_s29  ;;  %2281 = vrot.lane.b32.xlu1 %v9406_v19, %s4066_s29  ;;  %v2511_v57 = vsel %vm2495_vm5, %v2446_v51, %v9414_v10  ;;  %v9428_v51 = vld [vmem:[#allocation135_spill] sm:$0xff] }
 0x4ae   :  { %v2576_v48 = vsel %vm2560_vm6, %v2511_v57, %v9415_v63  ;;  %v9429_v57 = vld [vmem:[#allocation103_spill] sm:$0xff] }
 0x4af   :  { %v2272_v23 = vpop.permute.xlu2 %2271  ;;  %v2270_v45 = vpop.permute.xlu1 %2269  ;;  %v2641_v31 = vsel %vm2625_vm8, %v2576_v48, %v9416_v60  ;;  %v9430_v63 = vld [vmem:[#allocation131_spill] sm:$0xff] }
 0x4b0   :  { %v2900_v30 = vsel %vm2885_vm11, %v2835_v28, %v2270_v45  ;;  %1759 = vrot.lane.b32.xlu0 %v9405_v8, %s4063_s20  ;;  %v6935_v5 = vpop.f32.mrf.mxu1  ;;  %v2706_v8 = vsel %vm2690_vm7, %v2641_v31, %v9420_v7  ;;  %v9431_v48 = vld [vmem:[#allocation339_spill] sm:$0xff]  ;;  %v9432_v31 = vld [vmem:[#allocation69_spill] sm:$0xff] }
 0x4b1   :  { %v3028_v49 = vmul.f32 %v2964_v26, %v2900_v30  ;;  %v2771_v26 = vsel %vm2755_vm9, %v2706_v8, %v1891_v47  ;;  %v9421_v30 = vld [vmem:[#allocation264_spill] sm:$0xff] }
 0x4b2   :  { %v1748_v46 = vpop.permute.xlu0 %1747 }
 0x4b3   :  { %3891 = vmatmul.msk.f32.gmra.mxu1 %vm103_vm1, %v3028_v49  ;;  %v9422_v49 = vld [vmem:[#allocation175_spill] sm:$0xff] }
 0x4b5   :  { %1757 = vrot.lane.b32.xlu2 %v9388_v13, %s4063_s20  ;;  %2142 = vrot.lane.b32.xlu1 %v9411_v41, %s4064_s24  ;;  %v9413_v13 = vld [vmem:[#allocation195_spill] sm:$0xff] }
 0x4b7   :  { %v2133_v40 = vpop.permute.xlu2 %2132  ;;  %v2131_v6 = vpop.permute.xlu1 %2130 }
 0x4b8   :  { %v2860_v34 = vsel %vm2820_vm10, %v2795_v21, %v2131_v6  ;;  %1904 = vrot.lane.b32.xlu0 %v9413_v13, %s4065_s28  ;;  %v6971_v19 = vpop.f32.mrf.mxu1  ;;  %v9426_v6 = vld [vmem:[#allocation109_spill] sm:$0xff] }
 0x4b9   :  { %v2925_v16 = vsel %vm2885_vm11, %v2860_v34, %v2320_v9  ;;  %v9419_v9 = vld [vmem:[#allocation182_spill] sm:$0xff]  ;;  %v2966_v13 = vld [vmem:[%s8377_s1 + $0x80] sm:$0xff] }
 0x4ba   :  { %v1893_v24 = vpop.permute.xlu0 %1892  ;;  %v3053_v14 = vmul.f32 %v2989_v27, %v2925_v16  ;;  %v2447_v35 = vsel %vm2430_vm4, %v9290_v11, %v9419_v9  ;;  %v2471_v27 = vsel %vm2430_vm4, %v9286_v32, %v9426_v6 }
 0x4bb   :  { %v2512_v11 = vsel %vm2495_vm5, %v2447_v35, %v9422_v49  ;;  %v2536_v32 = vsel %vm2495_vm5, %v2471_v27, %v9429_v57  ;;  %v9435_v49 = vld [vmem:[#allocation191_spill] sm:$0xff] }
 0x4bc   :  { %3916 = vmatmul.msk.f32.gmra.mxu2 %vm103_vm1, %v3053_v14  ;;  %v2577_v59 = vsel %vm2560_vm6, %v2512_v11, %v9423_v4  ;;  %v2601_v60 = vsel %vm2560_vm6, %v2536_v32, %v9431_v48  ;;  %v9442_v32 = vld [vmem:[#allocation205_spill] sm:$0xff] }
 0x4bd   :  { %1902 = vrot.lane.b32.xlu2 %v9417_v39, %s4065_s28  ;;  %2094 = vrot.lane.b32.xlu1 %v9418_v33, %s4064_s24  ;;  %v2642_v12 = vsel %vm2625_vm8, %v2577_v59, %v9424_v38  ;;  %v2666_v39 = vsel %vm2625_vm8, %v2601_v60, %v9432_v31  ;;  %v2448_v48 = vsel %vm2430_vm4, %v9325_v36, %v9442_v32  ;;  %v3968_v31 = vld [vmem:[%s8376_s0] sm:$0xff] }
 0x4be   :  { %v2707_v21 = vsel %vm2690_vm7, %v2642_v12, %v9425_v15  ;;  %v2731_v7 = vsel %vm2690_vm7, %v2666_v39, %v1748_v46  ;;  %v9438_v12 = vld [vmem:[#allocation188_spill] sm:$0xff] }
 0x4bf   :  { %v2085_v28 = vpop.permute.xlu2 %2084  ;;  %v2083_v45 = vpop.permute.xlu1 %2082  ;;  %v2772_v61 = vsel %vm2755_vm9, %v2707_v21, %v1893_v24  ;;  %v9440_v21 = vld [vmem:[#allocation378_spill] sm:$0xff] }
 0x4c0   :  { %v2836_v1 = vsel %vm2820_vm10, %v2771_v26, %v2083_v45  ;;  %2285 = vrot.lane.b32.xlu0 %v9421_v30, %s4066_s29  ;;  %v2837_v34 = vsel %vm2820_vm10, %v2772_v61, %v2085_v28  ;;  %v7005_v24 = vpop.f32.mrf.mxu1  ;;  %v9433_v26 = vld [vmem:[#allocation128_spill] sm:$0xff] }
 0x4c1   :  { %v2901_v25 = vsel %vm2885_vm11, %v2836_v1, %v2272_v23  ;;  %v9427_v23 = vld [vmem:[#allocation259_spill] sm:$0xff]  ;;  %v9434_v28 = vld [vmem:[#allocation308_spill] sm:$0xff] }
 0x4c2   :  { %v2274_v47 = vpop.permute.xlu0 %2273  ;;  %v3029_v52 = vmul.f32 %v2965_v29, %v2901_v25  ;;  %v2990_v45 = vld [vmem:[%s8377_s1 + $0x140] sm:$0xff] }
 0x4c3   :  { %v2902_v16 = vsel %vm2885_vm11, %v2837_v34, %v2274_v47  ;;  %v9436_v25 = vld [vmem:[#allocation133_spill] sm:$0xff] }
 0x4c4   :  { %3892 = vmatmul.msk.f32.gmra.mxu1 %vm103_vm1, %v3029_v52  ;;  %v3030_v9 = vmul.f32 %v2966_v13, %v2902_v16  ;;  %v2472_v4 = vsel %vm2430_vm4, %v9319_v54, %v9436_v25  ;;  %v9437_v52 = vld [vmem:[#allocation126_spill] sm:$0xff]  ;;  %v9441_v13 = vld [vmem:[#allocation136_spill] sm:$0xff] }
 0x4c5   :  { %2283 = vrot.lane.b32.xlu2 %v9427_v23, %s4066_s29  ;;  %1952 = vrot.lane.b32.xlu1 %v9428_v51, %s4065_s28  ;;  %v2537_v38 = vsel %vm2495_vm5, %v2472_v4, %v9437_v52  ;;  %v9439_v54 = vld [vmem:[#allocation62_spill] sm:$0xff] }
 0x4c6   :  { %v2602_v15 = vsel %vm2560_vm6, %v2537_v38, %v9439_v54  ;;  %v9446_v38 = vld [vmem:[#allocation309_spill] sm:$0xff] }
 0x4c7   :  { %v1943_v14 = vpop.permute.xlu2 %1942  ;;  %v1941_v10 = vpop.permute.xlu1 %1940  ;;  %v2667_v6 = vsel %vm2625_vm8, %v2602_v15, %v9440_v21  ;;  %v9447_v54 = vld [vmem:[#allocation197_spill] sm:$0xff] }
 0x4c8   :  { %2146 = vrot.lane.b32.xlu0 %v9430_v63, %s4064_s24  ;;  %v2796_v8 = vsel %vm2755_vm9, %v2731_v7, %v1941_v10  ;;  %v3320_v59 = vpop.f32.mrf.mxu1 }
 0x4c9   :  { %v2861_v1 = vsel %vm2820_vm10, %v2796_v8, %v2133_v40  ;;  %v7036_v40 = vld [vmem:[%s8381_s5] ss:$0 sm:$0xff]  ;;  %v9443_v8 = vld [vmem:[#allocation142_spill] sm:$0xff] }
 0x4ca   :  { %v2135_v35 = vpop.permute.xlu0 %2134  ;;  %v3303_v27 = vadd.f32 %v7036_v40, %v6872_v55  ;;  %v3300_v51 = vadd.f32 %v7036_v40, %v6844_v62  ;;  %v2991_v55 = vld [vmem:[%s8377_s1 + $0x148] sm:$0xff]  ;;  %v3309_v10 = vadd.f32 %v7036_v40, %v6911_v56  ;;  %v3312_v36 = vadd.f32 %v7036_v40, %v6935_v5 }
 0x4cb   :  { %v3315_v5 = vadd.f32 %v7036_v40, %v6971_v19  ;;  %v9448_v19 = vld [vmem:[#allocation364_spill] sm:$0xff]  ;;  %v3321_v32 = vadd.f32 %v7036_v40, %v3320_v59  ;;  %v9451_v59 = vld [vmem:[#allocation251_spill] sm:$0xff] }
 0x4cc   :  { %3893 = vmatmul.msk.f32.gmra.mxu1 %vm103_vm1, %v3030_v9  ;;  %v3491_v56 = vadd.f32 %v3968_v31, %v3300_v51  ;;  %v3973_v31 = vld [vmem:[%s8376_s0 + $0x30] sm:$0xff] }
 0x4cd   :  { %2144 = vrot.lane.b32.xlu2 %v9433_v26, %s4064_s24  ;;  %2333 = vrot.lane.b32.xlu1 %v9434_v28, %s4066_s29 }
 0x4ce   :  { %v3555_v52 = vmax.f32 %v3491_v56, 0.0 }
 0x4cf   :  { %v2324_v29 = vpop.permute.xlu2 %2323  ;;  %v2322_v30 = vpop.permute.xlu1 %2321 }
 0x4d0   :  { %v2926_v46 = vsel %vm2885_vm11, %v2861_v1, %v2322_v30  ;;  %2098 = vrot.lane.b32.xlu0 %v9435_v49, %s4064_s24  ;;  %v3323_v39 = vpop.f32.mrf.mxu1  ;;  %v3970_v30 = vld [vmem:[%s8376_s0 + $0x18] sm:$0xff] }
 0x4d1   :  { %v3054_v11 = vmul.f32 %v2990_v45, %v2926_v46  ;;  %v9444_v45 = vld [vmem:[#allocation202_spill] sm:$0xff]  ;;  %v3494_v46 = vadd.f32 %v3970_v30, %v3309_v10 }
 0x4d2   :  { %v7030_v47 = vpop.permute.xlu0 %2086  ;;  %v3972_v10 = vld [vmem:[%s8376_s0 + $0x28] sm:$0xff] }
 0x4d3   :  { %3917 = vmatmul.msk.f32.gmra.mxu2 %vm103_vm1, %v3054_v11 }
 0x4d5   :  { %2096 = vrot.lane.b32.xlu2 %v9438_v12, %s4064_s24  ;;  %1761 = vrot.lane.b32.xlu1 %v9401_v43, %s4063_s20  ;;  %v3306_v43 = vadd.f32 %v7036_v40, %v6893_v3  ;;  %v3967_v3 = vld [vmem:[%s8376_s0 + $0x8] sm:$0xff] }
 0x4d7   :  { %v7050_v61 = vpop.permute.xlu2 %1751  ;;  %v1750_v23 = vpop.permute.xlu1 %1749 }
 0x4d8   :  { %v2732_v34 = vsel %vm2690_vm7, %v2667_v6, %v1750_v23  ;;  %1956 = vrot.lane.b32.xlu0 %v9441_v13, %s4065_s28  ;;  %v3971_v6 = vld [vmem:[%s8376_s0 + $0x20] sm:$0xff]  ;;  %v3318_v23 = vadd.f32 %v7036_v40, %v7005_v24  ;;  %v3619_v24 = vsel %vm2430_vm4, %v3555_v52, 0.0 }
 0x4d9   :  { %v2797_v16 = vsel %vm2755_vm9, %v2732_v34, %v1943_v14  ;;  %v3492_v14 = vadd.f32 %v3967_v3, %v3303_v27  ;;  %v3495_v27 = vadd.f32 %v3971_v6, %v3312_v36  ;;  %v3558_v34 = vmax.f32 %v3494_v46, 0.0  ;;  %v3975_v6 = vld [vmem:[%s8376_s0 + $0x40] sm:$0xff] }
 0x4da   :  { %v2862_v57 = vsel %vm2820_vm10, %v2797_v16, %v2135_v35  ;;  %v7066_v62 = vpop.permute.xlu0 %1944  ;;  %v3969_v35 = vld [vmem:[%s8376_s0 + $0x10] sm:$0xff]  ;;  %v3497_v56 = vadd.f32 %v3973_v31, %v3318_v23 }
 0x4db   :  { %v2927_v60 = vsel %vm2885_vm11, %v2862_v57, %v2324_v29  ;;  %v3493_v7 = vadd.f32 %v3969_v35, %v3306_v43  ;;  %v9445_v29 = vld [vmem:[#allocation198_spill] sm:$0xff]  ;;  %v3556_v11 = vmax.f32 %v3492_v14, 0.0  ;;  %v9449_v43 = vld [vmem:[#allocation400_spill] sm:$0xff]  ;;  %v3496_v57 = vadd.f32 %v3972_v10, %v3315_v5  ;;  %v9452_v5 = vld [vmem:[#allocation119_spill] sm:$0xff] }
 0x4dc   :  { %v3055_v9 = vmul.f32 %v2991_v55, %v2927_v60  ;;  %v2513_v1 = vsel %vm2495_vm5, %v2448_v48, %v9445_v29  ;;  %v3559_v60 = vmax.f32 %v3495_v27, 0.0  ;;  %v9450_v35 = vld [vmem:[#allocation294_spill] sm:$0xff]  ;;  %v3624_v36 = vsel %vm2430_vm4, %v3558_v34, 0.0  ;;  %v3974_v29 = vld [vmem:[%s8376_s0 + $0x38] sm:$0xff] }
 0x4dd   :  { %1954 = vrot.lane.b32.xlu2 %v9443_v8, %s4065_s28  ;;  %1906 = vrot.lane.b32.xlu1 %v9444_v45, %s4065_s28  ;;  %v2578_v15 = vsel %vm2560_vm6, %v2513_v1, %v9447_v54  ;;  %v3557_v21 = vmax.f32 %v3493_v7, 0.0  ;;  %v3620_v55 = vsel %vm2430_vm4, %v3556_v11, 0.0  ;;  %v2967_v8 = vld [vmem:[%s8377_s1 + $0x88] sm:$0xff]  ;;  %v3560_v45 = vmax.f32 %v3496_v57, 0.0  ;;  %v9454_v10 = vld [vmem:[#allocation336_spill] sm:$0xff] }
 0x4de   :  { %3918 = vmatmul.msk.f32.gmra.mxu2 %vm103_vm1, %v3055_v9  ;;  %v2643_v51 = vsel %vm2625_vm8, %v2578_v15, %v9448_v19  ;;  %v3324_v9 = vadd.f32 %v7036_v40, %v3323_v39  ;;  %v3621_v7 = vadd.f32 %v3620_v55, %v3619_v24  ;;  %v3498_v1 = vadd.f32 %v3974_v29, %v3321_v32  ;;  %v9455_v24 = vld [vmem:[#allocation382_spill] sm:$0xff] }
 0x4df   :  { %v7095_v25 = vpop.permute.xlu2 %1896  ;;  %v1895_v4 = vpop.permute.xlu1 %1894  ;;  %v2708_v16 = vsel %vm2690_vm7, %v2643_v51, %v9449_v43  ;;  %v3622_v14 = vsel %vm2430_vm4, %v3557_v21, 0.0  ;;  %v3626_v15 = vsel %vm2430_vm4, %v3559_v60, 0.0  ;;  %v3561_v21 = vmax.f32 %v3497_v56, 0.0  ;;  %v9453_v51 = vld [vmem:[#allocation113_spill] sm:$0xff] }
 0x4e0   :  { %2337 = vrot.lane.b32.xlu0 %v9446_v38, %s4066_s29  ;;  %v2773_v48 = vsel %vm2755_vm9, %v2708_v16, %v1895_v4  ;;  %v3326_v3 = vpop.f32.mrf.mxu1  ;;  %v2473_v4 = vsel %vm2430_vm4, %v9337_v44, %v9452_v5  ;;  %v3623_v52 = vadd.f32 %v3622_v14, %v3621_v7  ;;  %v3499_v27 = vadd.f32 %v3975_v6, %v3324_v9  ;;  %v3976_v16 = vld [vmem:[%s8376_s0 + $0x48] sm:$0xff] }
 0x4e1   :  { %v3327_v39 = vadd.f32 %v7036_v40, %v3326_v3  ;;  %v2838_v46 = vsel %vm2820_vm10, %v2773_v48, %v7030_v47  ;;  %v2538_v44 = vsel %vm2495_vm5, %v2473_v4, %v9453_v51  ;;  %v3628_v34 = vsel %vm2430_vm4, %v3560_v45, 0.0  ;;  %v9456_v60 = vld [vmem:[#allocation129_spill] sm:$0xff] }
 0x4e2   :  { %v7108_v13 = vpop.permute.xlu0 %2325  ;;  %v3625_v23 = vadd.f32 %v3624_v36, %v3623_v52  ;;  %v3562_v43 = vmax.f32 %v3498_v1, 0.0  ;;  %v2603_v57 = vsel %vm2560_vm6, %v2538_v44, %v9454_v10  ;;  %v3630_v3 = vsel %vm2430_vm4, %v3561_v21, 0.0  ;;  %v9458_v1 = vld [vmem:[#allocation219_spill] sm:$0xff]  ;;  %v9465_v10 = vld [vmem:[#allocation396_spill] sm:$0xff] }
 0x4e3   :  { %v3500_v55 = vadd.f32 %v3976_v16, %v3327_v39  ;;  %v2668_v48 = vsel %vm2625_vm8, %v2603_v57, %v9455_v24  ;;  %v3563_v14 = vmax.f32 %v3499_v27, 0.0  ;;  %v3977_v21 = vld [vmem:[%s8376_s0 + $0x50] sm:$0xff] }
 0x4e4   :  { %v3627_v32 = vadd.f32 %v3626_v15, %v3625_v23  ;;  %v2733_v56 = vsel %vm2690_vm7, %v2668_v48, %v7050_v61  ;;  %v3632_v9 = vsel %vm2430_vm4, %v3562_v43, 0.0  ;;  %v9460_v27 = vld [vmem:[#allocation307_spill] sm:$0xff]  ;;  %v9463_v43 = vld [vmem:[#allocation189_spill] sm:$0xff] }
 0x4e5   :  { %2335 = vrot.lane.b32.xlu2 %v9450_v35, %s4066_s29  ;;  %2287 = vrot.lane.b32.xlu1 %v9451_v59, %s4066_s29  ;;  %v3564_v59 = vmax.f32 %v3500_v55, 0.0  ;;  %v9464_v16 = vld [vmem:[#allocation211_spill] sm:$0xff] }
 0x4e6   :  { %v3629_v31 = vadd.f32 %v3628_v34, %v3627_v32  ;;  %v9462_v34 = vld [vmem:[#allocation196_spill] sm:$0xff]  ;;  %v2450_v55 = vsel %vm2430_vm4, %v9340_v37, %v9464_v16  ;;  %v9466_v37 = vld [vmem:[#allocation270_spill] sm:$0xff] }
 0x4e7   :  { %v7136_v30 = vpop.permute.xlu2 %2277  ;;  %v2276_v11 = vpop.permute.xlu1 %2275  ;;  %v3636_v15 = vsel %vm2430_vm4, %v3564_v59, 0.0 }
 0x4e8   :  { %v2903_v54 = vsel %vm2885_vm11, %v2838_v46, %v2276_v11  ;;  %1765 = vrot.lane.b32.xlu0 %v9450_v35, %s4063_s20  ;;  %v2798_v35 = vsel %vm2755_vm9, %v2733_v56, %v7066_v62  ;;  %v3631_v29 = vadd.f32 %v3630_v3, %v3629_v31  ;;  %v3634_v62 = vsel %vm2430_vm4, %v3563_v14, 0.0  ;;  %v2968_v31 = vld [vmem:[%s8377_s1 + $0x90] sm:$0xff] }
 0x4e9   :  { %v3031_v47 = vmul.f32 %v2967_v8, %v2903_v54  ;;  %v9457_v8 = vld [vmem:[#allocation192_spill] sm:$0xff]  ;;  %v9459_v54 = vld [vmem:[#allocation185_spill] sm:$0xff] }
 0x4ea   :  { %v7150_v19 = vpop.permute.xlu0 %1753  ;;  %v2449_v45 = vsel %vm2430_vm4, %v9345_v18, %v9457_v8  ;;  %v3633_v5 = vadd.f32 %v3632_v9, %v3631_v29  ;;  %v9469_v29 = vld [vmem:[#allocation365_spill] sm:$0xff] }
 0x4eb   :  { %3894 = vmatmul.msk.f32.gmra.mxu1 %vm103_vm1, %v3031_v47  ;;  %v2514_v18 = vsel %vm2495_vm5, %v2449_v45, %v9459_v54  ;;  %v2969_v54 = vld [vmem:[%s8377_s1 + $0x98] sm:$0xff] }
 0x4ec   :  { %v2579_v47 = vsel %vm2560_vm6, %v2514_v18, %v9460_v27  ;;  %v3635_v23 = vadd.f32 %v3634_v62, %v3633_v5  ;;  %v9471_v62 = vld [vmem:[#allocation139_spill] sm:$0xff] }
 0x4ed   :  { %1763 = vrot.lane.b32.xlu2 %v9434_v28, %s4063_s20  ;;  %2148 = vrot.lane.b32.xlu1 %v9456_v60, %s4064_s24  ;;  %v2992_v28 = vld [vmem:[%s8377_s1 + $0x150] sm:$0xff] }
 0x4ee   :  { %v3637_v32 = vadd.f32 %v3636_v15, %v3635_v23  ;;  %v9473_v5 = vld [vmem:[#allocation159_spill] sm:$0xff] }
 0x4ef   :  { %v7173_v7 = vpop.permute.xlu2 %2138  ;;  %v2137_v36 = vpop.permute.xlu1 %2136 }
 0x4f0   :  { %v2863_v61 = vsel %vm2820_vm10, %v2798_v35, %v2137_v36  ;;  %1910 = vrot.lane.b32.xlu0 %v9458_v1, %s4065_s28  ;;  %v3329_v39 = vpop.f32.mrf.mxu1  ;;  %v9467_v35 = vld [vmem:[#allocation206_spill] sm:$0xff]  ;;  %v9468_v36 = vld [vmem:[#allocation329_spill] sm:$0xff] }
 0x4f1   :  { %v2928_v46 = vsel %vm2885_vm11, %v2863_v61, %v7108_v13  ;;  %v3330_v11 = vadd.f32 %v7036_v40, %v3329_v39  ;;  %v9461_v13 = vld [vmem:[#allocation373_spill] sm:$0xff]  ;;  %v2515_v59 = vsel %vm2495_vm5, %v2450_v55, %v9467_v35  ;;  %v9470_v1 = vld [vmem:[#allocation50_spill] sm:$0xff] }
 0x4f2   :  { %v1899_v4 = vpop.permute.xlu0 %1898  ;;  %v3056_v52 = vmul.f32 %v2992_v28, %v2928_v46  ;;  %v2644_v51 = vsel %vm2625_vm8, %v2579_v47, %v9461_v13  ;;  %v2580_v28 = vsel %vm2560_vm6, %v2515_v59, %v9468_v36  ;;  %v2474_v46 = vsel %vm2430_vm4, %v9334_v0, %v9471_v62  ;;  %v9476_v47 = vld [vmem:[#allocation342_spill] sm:$0xff] }
 0x4f3   :  { %v3501_v6 = vadd.f32 %v3977_v21, %v3330_v11  ;;  %v2709_v57 = vsel %vm2690_vm7, %v2644_v51, %v9465_v10  ;;  %v2645_v61 = vsel %vm2625_vm8, %v2580_v28, %v9469_v29  ;;  %v9477_v51 = vld [vmem:[#allocation99_spill] sm:$0xff]  ;;  %v9481_v28 = vld [vmem:[#allocation162_spill] sm:$0xff]  ;;  %v9482_v29 = vld [vmem:[#allocation157_spill] sm:$0xff] }
 0x4f4   :  { %3919 = vmatmul.msk.f32.gmra.mxu2 %vm103_vm1, %v3056_v52  ;;  %v2774_v24 = vsel %vm2755_vm9, %v2709_v57, %v7095_v25  ;;  %v2710_v39 = vsel %vm2690_vm7, %v2645_v61, %v9470_v1  ;;  %v3978_v10 = vld [vmem:[%s8376_s0 + $0x58] sm:$0xff] }
 0x4f5   :  { %v3565_v44 = vmax.f32 %v3501_v6, 0.0  ;;  %1908 = vrot.lane.b32.xlu2 %v9462_v34, %s4065_s28  ;;  %2100 = vrot.lane.b32.xlu1 %v9463_v43, %s4064_s24  ;;  %v2775_v11 = vsel %vm2755_vm9, %v2710_v39, %v1899_v4  ;;  %v9474_v6 = vld [vmem:[#allocation134_spill] sm:$0xff]  ;;  %v9475_v4 = vld [vmem:[#allocation155_spill] sm:$0xff] }
 0x4f6   :  { %v2539_v0 = vsel %vm2495_vm5, %v2474_v46, %v9474_v6  ;;  %v9485_v39 = vld [vmem:[#allocation379_spill] sm:$0xff]  ;;  %v3979_v6 = vld [vmem:[%s8376_s0 + $0x60] sm:$0xff] }
 0x4f7   :  { %v3638_v48 = vsel %vm2430_vm4, %v3565_v44, 0.0  ;;  %v2091_v3 = vpop.permute.xlu2 %2090  ;;  %v2089_v14 = vpop.permute.xlu1 %2088  ;;  %v2604_v23 = vsel %vm2560_vm6, %v2539_v0, %v9476_v47 }
 0x4f8   :  { %v3639_v56 = vadd.f32 %v3638_v48, %v3637_v32  ;;  %v2839_v9 = vsel %vm2820_vm10, %v2774_v24, %v2089_v14  ;;  %2291 = vrot.lane.b32.xlu0 %v9466_v37, %s4066_s29  ;;  %v2840_v52 = vsel %vm2820_vm10, %v2775_v11, %v2091_v3  ;;  %v2669_v44 = vsel %vm2625_vm8, %v2604_v23, %v9477_v51  ;;  %v9478_v48 = vld [vmem:[#allocation152_spill] sm:$0xff]  ;;  %v9479_v3 = vld [vmem:[#allocation315_spill] sm:$0xff]  ;;  %v9487_v23 = vld [vmem:[#allocation234_spill] sm:$0xff] }
 0x4f9   :  { %v2904_v25 = vsel %vm2885_vm11, %v2839_v9, %v7136_v30  ;;  %v9472_v30 = vld [vmem:[#allocation265_spill] sm:$0xff]  ;;  %v2734_v55 = vsel %vm2690_vm7, %v2669_v44, %v7150_v19  ;;  %v2993_v19 = vld [vmem:[%s8377_s1 + $0x158] sm:$0xff]  ;;  %v9488_v51 = vld [vmem:[#allocation166_spill] sm:$0xff] }
 0x4fa   :  { %v2280_v8 = vpop.permute.xlu0 %2279  ;;  %v3032_v45 = vmul.f32 %v2968_v31, %v2904_v25  ;;  %v9480_v25 = vld [vmem:[#allocation215_spill] sm:$0xff]  ;;  %v9489_v44 = vld [vmem:[#allocation225_spill] sm:$0xff] }
 0x4fb   :  { %v2905_v18 = vsel %vm2885_vm11, %v2840_v52, %v2280_v8  ;;  %v2475_v8 = vsel %vm2430_vm4, %v9363_v58, %v9481_v28  ;;  %v9495_v28 = vld [vmem:[#allocation300_spill] sm:$0xff] }
 0x4fc   :  { %3895 = vmatmul.msk.f32.gmra.mxu1 %vm103_vm1, %v3032_v45  ;;  %v3033_v34 = vmul.f32 %v2969_v54, %v2905_v18  ;;  %v2540_v61 = vsel %vm2495_vm5, %v2475_v8, %v9482_v29  ;;  %v2970_v8 = vld [vmem:[%s8377_s1 + $0xa0] sm:$0xff] }
 0x4fd   :  { %2289 = vrot.lane.b32.xlu2 %v9472_v30, %s4066_s29  ;;  %1958 = vrot.lane.b32.xlu1 %v9473_v5, %s4065_s28  ;;  %v9486_v30 = vld [vmem:[#allocation160_spill] sm:$0xff] }
 0x4ff   :  { %v1949_v15 = vpop.permute.xlu2 %1948  ;;  %v1947_v21 = vpop.permute.xlu1 %1946 }
 0x500   :  { %2152 = vrot.lane.b32.xlu0 %v9475_v4, %s4064_s24  ;;  %v3332_v27 = vpop.f32.mrf.mxu1  ;;  %v2799_v32 = vsel %vm2755_vm9, %v2734_v55, %v1947_v21 }
 0x501   :  { %v3333_v13 = vadd.f32 %v7036_v40, %v3332_v27  ;;  %v2864_v9 = vsel %vm2820_vm10, %v2799_v32, %v7173_v7  ;;  %v9483_v7 = vld [vmem:[#allocation212_spill] sm:$0xff] }
 0x502   :  { %v2141_v16 = vpop.permute.xlu0 %2140 }
 0x503   :  { %v3502_v57 = vadd.f32 %v3978_v10, %v3333_v13  ;;  %v9490_v10 = vld [vmem:[#allocation228_spill] sm:$0xff] }
 0x504   :  { %3896 = vmatmul.msk.f32.gmra.mxu1 %vm103_vm1, %v3033_v34 }
 0x505   :  { %v3566_v24 = vmax.f32 %v3502_v57, 0.0  ;;  %2150 = vrot.lane.b32.xlu2 %v9478_v48, %s4064_s24  ;;  %2339 = vrot.lane.b32.xlu1 %v9479_v3, %s4066_s29 }
 0x507   :  { %v3640_v14 = vsel %vm2430_vm4, %v3566_v24, 0.0  ;;  %v2330_v31 = vpop.permute.xlu2 %2329  ;;  %v2328_v37 = vpop.permute.xlu1 %2327  ;;  %v9491_v24 = vld [vmem:[#allocation316_spill] sm:$0xff] }
 0x508   :  { %v3641_v35 = vadd.f32 %v3640_v14, %v3639_v56  ;;  %v2929_v59 = vsel %vm2885_vm11, %v2864_v9, %v2328_v37  ;;  %2104 = vrot.lane.b32.xlu0 %v9480_v25, %s4064_s24  ;;  %v9484_v56 = vld [vmem:[#allocation92_spill] sm:$0xff]  ;;  %v9494_v37 = vld [vmem:[#allocation402_spill] sm:$0xff] }
 0x509   :  { %v3057_v36 = vmul.f32 %v2993_v19, %v2929_v59  ;;  %v2605_v1 = vsel %vm2560_vm6, %v2540_v61, %v9484_v56  ;;  %v9493_v14 = vld [vmem:[#allocation368_spill] sm:$0xff] }
 0x50a   :  { %v2093_v45 = vpop.permute.xlu0 %2092  ;;  %v2670_v62 = vsel %vm2625_vm8, %v2605_v1, %v9485_v39  ;;  %v9497_v1 = vld [vmem:[#allocation149_spill] sm:$0xff] }
 0x50b   :  { %3920 = vmatmul.msk.f32.gmra.mxu2 %vm103_vm1, %v3057_v36  ;;  %v2476_v39 = vsel %vm2430_vm4, %v9387_v17, %v9497_v1  ;;  %v9499_v17 = vld [vmem:[#allocation337_spill] sm:$0xff] }
 0x50d   :  { %2102 = vrot.lane.b32.xlu2 %v9483_v7, %s4064_s24  ;;  %1767 = vrot.lane.b32.xlu1 %v9446_v38, %s4063_s20  ;;  %v2994_v38 = vld [vmem:[%s8377_s1 + $0x160] sm:$0xff] }
 0x50f   :  { %v1758_v46 = vpop.permute.xlu2 %1757  ;;  %v1756_v58 = vpop.permute.xlu1 %1755 }
 0x510   :  { %v2735_v11 = vsel %vm2690_vm7, %v2670_v62, %v1756_v58  ;;  %1962 = vrot.lane.b32.xlu0 %v9486_v30, %s4065_s28  ;;  %v3335_v5 = vpop.f32.mrf.mxu1 }
 0x511   :  { %v2800_v52 = vsel %vm2755_vm9, %v2735_v11, %v1949_v15  ;;  %v3336_v54 = vadd.f32 %v7036_v40, %v3335_v5  ;;  %v2451_v15 = vsel %vm2430_vm4, %v9371_v22, %v9487_v23  ;;  %v9492_v22 = vld [vmem:[#allocation304_spill] sm:$0xff] }
 0x512   :  { %v2865_v18 = vsel %vm2820_vm10, %v2800_v52, %v2141_v16  ;;  %v1951_v21 = vpop.permute.xlu0 %1950  ;;  %v2516_v57 = vsel %vm2495_vm5, %v2451_v15, %v9490_v10  ;;  %v9498_v52 = vld [vmem:[#allocation144_spill] sm:$0xff] }
 0x513   :  { %v3503_v0 = vadd.f32 %v3979_v6, %v3336_v54  ;;  %v2930_v27 = vsel %vm2885_vm11, %v2865_v18, %v2330_v31  ;;  %v2581_v19 = vsel %vm2560_vm6, %v2516_v57, %v9492_v22  ;;  %v2541_v54 = vsel %vm2495_vm5, %v2476_v39, %v9498_v52  ;;  %v9500_v6 = vld [vmem:[#allocation385_spill] sm:$0xff]  ;;  %v9503_v22 = vld [vmem:[#allocation244_spill] sm:$0xff]  ;;  %v9512_v52 = vld [vmem:[#allocation230_spill] sm:$0xff] }
 0x514   :  { %v3058_v47 = vmul.f32 %v2994_v38, %v2930_v27  ;;  %v2646_v31 = vsel %vm2625_vm8, %v2581_v19, %v9493_v14  ;;  %v2606_v18 = vsel %vm2560_vm6, %v2541_v54, %v9499_v17  ;;  %v9504_v14 = vld [vmem:[#allocation216_spill] sm:$0xff] }
 0x515   :  { %v3567_v13 = vmax.f32 %v3503_v0, 0.0  ;;  %1960 = vrot.lane.b32.xlu2 %v9488_v51, %s4065_s28  ;;  %1912 = vrot.lane.b32.xlu1 %v9489_v44, %s4065_s28  ;;  %v2711_v59 = vsel %vm2690_vm7, %v2646_v31, %v9494_v37  ;;  %v2671_v0 = vsel %vm2625_vm8, %v2606_v18, %v9500_v6  ;;  %v9505_v37 = vld [vmem:[#allocation320_spill] sm:$0xff]  ;;  %v9514_v6 = vld [vmem:[#allocation369_spill] sm:$0xff] }
 0x516   :  { %3921 = vmatmul.msk.f32.gmra.mxu2 %vm103_vm1, %v3058_v47  ;;  %v9501_v47 = vld [vmem:[#allocation153_spill] sm:$0xff]  ;;  %v2736_v23 = vsel %vm2690_vm7, %v2671_v0, %v1758_v46 }
 0x517   :  { %v3642_v34 = vsel %vm2430_vm4, %v3567_v13, 0.0  ;;  %v1903_v16 = vpop.permute.xlu2 %1902  ;;  %v1901_v55 = vpop.permute.xlu1 %1900  ;;  %v2801_v15 = vsel %vm2755_vm9, %v2736_v23, %v1951_v21 }
 0x518   :  { %v3643_v32 = vadd.f32 %v3642_v34, %v3641_v35  ;;  %2343 = vrot.lane.b32.xlu0 %v9491_v24, %s4066_s29  ;;  %v2776_v36 = vsel %vm2755_vm9, %v2711_v59, %v1901_v55  ;;  %v9496_v35 = vld [vmem:[#allocation257_spill] sm:$0xff] }
 0x519   :  { %v2841_v61 = vsel %vm2820_vm10, %v2776_v36, %v2093_v45  ;;  %v3980_v45 = vld [vmem:[%s8376_s0 + $0x68] sm:$0xff]  ;;  %v9506_v36 = vld [vmem:[#allocation376_spill] sm:$0xff] }
 0x51a   :  { %v2332_v9 = vpop.permute.xlu0 %2331  ;;  %v2995_v34 = vld [vmem:[%s8377_s1 + $0x168] sm:$0xff] }
 0x51b   :  { %v9502_v55 = vld [vmem:[#allocation221_spill] sm:$0xff] }
 0x51c   :  { %v2452_v10 = vsel %vm2430_vm4, %v9394_v50, %v9502_v55  ;;  %v9517_v55 = vld [vmem:[#allocation183_spill] sm:$0xff] }
 0x51d   :  { %2341 = vrot.lane.b32.xlu2 %v9495_v28, %s4066_s29  ;;  %2293 = vrot.lane.b32.xlu1 %v9496_v35, %s4066_s29  ;;  %v2517_v31 = vsel %vm2495_vm5, %v2452_v10, %v9504_v14  ;;  %v9518_v10 = vld [vmem:[#allocation170_spill] sm:$0xff] }
 0x51e   :  { %v2582_v59 = vsel %vm2560_vm6, %v2517_v31, %v9505_v37 }
 0x51f   :  { %v2284_v29 = vpop.permute.xlu2 %2283  ;;  %v2282_v56 = vpop.permute.xlu1 %2281  ;;  %v2647_v50 = vsel %vm2625_vm8, %v2582_v59, %v9506_v36  ;;  %v9519_v59 = vld [vmem:[#allocation179_spill] sm:$0xff] }
 0x520   :  { %v2906_v62 = vsel %vm2885_vm11, %v2841_v61, %v2282_v56  ;;  %1771 = vrot.lane.b32.xlu0 %v9495_v28, %s4063_s20  ;;  %v3338_v58 = vpop.f32.mrf.mxu1  ;;  %v9508_v28 = vld [vmem:[#allocation213_spill] sm:$0xff]  ;;  %v9520_v36 = vld [vmem:[#allocation163_spill] sm:$0xff] }
 0x521   :  { %v3034_v11 = vmul.f32 %v2970_v8, %v2906_v62  ;;  %v3339_v30 = vadd.f32 %v7036_v40, %v3338_v58  ;;  %v9510_v8 = vld [vmem:[#allocation397_spill] sm:$0xff] }
 0x522   :  { %v7332_v5 = vpop.permute.xlu0 %1759  ;;  %v2712_v61 = vsel %vm2690_vm7, %v2647_v50, %v9510_v8  ;;  %v2971_v62 = vld [vmem:[%s8377_s1 + $0xa8] sm:$0xff] }
 0x523   :  { %v3504_v38 = vadd.f32 %v3980_v45, %v3339_v30  ;;  %3897 = vmatmul.msk.f32.gmra.mxu1 %vm103_vm1, %v3034_v11  ;;  %v2777_v56 = vsel %vm2755_vm9, %v2712_v61, %v1903_v16  ;;  %v9511_v11 = vld [vmem:[#allocation275_spill] sm:$0xff]  ;;  %v9513_v16 = vld [vmem:[#allocation333_spill] sm:$0xff]  ;;  %v9522_v8 = vld [vmem:[#allocation130_spill] sm:$0xff] }
 0x525   :  { %v3568_v27 = vmax.f32 %v3504_v38, 0.0  ;;  %1769 = vrot.lane.b32.xlu2 %v9479_v3, %s4063_s20  ;;  %2154 = vrot.lane.b32.xlu1 %v9501_v47, %s4064_s24 }
 0x527   :  { %v3644_v13 = vsel %vm2430_vm4, %v3568_v27, 0.0  ;;  %v2145_v51 = vpop.permute.xlu2 %2144  ;;  %v2143_v44 = vpop.permute.xlu1 %2142  ;;  %v3981_v27 = vld [vmem:[%s8376_s0 + $0x70] sm:$0xff] }
 0x528   :  { %v3645_v3 = vadd.f32 %v3644_v13, %v3643_v32  ;;  %v2866_v57 = vsel %vm2820_vm10, %v2801_v15, %v2143_v44  ;;  %1916 = vrot.lane.b32.xlu0 %v9503_v22, %s4065_s28  ;;  %v9507_v32 = vld [vmem:[#allocation220_spill] sm:$0xff] }
 0x529   :  { %v2931_v46 = vsel %vm2885_vm11, %v2866_v57, %v2332_v9  ;;  %v9509_v9 = vld [vmem:[#allocation236_spill] sm:$0xff]  ;;  %v2477_v57 = vsel %vm2430_vm4, %v9380_v2, %v9518_v10  ;;  %v9521_v2 = vld [vmem:[#allocation345_spill] sm:$0xff] }
 0x52a   :  { %v1905_v21 = vpop.permute.xlu0 %1904  ;;  %v3059_v19 = vmul.f32 %v2995_v34, %v2931_v46  ;;  %v2453_v35 = vsel %vm2430_vm4, %v9390_v42, %v9509_v9  ;;  %v9515_v15 = vld [vmem:[#allocation56_spill] sm:$0xff]  ;;  %v9516_v34 = vld [vmem:[#allocation271_spill] sm:$0xff]  ;;  %v2542_v50 = vsel %vm2495_vm5, %v2477_v57, %v9520_v36 }
 0x52b   :  { %v2518_v42 = vsel %vm2495_vm5, %v2453_v35, %v9512_v52  ;;  %v9531_v10 = vld [vmem:[#allocation184_spill] sm:$0xff] }
 0x52c   :  { %3922 = vmatmul.msk.f32.gmra.mxu2 %vm103_vm1, %v3059_v19  ;;  %v2583_v38 = vsel %vm2560_vm6, %v2518_v42, %v9513_v16  ;;  %v2972_v19 = vld [vmem:[%s8377_s1 + $0xb0] sm:$0xff] }
 0x52d   :  { %1914 = vrot.lane.b32.xlu2 %v9507_v32, %s4065_s28  ;;  %2106 = vrot.lane.b32.xlu1 %v9508_v28, %s4064_s24  ;;  %v2648_v0 = vsel %vm2625_vm8, %v2583_v38, %v9514_v6  ;;  %v2607_v32 = vsel %vm2560_vm6, %v2542_v50, %v9521_v2  ;;  %v9526_v38 = vld [vmem:[#allocation193_spill] sm:$0xff] }
 0x52e   :  { %v2713_v13 = vsel %vm2690_vm7, %v2648_v0, %v9515_v15  ;;  %v2672_v61 = vsel %vm2625_vm8, %v2607_v32, %v9522_v8  ;;  %v9527_v6 = vld [vmem:[#allocation237_spill] sm:$0xff]  ;;  %v9528_v0 = vld [vmem:[#allocation186_spill] sm:$0xff]  ;;  %v9534_v8 = vld [vmem:[#allocation256_spill] sm:$0xff] }
 0x52f   :  { %v2097_v1 = vpop.permute.xlu2 %2096  ;;  %v2095_v39 = vpop.permute.xlu1 %2094  ;;  %v9529_v15 = vld [vmem:[#allocation338_spill] sm:$0xff]  ;;  %v3983_v50 = vld [vmem:[%s8376_s0 + $0x80] sm:$0xff] }
 0x530   :  { %v2842_v58 = vsel %vm2820_vm10, %v2777_v56, %v2095_v39  ;;  %2297 = vrot.lane.b32.xlu0 %v9511_v11, %s4066_s29  ;;  %v3341_v30 = vpop.f32.mrf.mxu1  ;;  %v2737_v56 = vsel %vm2690_vm7, %v2672_v61, %v7332_v5  ;;  %v9524_v39 = vld [vmem:[#allocation321_spill] sm:$0xff]  ;;  %v9525_v5 = vld [vmem:[#allocation226_spill] sm:$0xff]  ;;  %v2454_v61 = vsel %vm2430_vm4, %v9418_v33, %v9534_v8 }
 0x531   :  { %v2907_v54 = vsel %vm2885_vm11, %v2842_v58, %v2284_v29  ;;  %v3342_v45 = vadd.f32 %v7036_v40, %v3341_v30  ;;  %v2778_v29 = vsel %vm2755_vm9, %v2713_v13, %v1905_v21  ;;  %v2996_v58 = vld [vmem:[%s8377_s1 + $0x170] sm:$0xff]  ;;  %v9538_v33 = vld [vmem:[#allocation13_spill] sm:$0xff] }
 0x532   :  { %v2286_v17 = vpop.permute.xlu0 %2285  ;;  %v3035_v18 = vmul.f32 %v2971_v62, %v2907_v54  ;;  %v2843_v22 = vsel %vm2820_vm10, %v2778_v29, %v2097_v1  ;;  %v9523_v1 = vld [vmem:[#allocation176_spill] sm:$0xff]  ;;  %v9530_v29 = vld [vmem:[#allocation381_spill] sm:$0xff]  ;;  %v9532_v32 = vld [vmem:[#allocation190_spill] sm:$0xff] }
 0x533   :  { %v3505_v23 = vadd.f32 %v3981_v27, %v3342_v45  ;;  %v2908_v21 = vsel %vm2885_vm11, %v2843_v22, %v2286_v17  ;;  %v2478_v17 = vsel %vm2430_vm4, %v9411_v41, %v9526_v38 }
 0x534   :  { %3898 = vmatmul.msk.f32.gmra.mxu1 %vm103_vm1, %v3035_v18  ;;  %v3036_v9 = vmul.f32 %v2972_v19, %v2908_v21  ;;  %v3982_v18 = vld [vmem:[%s8376_s0 + $0x78] sm:$0xff]  ;;  %v2543_v27 = vsel %vm2495_vm5, %v2478_v17, %v9528_v0  ;;  %v9540_v0 = vld [vmem:[#allocation306_spill] sm:$0xff] }
 0x535   :  { %v3569_v44 = vmax.f32 %v3505_v23, 0.0  ;;  %2295 = vrot.lane.b32.xlu2 %v9516_v34, %s4066_s29  ;;  %1964 = vrot.lane.b32.xlu1 %v9517_v55, %s4065_s28  ;;  %v2608_v41 = vsel %vm2560_vm6, %v2543_v27, %v9529_v15  ;;  %v9539_v17 = vld [vmem:[#allocation404_spill] sm:$0xff]  ;;  %v9541_v27 = vld [vmem:[#allocation262_spill] sm:$0xff] }
 0x536   :  { %v2973_v15 = vld [vmem:[%s8377_s1 + $0xb8] sm:$0xff] }
 0x537   :  { %v3646_v46 = vsel %vm2430_vm4, %v3569_v44, 0.0  ;;  %v1955_v14 = vpop.permute.xlu2 %1954  ;;  %v1953_v31 = vpop.permute.xlu1 %1952  ;;  %v2673_v44 = vsel %vm2625_vm8, %v2608_v41, %v9530_v29 }
 0x538   :  { %v3647_v37 = vadd.f32 %v3646_v46, %v3645_v3  ;;  %2158 = vrot.lane.b32.xlu0 %v9519_v59, %s4064_s24  ;;  %v2802_v3 = vsel %vm2755_vm9, %v2737_v56, %v1953_v31  ;;  %v2997_v31 = vld [vmem:[%s8377_s1 + $0x178] sm:$0xff] }
 0x539   :  { %v2867_v11 = vsel %vm2820_vm10, %v2802_v3, %v2145_v51 }
 0x53a   :  { %v2147_v35 = vpop.permute.xlu0 %2146 }
 0x53c   :  { %3899 = vmatmul.msk.f32.gmra.mxu1 %vm103_vm1, %v3036_v9 }
 0x53d   :  { %2156 = vrot.lane.b32.xlu2 %v9523_v1, %s4064_s24  ;;  %2345 = vrot.lane.b32.xlu1 %v9524_v39, %s4066_s29 }
 0x53f   :  { %v2336_v62 = vpop.permute.xlu2 %2335  ;;  %v2334_v30 = vpop.permute.xlu1 %2333 }
 0x540   :  { %2110 = vrot.lane.b32.xlu0 %v9525_v5, %s4064_s24  ;;  %v2932_v52 = vsel %vm2885_vm11, %v2867_v11, %v2334_v30  ;;  %v9536_v11 = vld [vmem:[#allocation250_spill] sm:$0xff] }
 0x541   :  { %v3344_v42 = vpop.f32.mrf.mxu1  ;;  %v3060_v54 = vmul.f32 %v2996_v58, %v2932_v52  ;;  %v2519_v30 = vsel %vm2495_vm5, %v2454_v61, %v9536_v11 }
 0x542   :  { %v3345_v45 = vadd.f32 %v7036_v40, %v3344_v42  ;;  %v2099_v16 = vpop.permute.xlu0 %2098  ;;  %v9537_v42 = vld [vmem:[#allocation323_spill] sm:$0xff] }
 0x543   :  { %3923 = vmatmul.msk.f32.gmra.mxu2 %vm103_vm1, %v3060_v54  ;;  %v2584_v54 = vsel %vm2560_vm6, %v2519_v30, %v9537_v42  ;;  %v9551_v30 = vld [vmem:[#allocation235_spill] sm:$0xff] }
 0x544   :  { %v3506_v51 = vadd.f32 %v3982_v18, %v3345_v45  ;;  %v2649_v38 = vsel %vm2625_vm8, %v2584_v54, %v9538_v33  ;;  %v9552_v42 = vld [vmem:[#allocation23_spill] sm:$0xff] }
 0x545   :  { %2108 = vrot.lane.b32.xlu2 %v9527_v6, %s4064_s24  ;;  %1773 = vrot.lane.b32.xlu1 %v9491_v24, %s4063_s20  ;;  %v2714_v18 = vsel %vm2690_vm7, %v2649_v38, %v9539_v17  ;;  %v9553_v54 = vld [vmem:[#allocation7_spill] sm:$0xff] }
 0x546   :  { %v3570_v23 = vmax.f32 %v3506_v51, 0.0  ;;  %v9555_v38 = vld [vmem:[#allocation399_spill] sm:$0xff] }
 0x547   :  { %v1764_v13 = vpop.permute.xlu2 %1763  ;;  %v1762_v55 = vpop.permute.xlu1 %1761 }
 0x548   :  { %v3648_v34 = vsel %vm2430_vm4, %v3570_v23, 0.0  ;;  %1968 = vrot.lane.b32.xlu0 %v9531_v10, %s4065_s28  ;;  %v2738_v24 = vsel %vm2690_vm7, %v2673_v44, %v1762_v55  ;;  %v9542_v44 = vld [vmem:[#allocation180_spill] sm:$0xff] }
 0x549   :  { %v3649_v57 = vadd.f32 %v3648_v34, %v3647_v37  ;;  %v3347_v22 = vpop.f32.mrf.mxu1  ;;  %v2803_v46 = vsel %vm2755_vm9, %v2738_v24, %v1955_v14  ;;  %v9533_v14 = vld [vmem:[#allocation253_spill] sm:$0xff]  ;;  %v2479_v34 = vsel %vm2430_vm4, %v9433_v26, %v9542_v44  ;;  %v9546_v26 = vld [vmem:[#allocation388_spill] sm:$0xff] }
 0x54a   :  { %v3348_v19 = vadd.f32 %v7036_v40, %v3347_v22  ;;  %v1957_v21 = vpop.permute.xlu0 %1956  ;;  %v2868_v36 = vsel %vm2820_vm10, %v2803_v46, %v2147_v35  ;;  %v9543_v24 = vld [vmem:[#allocation173_spill] sm:$0xff]  ;;  %v9544_v46 = vld [vmem:[#allocation340_spill] sm:$0xff] }
 0x54b   :  { %v2933_v37 = vsel %vm2885_vm11, %v2868_v36, %v2336_v62  ;;  %v9535_v62 = vld [vmem:[#allocation322_spill] sm:$0xff]  ;;  %v2544_v22 = vsel %vm2495_vm5, %v2479_v34, %v9543_v24 }
 0x54c   :  { %v3507_v2 = vadd.f32 %v3983_v50, %v3348_v19  ;;  %v3061_v9 = vmul.f32 %v2997_v31, %v2933_v37  ;;  %v9545_v19 = vld [vmem:[#allocation177_spill] sm:$0xff] }
 0x54d   :  { %1966 = vrot.lane.b32.xlu2 %v9532_v32, %s4065_s28  ;;  %1918 = vrot.lane.b32.xlu1 %v9533_v14, %s4065_s28  ;;  %v9547_v32 = vld [vmem:[#allocation17_spill] sm:$0xff] }
 0x54e   :  { %v3571_v56 = vmax.f32 %v3507_v2, 0.0  ;;  %3924 = vmatmul.msk.f32.gmra.mxu2 %vm103_vm1, %v3061_v9  ;;  %v2998_v14 = vld [vmem:[%s8377_s1 + $0x180] sm:$0xff] }
 0x54f   :  { %v1909_v35 = vpop.permute.xlu2 %1908  ;;  %v1907_v58 = vpop.permute.xlu1 %1906 }
 0x550   :  { %v3650_v3 = vsel %vm2430_vm4, %v3571_v56, 0.0  ;;  %2349 = vrot.lane.b32.xlu0 %v9535_v62, %s4066_s29  ;;  %v2779_v51 = vsel %vm2755_vm9, %v2714_v18, %v1907_v58  ;;  %v9550_v58 = vld [vmem:[#allocation325_spill] sm:$0xff] }
 0x551   :  { %v7480_v52 = vadd.f32 %v3650_v3, %v3649_v57  ;;  %v2844_v41 = vsel %vm2820_vm10, %v2779_v51, %v2099_v16  ;;  %v2609_v16 = vsel %vm2560_vm6, %v2544_v22, %v9544_v46  ;;  %v9549_v3 = vld [vmem:[#allocation239_spill] sm:$0xff]  ;;  %v3984_v46 = vld [vmem:[%s8376_s0 + $0x88] sm:$0xff] }
 0x552   :  { %v2338_v45 = vpop.permute.xlu0 %2337  ;;  %v2674_v31 = vsel %vm2625_vm8, %v2609_v16, %v9546_v26  ;;  %v9559_v26 = vld [vmem:[#allocation372_spill] sm:$0xff] }
 0x553   :  { %v2739_v36 = vsel %vm2690_vm7, %v2674_v31, %v1764_v13 }
 0x554   :  { %v2804_v2 = vsel %vm2755_vm9, %v2739_v36, %v1957_v21  ;;  %v9560_v36 = vld [vmem:[#allocation15_spill] sm:$0xff] }
 0x555   :  { %2347 = vrot.lane.b32.xlu2 %v9540_v0, %s4066_s29  ;;  %2299 = vrot.lane.b32.xlu1 %v9541_v27, %s4066_s29 }
 0x557   :  { %v2290_v23 = vpop.permute.xlu2 %2289  ;;  %v2288_v29 = vpop.permute.xlu1 %2287 }
 0x558   :  { %1777 = vrot.lane.b32.xlu0 %v9540_v0, %s4063_s20  ;;  %v2909_v55 = vsel %vm2885_vm11, %v2844_v41, %v2288_v29  ;;  %v2974_v0 = vld [vmem:[%s8377_s1 + $0xc0] sm:$0xff] }
 0x559   :  { %v3037_v10 = vmul.f32 %v2973_v15, %v2909_v55  ;;  %v9556_v15 = vld [vmem:[#allocation281_spill] sm:$0xff] }
 0x55a   :  { %v7503_v57 = vpop.permute.xlu0 %1765 }
 0x55b   :  { %3900 = vmatmul.msk.f32.gmra.mxu1 %vm103_vm1, %v3037_v10 }
 0x55d   :  { %1775 = vrot.lane.b32.xlu2 %v9524_v39, %s4063_s20  ;;  %2160 = vrot.lane.b32.xlu1 %v9545_v19, %s4064_s24  ;;  %v9548_v39 = vld [vmem:[#allocation245_spill] sm:$0xff] }
 0x55e   :  { %v2455_v9 = vsel %vm2430_vm4, %v9438_v12, %v9548_v39 }
 0x55f   :  { %v2151_v50 = vpop.permute.xlu2 %2150  ;;  %v2149_v37 = vpop.permute.xlu1 %2148  ;;  %v2520_v21 = vsel %vm2495_vm5, %v2455_v9, %v9549_v3  ;;  %v9563_v9 = vld [vmem:[#allocation207_spill] sm:$0xff] }
 0x560   :  { %1922 = vrot.lane.b32.xlu0 %v9547_v32, %s4065_s28  ;;  %v2869_v8 = vsel %vm2820_vm10, %v2804_v2, %v2149_v37  ;;  %v2585_v11 = vsel %vm2560_vm6, %v2520_v21, %v9550_v58  ;;  %v9562_v32 = vld [vmem:[#allocation199_spill] sm:$0xff]  ;;  %v2975_v21 = vld [vmem:[%s8377_s1 + $0xc8] sm:$0xff] }
 0x561   :  { %v2934_v61 = vsel %vm2885_vm11, %v2869_v8, %v2338_v45  ;;  %v2650_v12 = vsel %vm2625_vm8, %v2585_v11, %v9552_v42  ;;  %v9554_v45 = vld [vmem:[#allocation258_spill] sm:$0xff]  ;;  %v9566_v42 = vld [vmem:[#allocation348_spill] sm:$0xff] }
 0x562   :  { %v1911_v13 = vpop.permute.xlu0 %1910  ;;  %v3062_v56 = vmul.f32 %v2998_v14, %v2934_v61  ;;  %v2456_v33 = vsel %vm2430_vm4, %v9435_v49, %v9554_v45  ;;  %v2715_v17 = vsel %vm2690_vm7, %v2650_v12, %v9555_v38  ;;  %v9557_v49 = vld [vmem:[#allocation252_spill] sm:$0xff]  ;;  %v2480_v14 = vsel %vm2430_vm4, %v9430_v63, %v9562_v32  ;;  %v9564_v63 = vld [vmem:[#allocation203_spill] sm:$0xff] }
 0x563   :  { %v2780_v51 = vsel %vm2755_vm9, %v2715_v17, %v1909_v35  ;;  %v2521_v34 = vsel %vm2495_vm5, %v2456_v33, %v9557_v49  ;;  %v9558_v35 = vld [vmem:[#allocation18_spill] sm:$0xff]  ;;  %v9567_v33 = vld [vmem:[#allocation243_spill] sm:$0xff] }
 0x564   :  { %3925 = vmatmul.msk.f32.gmra.mxu2 %vm103_vm1, %v3062_v56  ;;  %v2586_v24 = vsel %vm2560_vm6, %v2521_v34, %v9558_v35 }
 0x565   :  { %1920 = vrot.lane.b32.xlu2 %v9551_v30, %s4065_s28  ;;  %2112 = vrot.lane.b32.xlu1 %v9553_v54, %s4064_s24  ;;  %v2651_v31 = vsel %vm2625_vm8, %v2586_v24, %v9559_v26  ;;  %v3985_v24 = vld [vmem:[%s8376_s0 + $0x90] sm:$0xff] }
 0x566   :  { %v2716_v2 = vsel %vm2690_vm7, %v2651_v31, %v9560_v36  ;;  %v9573_v31 = vld [vmem:[#allocation383_spill] sm:$0xff] }
 0x567   :  { %v2103_v18 = vpop.permute.xlu2 %2102  ;;  %v2101_v27 = vpop.permute.xlu1 %2100  ;;  %v2781_v39 = vsel %vm2755_vm9, %v2716_v2, %v1911_v13  ;;  %v9565_v13 = vld [vmem:[#allocation194_spill] sm:$0xff] }
 0x568   :  { %2303 = vrot.lane.b32.xlu0 %v9556_v15, %s4066_s29  ;;  %v3350_v41 = vpop.f32.mrf.mxu1  ;;  %v2845_v29 = vsel %vm2820_vm10, %v2780_v51, %v2101_v27  ;;  %v2846_v8 = vsel %vm2820_vm10, %v2781_v39, %v2103_v18  ;;  %v2545_v30 = vsel %vm2495_vm5, %v2480_v14, %v9565_v13  ;;  %v9568_v51 = vld [vmem:[#allocation200_spill] sm:$0xff]  ;;  %v2999_v15 = vld [vmem:[%s8377_s1 + $0x188] sm:$0xff] }
 0x569   :  { %v3351_v44 = vadd.f32 %v7036_v40, %v3350_v41  ;;  %v2910_v55 = vsel %vm2885_vm11, %v2845_v29, %v2290_v23  ;;  %v9561_v23 = vld [vmem:[#allocation276_spill] sm:$0xff]  ;;  %v2610_v12 = vsel %vm2560_vm6, %v2545_v30, %v9566_v42  ;;  %v9576_v13 = vld [vmem:[#allocation278_spill] sm:$0xff] }
 0x56a   :  { %v2292_v10 = vpop.permute.xlu0 %2291  ;;  %v3038_v22 = vmul.f32 %v2974_v0, %v2910_v55  ;;  %v9569_v0 = vld [vmem:[#allocation326_spill] sm:$0xff]  ;;  %v2457_v30 = vsel %vm2430_vm4, %v9463_v43, %v9576_v13  ;;  %v9592_v13 = vld [vmem:[#allocation260_spill] sm:$0xff] }
 0x56b   :  { %v3508_v16 = vadd.f32 %v3984_v46, %v3351_v44  ;;  %v2911_v58 = vsel %vm2885_vm11, %v2846_v8, %v2292_v10  ;;  %v9570_v10 = vld [vmem:[#allocation222_spill] sm:$0xff] }
 0x56c   :  { %3901 = vmatmul.msk.f32.gmra.mxu1 %vm103_vm1, %v3038_v22  ;;  %v3039_v38 = vmul.f32 %v2975_v21, %v2911_v58  ;;  %v2481_v35 = vsel %vm2430_vm4, %v9456_v60, %v9570_v10  ;;  %v3000_v8 = vld [vmem:[%s8377_s1 + $0x190] sm:$0xff]  ;;  %v3986_v21 = vld [vmem:[%s8376_s0 + $0x98] sm:$0xff] }
 0x56d   :  { %v3572_v37 = vmax.f32 %v3508_v16, 0.0  ;;  %2301 = vrot.lane.b32.xlu2 %v9561_v23, %s4066_s29  ;;  %1970 = vrot.lane.b32.xlu1 %v9563_v9, %s4065_s28  ;;  %v9572_v16 = vld [vmem:[#allocation341_spill] sm:$0xff]  ;;  %v9574_v23 = vld [vmem:[#allocation208_spill] sm:$0xff] }
 0x56e   :  { %v9583_v10 = vld [vmem:[#allocation268_spill] sm:$0xff] }
 0x56f   :  { %v3652_v61 = vsel %vm2430_vm4, %v3572_v37, 0.0  ;;  %v1961_v56 = vpop.permute.xlu2 %1960  ;;  %v1959_v11 = vpop.permute.xlu1 %1958 }
 0x570   :  { %v3653_v3 = vadd.f32 %v3652_v61, %v7480_v52  ;;  %2164 = vrot.lane.b32.xlu0 %v9564_v63, %s4064_s24  ;;  %v2675_v52 = vsel %vm2625_vm8, %v2610_v12, %v9567_v33  ;;  %v9577_v12 = vld [vmem:[#allocation16_spill] sm:$0xff] }
 0x571   :  { %v2740_v17 = vsel %vm2690_vm7, %v2675_v52, %v7503_v57 }
 0x572   :  { %v2153_v45 = vpop.permute.xlu0 %2152  ;;  %v2805_v18 = vsel %vm2755_vm9, %v2740_v17, %v1959_v11  ;;  %v9575_v11 = vld [vmem:[#allocation214_spill] sm:$0xff]  ;;  %v9579_v17 = vld [vmem:[#allocation273_spill] sm:$0xff] }
 0x573   :  { %v2870_v41 = vsel %vm2820_vm10, %v2805_v18, %v2151_v50  ;;  %v2522_v18 = vsel %vm2495_vm5, %v2457_v30, %v9579_v17  ;;  %v9593_v30 = vld [vmem:[#allocation330_spill] sm:$0xff] }
 0x574   :  { %3902 = vmatmul.msk.f32.gmra.mxu1 %vm103_vm1, %v3039_v38  ;;  %v9578_v38 = vld [vmem:[#allocation313_spill] sm:$0xff] }
 0x575   :  { %2162 = vrot.lane.b32.xlu2 %v9568_v51, %s4064_s24  ;;  %2351 = vrot.lane.b32.xlu1 %v9569_v0, %s4066_s29 }
 0x577   :  { %v2342_v27 = vpop.permute.xlu2 %2341  ;;  %v2340_v29 = vpop.permute.xlu1 %2339 }
 0x578   :  { %2116 = vrot.lane.b32.xlu0 %v9327_v53, %s4064_s24  ;;  %v2935_v57 = vsel %vm2885_vm11, %v2870_v41, %v2340_v29  ;;  %v9571_v53 = vld [vmem:[#allocation217_spill] sm:$0xff] }
 0x579   :  { %v3353_v44 = vpop.f32.mrf.mxu1  ;;  %v3063_v49 = vmul.f32 %v2999_v15, %v2935_v57  ;;  %v2546_v22 = vsel %vm2495_vm5, %v2481_v35, %v9571_v53  ;;  %v9580_v15 = vld [vmem:[#allocation328_spill] sm:$0xff]  ;;  %v9581_v29 = vld [vmem:[#allocation25_spill] sm:$0xff] }
 0x57a   :  { %v3354_v34 = vadd.f32 %v7036_v40, %v3353_v44  ;;  %v2105_v55 = vpop.permute.xlu0 %2104  ;;  %v2611_v60 = vsel %vm2560_vm6, %v2546_v22, %v9572_v16  ;;  %v2587_v43 = vsel %vm2560_vm6, %v2522_v18, %v9580_v15  ;;  %v9582_v44 = vld [vmem:[#allocation406_spill] sm:$0xff]  ;;  %v9584_v22 = vld [vmem:[#allocation331_spill] sm:$0xff]  ;;  %v9598_v18 = vld [vmem:[#allocation401_spill] sm:$0xff] }
 0x57b   :  { %3926 = vmatmul.msk.f32.gmra.mxu2 %vm103_vm1, %v3063_v49  ;;  %v2676_v36 = vsel %vm2625_vm8, %v2611_v60, %v9573_v31  ;;  %v2652_v57 = vsel %vm2625_vm8, %v2587_v43, %v9581_v29  ;;  %v2977_v29 = vld [vmem:[%s8377_s1 + $0xd8] sm:$0xff] }
 0x57c   :  { %v3509_v50 = vadd.f32 %v3985_v24, %v3354_v34  ;;  %v2717_v49 = vsel %vm2690_vm7, %v2652_v57, %v9582_v44  ;;  %v2976_v24 = vld [vmem:[%s8377_s1 + $0xd0] sm:$0xff] }
 0x57d   :  { %2114 = vrot.lane.b32.xlu2 %v9311_v20, %s4064_s24  ;;  %1779 = vrot.lane.b32.xlu1 %v9535_v62, %s4063_s20  ;;  %v9599_v44 = vld [vmem:[#allocation367_spill] sm:$0xff] }
 0x57e   :  { %v3573_v46 = vmax.f32 %v3509_v50, 0.0 }
 0x57f   :  { %v1770_v26 = vpop.permute.xlu2 %1769  ;;  %v1768_v37 = vpop.permute.xlu1 %1767 }
 0x580   :  { %v3654_v2 = vsel %vm2430_vm4, %v3573_v46, 0.0  ;;  %1974 = vrot.lane.b32.xlu0 %v9574_v23, %s4065_s28  ;;  %v2741_v32 = vsel %vm2690_vm7, %v2676_v36, %v1768_v37  ;;  %v9585_v46 = vld [vmem:[#allocation209_spill] sm:$0xff]  ;;  %v9587_v23 = vld [vmem:[#allocation343_spill] sm:$0xff] }
 0x581   :  { %v3655_v20 = vadd.f32 %v3654_v2, %v3653_v3  ;;  %v3356_v14 = vpop.f32.mrf.mxu1  ;;  %v2806_v39 = vsel %vm2755_vm9, %v2741_v32, %v1961_v56  ;;  %v2482_v16 = vsel %vm2430_vm4, %v9478_v48, %v9585_v46  ;;  %v9586_v2 = vld [vmem:[#allocation204_spill] sm:$0xff]  ;;  %v9589_v48 = vld [vmem:[#allocation201_spill] sm:$0xff] }
 0x582   :  { %v3357_v62 = vadd.f32 %v7036_v40, %v3356_v14  ;;  %v1963_v9 = vpop.permute.xlu0 %1962  ;;  %v2871_v61 = vsel %vm2820_vm10, %v2806_v39, %v2153_v45  ;;  %v2547_v37 = vsel %vm2495_vm5, %v2482_v16, %v9586_v2  ;;  %v9602_v2 = vld [vmem:[#allocation375_spill] sm:$0xff] }
 0x583   :  { %v2936_v3 = vsel %vm2885_vm11, %v2871_v61, %v2342_v27  ;;  %v9590_v61 = vld [vmem:[#allocation231_spill] sm:$0xff] }
 0x584   :  { %v3510_v58 = vadd.f32 %v3986_v21, %v3357_v62  ;;  %v3064_v56 = vmul.f32 %v3000_v8, %v2936_v3  ;;  %v9591_v21 = vld [vmem:[#allocation266_spill] sm:$0xff] }
 0x585   :  { %1972 = vrot.lane.b32.xlu2 %v9575_v11, %s4065_s28  ;;  %1924 = vrot.lane.b32.xlu1 %v9577_v12, %s4065_s28  ;;  %v9594_v12 = vld [vmem:[#allocation327_spill] sm:$0xff] }
 0x586   :  { %v3574_v42 = vmax.f32 %v3510_v58, 0.0  ;;  %3927 = vmatmul.msk.f32.gmra.mxu2 %vm103_vm1, %v3064_v56  ;;  %v2458_v58 = vsel %vm2430_vm4, %v9483_v7, %v9591_v21 }
 0x587   :  { %v1915_v45 = vpop.permute.xlu2 %1914  ;;  %v1913_v52 = vpop.permute.xlu1 %1912 }
 0x588   :  { %v3656_v33 = vsel %vm2430_vm4, %v3574_v42, 0.0  ;;  %1783 = vrot.lane.b32.xlu0 %v9578_v38, %s4063_s20  ;;  %v2782_v34 = vsel %vm2755_vm9, %v2717_v49, %v1913_v52  ;;  %v9596_v52 = vld [vmem:[#allocation232_spill] sm:$0xff] }
 0x589   :  { %v7648_v27 = vadd.f32 %v3656_v33, %v3655_v20  ;;  %v2847_v50 = vsel %vm2820_vm10, %v2782_v34, %v2105_v55  ;;  %v2612_v55 = vsel %vm2560_vm6, %v2547_v37, %v9587_v23  ;;  %v9588_v20 = vld [vmem:[#allocation391_spill] sm:$0xff]  ;;  %v9595_v33 = vld [vmem:[#allocation37_spill] sm:$0xff] }
 0x58a   :  { %v2344_v41 = vpop.permute.xlu0 %2343  ;;  %v2677_v32 = vsel %vm2625_vm8, %v2612_v55, %v9588_v20  ;;  %v9603_v23 = vld [vmem:[#allocation57_spill] sm:$0xff]  ;;  %v9605_v20 = vld [vmem:[#allocation223_spill] sm:$0xff] }
 0x58b   :  { %v2742_v14 = vsel %vm2690_vm7, %v2677_v32, %v1770_v26  ;;  %v2483_v32 = vsel %vm2430_vm4, %v9475_v4, %v9605_v20  ;;  %v9606_v4 = vld [vmem:[#allocation319_spill] sm:$0xff] }
 0x58c   :  { %v2807_v62 = vsel %vm2755_vm9, %v2742_v14, %v1963_v9  ;;  %v2523_v9 = vsel %vm2495_vm5, %v2458_v58, %v9592_v13  ;;  %v2978_v58 = vld [vmem:[%s8377_s1 + $0xe0] sm:$0xff]  ;;  %v9608_v13 = vld [vmem:[#allocation350_spill] sm:$0xff] }
 0x58d   :  { %2353 = vrot.lane.b32.xlu2 %v9578_v38, %s4066_s29  ;;  %2305 = vrot.lane.b32.xlu1 %v9583_v10, %s4066_s29  ;;  %v2588_v42 = vsel %vm2560_vm6, %v2523_v9, %v9593_v30  ;;  %v9597_v38 = vld [vmem:[#allocation280_spill] sm:$0xff] }
 0x58e   :  { %v2653_v7 = vsel %vm2625_vm8, %v2588_v42, %v9595_v33  ;;  %v2459_v17 = vsel %vm2430_vm4, %v9480_v25, %v9597_v38  ;;  %v9600_v25 = vld [vmem:[#allocation274_spill] sm:$0xff]  ;;  %v9609_v42 = vld [vmem:[#allocation384_spill] sm:$0xff]  ;;  %v9611_v38 = vld [vmem:[#allocation371_spill] sm:$0xff] }
 0x58f   :  { %v2296_v35 = vpop.permute.xlu2 %2295  ;;  %v2294_v53 = vpop.permute.xlu1 %2293  ;;  %v2718_v15 = vsel %vm2690_vm7, %v2653_v7, %v9598_v18 }
 0x590   :  { %2357 = vrot.lane.b32.xlu0 %v9584_v22, %s4066_s29  ;;  %v2912_v60 = vsel %vm2885_vm11, %v2847_v50, %v2294_v53 }
 0x591   :  { %v3040_v31 = vmul.f32 %v2976_v24, %v2912_v60  ;;  %v2524_v24 = vsel %vm2495_vm5, %v2459_v17, %v9600_v25  ;;  %v3987_v60 = vld [vmem:[%s8376_s0 + $0xa0] sm:$0xff]  ;;  %v895_v17 = vrot.slane %v9611_v38, 1  ;;  %v9612_v25 = vld [vmem:[#allocation246_spill] sm:$0xff] }
 0x592   :  { %v7671_v36 = vpop.permute.xlu0 %1771 }
 0x593   :  { %3903 = vmatmul.msk.f32.gmra.mxu1 %vm103_vm1, %v3040_v31 }
 0x595   :  { %1781 = vrot.lane.b32.xlu2 %v9569_v0, %s4063_s20  ;;  %2166 = vrot.lane.b32.xlu1 %v9589_v48, %s4064_s24  ;;  %v3001_v0 = vld [vmem:[%s8377_s1 + $0x198] sm:$0xff] }
 0x597   :  { %v7685_v39 = vpop.permute.xlu2 %2156  ;;  %v2155_v8 = vpop.permute.xlu1 %2154 }
 0x598   :  { %2170 = vrot.lane.b32.xlu0 %v9590_v61, %s4064_s24  ;;  %v2872_v3 = vsel %vm2820_vm10, %v2807_v62, %v2155_v8 }
 0x599   :  { %v2937_v26 = vsel %vm2885_vm11, %v2872_v3, %v2344_v41  ;;  %v2783_v41 = vsel %vm2755_vm9, %v2718_v15, %v1915_v45  ;;  %v9601_v45 = vld [vmem:[#allocation34_spill] sm:$0xff]  ;;  %v3002_v15 = vld [vmem:[%s8377_s1 + $0x1a0] sm:$0xff] }
 0x59a   :  { %v1917_v11 = vpop.permute.xlu0 %1916  ;;  %v3065_v56 = vmul.f32 %v3001_v0, %v2937_v26  ;;  %v2589_v46 = vsel %vm2560_vm6, %v2524_v24, %v9601_v45  ;;  %v3989_v24 = vld [vmem:[%s8376_s0 + $0xa8] sm:$0xff] }
 0x59b   :  { %v2654_v37 = vsel %vm2625_vm8, %v2589_v46, %v9602_v2  ;;  %v9616_v2 = vld [vmem:[#allocation386_spill] sm:$0xff] }
 0x59c   :  { %3928 = vmatmul.msk.f32.gmra.mxu2 %vm103_vm1, %v3065_v56 }
 0x59d   :  { %2355 = vrot.lane.b32.xlu2 %v9594_v12, %s4066_s29  ;;  %1976 = vrot.lane.b32.xlu1 %v9596_v52, %s4065_s28  ;;  %v9610_v52 = vld [vmem:[#allocation238_spill] sm:$0xff] }
 0x59f   :  { %v2109_v43 = vpop.permute.xlu2 %2108  ;;  %v2107_v57 = vpop.permute.xlu1 %2106 }
 0x5a0   :  { %1980 = vrot.lane.b32.xlu0 %v9599_v44, %s4065_s28  ;;  %v3359_v49 = vpop.f32.mrf.mxu1  ;;  %v2848_v34 = vsel %vm2820_vm10, %v2783_v41, %v2107_v57 }
 0x5a1   :  { %v3360_v10 = vadd.f32 %v7036_v40, %v3359_v49  ;;  %v2913_v50 = vsel %vm2885_vm11, %v2848_v34, %v2296_v35  ;;  %v2719_v40 = vsel %vm2690_vm7, %v2654_v37, %v9603_v23  ;;  %v9604_v35 = vld [vmem:[#allocation224_spill] sm:$0xff] }
 0x5a2   :  { %v2298_v53 = vpop.permute.xlu0 %2297  ;;  %v3041_v16 = vmul.f32 %v2977_v29, %v2913_v50  ;;  %v2784_v14 = vsel %vm2755_vm9, %v2719_v40, %v1917_v11  ;;  %v9607_v11 = vld [vmem:[#allocation218_spill] sm:$0xff]  ;;  %v7781_v49 = vld [vmem:[%s8381_s5] ss:$0 sm:$0xff] }
 0x5a3   :  { %v3511_v31 = vadd.f32 %v3987_v60, %v3360_v10  ;;  %v2849_v62 = vsel %vm2820_vm10, %v2784_v14, %v2109_v43  ;;  %v2548_v56 = vsel %vm2495_vm5, %v2483_v32, %v9607_v11  ;;  %v7771_v43 = vsel %vm762_vm3, %v895_v17, 0.0  ;;  %v9615_v60 = vld [vmem:[#allocation344_spill] sm:$0xff] }
 0x5a4   :  { %3904 = vmatmul.msk.f32.gmra.mxu1 %vm103_vm1, %v3041_v16  ;;  %v2914_v3 = vsel %vm2885_vm11, %v2849_v62, %v2298_v53  ;;  %v2613_v9 = vsel %vm2560_vm6, %v2548_v56, %v9608_v13  ;;  %v9613_v53 = vld [vmem:[#allocation240_spill] sm:$0xff]  ;;  %v9614_v16 = vld [vmem:[#allocation310_spill] sm:$0xff]  ;;  %v9619_v13 = vld [vmem:[#allocation299_spill] sm:$0xff] }
 0x5a5   :  { %v3575_v55 = vmax.f32 %v3511_v31, 0.0  ;;  %2168 = vrot.lane.b32.xlu2 %v9604_v35, %s4064_s24  ;;  %1785 = vrot.lane.b32.xlu1 %v9594_v12, %s4063_s20  ;;  %v3042_v12 = vmul.f32 %v2978_v58, %v2914_v3  ;;  %v3003_v58 = vld [vmem:[%s8377_s1 + $0x1a8] sm:$0xff] }
 0x5a7   :  { %v3658_v8 = vsel %vm2430_vm4, %v3575_v55, 0.0  ;;  %v1967_v0 = vpop.permute.xlu2 %1966  ;;  %v1965_v26 = vpop.permute.xlu1 %1964  ;;  %v9617_v55 = vmov 0.0  }
 0x5a8   :  { %v3659_v21 = vadd.f32 %v3658_v8, %v7648_v27  ;;  %1789 = vrot.lane.b32.xlu0 %v9606_v4, %s4063_s20  ;;  %v2678_v27 = vsel %vm2625_vm8, %v2613_v9, %v9609_v42  ;;  %v2460_v9 = vsel %vm2430_vm4, %v9508_v28, %v9619_v13 }
 0x5a9   :  { %v2743_v33 = vsel %vm2690_vm7, %v2678_v27, %v7671_v36 }
 0x5aa   :  { %v2159_v30 = vpop.permute.xlu0 %2158  ;;  %v2808_v7 = vsel %vm2755_vm9, %v2743_v33, %v1965_v26  ;;  %v3990_v26 = vld [vmem:[%s8376_s0 + $0xb0] sm:$0xff] }
 0x5ab   :  { %v2873_v36 = vsel %vm2820_vm10, %v2808_v7, %v7685_v39  ;;  %v2484_v39 = vsel %vm2430_vm4, %v9501_v47, %v9612_v25  ;;  %v9621_v7 = vld [vmem:[#allocation293_spill] sm:$0xff] }
 0x5ac   :  { %3905 = vmatmul.msk.f32.gmra.mxu1 %vm103_vm1, %v3042_v12  ;;  %v2549_v45 = vsel %vm2495_vm5, %v2484_v39, %v9613_v53  ;;  %v2979_v25 = vld [vmem:[%s8377_s1 + $0xe8] sm:$0xff] }
 0x5ad   :  { %1978 = vrot.lane.b32.xlu2 %v9610_v52, %s4065_s28  ;;  %2359 = vrot.lane.b32.xlu1 %v9606_v4, %s4066_s29  ;;  %v2614_v47 = vsel %vm2560_vm6, %v2549_v45, %v9615_v60  ;;  %v2525_v52 = vsel %vm2495_vm5, %v2460_v9, %v9621_v7 }
 0x5ae   :  { %v2679_v37 = vsel %vm2625_vm8, %v2614_v47, %v9616_v2  ;;  %v9626_v47 = vld [vmem:[#allocation227_spill] sm:$0xff] }
 0x5af   :  { %v2348_v18 = vpop.permute.xlu2 %2347  ;;  %v2346_v41 = vpop.permute.xlu1 %2345 }
 0x5b0   :  { %2363 = vrot.lane.b32.xlu0 %v7771_v43, %s4066_s29  ;;  %v2938_v29 = vsel %vm2885_vm11, %v2873_v36, %v2346_v41  ;;  %v9623_v36 = vld [vmem:[#allocation42_spill] sm:$0xff] }
 0x5b1   :  { %v3362_v57 = vpop.f32.mrf.mxu1  ;;  %v3066_v44 = vmul.f32 %v3002_v15, %v2938_v29  ;;  %v9624_v29 = vld [vmem:[#allocation80_spill] sm:$0xff] }
 0x5b2   :  { %v3363_v34 = vadd.f32 %v7781_v49, %v3362_v57  ;;  %v2111_v10 = vpop.permute.xlu0 %2110 }
 0x5b3   :  { %3929 = vmatmul.msk.f32.gmra.mxu2 %vm103_vm1, %v3066_v44 }
 0x5b4   :  { %v3512_v50 = vadd.f32 %v3989_v24, %v3363_v34 }
 0x5b5   :  { %1787 = vrot.lane.b32.xlu2 %v9584_v22, %s4063_s20  ;;  %2172 = vrot.lane.b32.xlu1 %v9614_v16, %s4064_s24 }
 0x5b6   :  { %v3576_v46 = vmax.f32 %v3512_v50, 0.0  ;;  %v9625_v50 = vld [vmem:[#allocation233_spill] sm:$0xff] }
 0x5b7   :  { %v1776_v31 = vpop.permute.xlu2 %1775  ;;  %v1774_v40 = vpop.permute.xlu1 %1773  ;;  %v2485_v53 = vsel %vm2430_vm4, %v9523_v1, %v9625_v50 }
 0x5b8   :  { %v3660_v23 = vsel %vm2430_vm4, %v3576_v46, 0.0  ;;  %2176 = vrot.lane.b32.xlu0 %v9617_v55, %s4064_s24  ;;  %v2744_v20 = vsel %vm2690_vm7, %v2679_v37, %v1774_v40  ;;  %v2550_v2 = vsel %vm2495_vm5, %v2485_v53, %v9626_v47  ;;  %v9627_v37 = vrot.slane %v9611_v38, 7  ;;  %v9628_v40 = vld [vmem:[#allocation346_spill] sm:$0xff]  ;;  %v3991_v53 = vld [vmem:[%s8376_s0 + $0xb8] sm:$0xff] }
 0x5b9   :  { %v3661_v22 = vadd.f32 %v3660_v23, %v3659_v21  ;;  %v3365_v32 = vpop.f32.mrf.mxu1  ;;  %v2809_v14 = vsel %vm2755_vm9, %v2744_v20, %v1967_v0  ;;  %v9618_v21 = vrot.slane %v9614_v16, 1 }
 0x5ba   :  { %v3366_v62 = vadd.f32 %v7781_v49, %v3365_v32  ;;  %v1969_v8 = vpop.permute.xlu0 %1968  ;;  %v2874_v3 = vsel %vm2820_vm10, %v2809_v14, %v2159_v30  ;;  %v9620_v30 = vld [vmem:[#allocation374_spill] sm:$0xff]  ;;  %v900_v23 = vsel %vm635_vm2, %v9627_v37, 0.0 }
 0x5bb   :  { %v896_v11 = vsel %vm762_vm3, %v9618_v21, %v895_v17  ;;  %v2939_v0 = vsel %vm2885_vm11, %v2874_v3, %v2348_v18  ;;  %v9622_v18 = vld [vmem:[#allocation332_spill] sm:$0xff]  ;;  %v9630_v3 = vld [vmem:[#allocation286_spill] sm:$0xff] }
 0x5bc   :  { %v3513_v4 = vadd.f32 %v3990_v26, %v3366_v62  ;;  %v3067_v56 = vmul.f32 %v3003_v58, %v2939_v0  ;;  %v2590_v28 = vsel %vm2560_vm6, %v2525_v52, %v9622_v18  ;;  %v3004_v58 = vld [vmem:[%s8377_s1 + $0x1b0] sm:$0xff]  ;;  %v2461_v26 = vsel %vm2430_vm4, %v9527_v6, %v9630_v3 }
 0x5bd   :  { %2361 = vrot.lane.b32.xlu2 %v896_v11, %s4066_s29  ;;  %1982 = vrot.lane.b32.xlu1 %v9620_v30, %s4065_s28  ;;  %v2655_v41 = vsel %vm2625_vm8, %v2590_v28, %v9623_v36  ;;  %v9633_v6 = vld [vmem:[#allocation63_spill] sm:$0xff] }
 0x5be   :  { %v3577_v42 = vmax.f32 %v3513_v4, 0.0  ;;  %3930 = vmatmul.msk.f32.gmra.mxu2 %vm103_vm1, %v3067_v56  ;;  %v2720_v57 = vsel %vm2690_vm7, %v2655_v41, %v9624_v29  ;;  %v9632_v56 = vld [vmem:[#allocation334_spill] sm:$0xff]  ;;  %v9636_v41 = vld [vmem:[#allocation295_spill] sm:$0xff] }
 0x5bf   :  { %v1921_v27 = vpop.permute.xlu2 %1920  ;;  %v1919_v33 = vpop.permute.xlu1 %1918  ;;  %v2980_v18 = vld [vmem:[%s8377_s1 + $0xf0] sm:$0xff] }
 0x5c0   :  { %v3662_v12 = vsel %vm2430_vm4, %v3577_v42, 0.0  ;;  %1986 = vrot.lane.b32.xlu0 %v9617_v55, %s4065_s28  ;;  %v2785_v44 = vsel %vm2755_vm9, %v2720_v57, %v1919_v33  ;;  %v9634_v42 = vld [vmem:[#allocation301_spill] sm:$0xff] }
 0x5c1   :  { %v7830_v17 = vadd.f32 %v3662_v12, %v3661_v22  ;;  %v2850_v39 = vsel %vm2820_vm10, %v2785_v44, %v2111_v10  ;;  %v2615_v10 = vsel %vm2560_vm6, %v2550_v2, %v9628_v40  ;;  %v9629_v22 = vld [vmem:[#allocation394_spill] sm:$0xff]  ;;  %v2462_v30 = vsel %vm2430_vm4, %v9525_v5, %v9634_v42  ;;  %v9635_v12 = vld [vmem:[#allocation403_spill] sm:$0xff] }
 0x5c2   :  { %v2350_v15 = vpop.permute.xlu0 %2349  ;;  %v2680_v1 = vsel %vm2625_vm8, %v2615_v10, %v9629_v22  ;;  %v2527_v29 = vsel %vm2495_vm5, %v2462_v30, %v9636_v41 }
 0x5c3   :  { %v2745_v20 = vsel %vm2690_vm7, %v2680_v1, %v1776_v31  ;;  %v3759_v31 = vld [vmem:[%s8382_s6] sm:$0xf]  ;;  %v2981_v1 = vld [vmem:[%s8377_s1 + $0xf8] sm:$0xff]  ;;  %s3802_s6 = sshll.u32 %s8384_s8, 4  ;;  %s3803_s6 = int_to_ptr.hbm [resolvable:$true] %s3802_s6 }
 0x5c4   :  { %v2810_v14 = vsel %vm2755_vm9, %v2745_v20, %v1969_v8  ;;  %3941 = vmatpush.msk.msrb.mxu2 %vm296_vm0, %v3759_v31  ;;  %v9631_v8 = vld [vmem:[#allocation282_spill] sm:$0xff] }
 0x5c5   :  { %2174 = vrot.lane.b32.xlu2 %v9611_v38, %s4064_s24  ;;  %1791 = vrot.lane.b32.xlu1 %v896_v11, %s4063_s20  ;;  %v2526_v0 = vsel %vm2495_vm5, %v2461_v26, %v9631_v8  ;;  %v9642_v26 = vld [vmem:[#allocation352_spill] sm:$0xff]  ;;  %s4067_s24 = smov [#allocation2]  }
 0x5c6   :  { %v2591_v13 = vsel %vm2560_vm6, %v2526_v0, %v9632_v56  ;;  %s3800_s22 = sshll.u32 %s4067_s24, 4  ;;  %s3801_s22 = int_to_ptr.vmem [resolvable:$true] %s3800_s22 }
 0x5c7   :  { %v2302_v34 = vpop.permute.xlu2 %2301  ;;  %v2300_v24 = vpop.permute.xlu1 %2299  ;;  %v2656_v9 = vsel %vm2625_vm8, %v2591_v13, %v9633_v6  ;;  %v3005_v13 = vld [vmem:[%s8377_s1 + $0x1b8] sm:$0xff] }
 0x5c8   :  { %v2915_v45 = vsel %vm2885_vm11, %v2850_v39, %v2300_v24  ;;  %v2721_v33 = vsel %vm2690_vm7, %v2656_v9, %v9635_v12  ;;  %v9638_v24 = vld [vmem:[#allocation8_spill] sm:$0xff] }
 0x5c9   :  { %v3043_v46 = vmul.f32 %v2979_v25, %v2915_v45  ;;  %v2786_v52 = vsel %vm2755_vm9, %v2721_v33, %v1921_v27  ;;  %v9637_v25 = vld [vmem:[#allocation58_spill] sm:$0xff] }
 0x5ca   :  { %v1778_v60 = vpop.permute.xlu0 %1777  ;;  %v2592_v27 = vsel %vm2560_vm6, %v2527_v29, %v9637_v25 }
 0x5cb   :  { %3906 = vmatmul.msk.f32.gmra.mxu1 %vm103_vm1, %v3043_v46  ;;  %v2657_v50 = vsel %vm2625_vm8, %v2592_v27, %v9638_v24  ;;  %v9639_v46 = vld [vmem:[#allocation405_spill] sm:$0xff] }
 0x5cc   :  { %v2722_v47 = vsel %vm2690_vm7, %v2657_v50, %v9639_v46  ;;  %v3006_v46 = vld [vmem:[%s8377_s1 + $0x1c0] sm:$0xff] }
 0x5cd   :  { %1984 = vrot.lane.b32.xlu2 %v900_v23, %s4065_s28  ;;  %2365 = vrot.lane.b32.xlu1 %v9617_v55, %s4066_s29 }
 0x5cf   :  { %v2163_v32 = vpop.permute.xlu2 %2162  ;;  %v2161_v62 = vpop.permute.xlu1 %2160 }
 0x5d0   :  { %v2875_v4 = vsel %vm2820_vm10, %v2810_v14, %v2161_v62  ;;  %v9641_v62 = vld [vmem:[#allocation242_spill] sm:$0xff] }
 0x5d1   :  { %v2940_v21 = vsel %vm2885_vm11, %v2875_v4, %v2350_v15  ;;  %v7895_v15 = vpop.f32.mrf.mxu2 }
 0x5d2   :  { %v1923_v11 = vpop.permute.xlu0 %1922  ;;  %v3068_v55 = vmul.f32 %v3004_v58, %v2940_v21 }
 0x5d3   :  { %v2787_v37 = vsel %vm2755_vm9, %v2722_v47, %v1923_v11  ;;  %v9643_v11 = vld [vmem:[#allocation387_spill] sm:$0xff] }
 0x5d4   :  { %3931 = vmatmul.msk.f32.gmra.mxu2 %vm103_vm1, %v3068_v55 }
 0x5d5   :  { %1793 = vrot.lane.b32.xlu2 %v7771_v43, %s4063_s20 }
 0x5d7   :  { %v2115_v7 = vpop.permute.xlu2 %2114  ;;  %v2113_v28 = vpop.permute.xlu1 %2112 }
 0x5d8   :  { %v2851_v43 = vsel %vm2820_vm10, %v2786_v52, %v2113_v28  ;;  %v3368_v36 = vpop.f32.mrf.mxu1  ;;  %v2852_v40 = vsel %vm2820_vm10, %v2787_v37, %v2115_v7  ;;  %v9645_v28 = vld [vmem:[#allocation261_spill] sm:$0xff] }
 0x5d9   :  { %v2916_v5 = vsel %vm2885_vm11, %v2851_v43, %v2302_v34  ;;  %v3369_v57 = vadd.f32 %v7781_v49, %v3368_v36  ;;  %v9640_v34 = vld [vmem:[#allocation248_spill] sm:$0xff]  ;;  %v7924_v3 = vpop.f32.mrf.mxu2  ;;  %v9646_v36 = vld [vmem:[#allocation347_spill] sm:$0xff]  ;;  %v3993_v37 = vld [vmem:[%s8376_s0 + $0xc8] sm:$0xff] }
 0x5da   :  { %v2304_v44 = vpop.permute.xlu0 %2303  ;;  %v3044_v39 = vmul.f32 %v2980_v18, %v2916_v5  ;;  %v2486_v2 = vsel %vm2430_vm4, %v9519_v59, %v9640_v34 }
 0x5db   :  { %v3514_v45 = vadd.f32 %v3991_v53, %v3369_v57  ;;  %v2917_v20 = vsel %vm2885_vm11, %v2852_v40, %v2304_v44  ;;  %v2551_v58 = vsel %vm2495_vm5, %v2486_v2, %v9641_v62  ;;  %v9647_v57 = vld [vmem:[#allocation389_spill] sm:$0xff] }
 0x5dc   :  { %3907 = vmatmul.msk.f32.gmra.mxu1 %vm103_vm1, %v3044_v39  ;;  %v2616_v4 = vsel %vm2560_vm6, %v2551_v58, %v9642_v26  ;;  %v3045_v55 = vmul.f32 %v2981_v1, %v2917_v20 }
 0x5dd   :  { %v3578_v23 = vmax.f32 %v3514_v45, 0.0  ;;  %v2681_v31 = vsel %vm2625_vm8, %v2616_v4, %v9643_v11  ;;  %v9650_v4 = vld [vmem:[#allocation9_spill] sm:$0xff] }
 0x5de   :  { %v2746_v8 = vsel %vm2690_vm7, %v2681_v31, %v1778_v60  ;;  %v9644_v60 = vld [vmem:[#allocation267_spill] sm:$0xff] }
 0x5df   :  { %v1973_v10 = vpop.permute.xlu2 %1972  ;;  %v3664_v22 = vsel %vm2430_vm4, %v3578_v23, 0.0  ;;  %v1971_v14 = vpop.permute.xlu1 %1970  ;;  %v2487_v7 = vsel %vm2430_vm4, %v9545_v19, %v9644_v60 }
 0x5e0   :  { %v3665_v59 = vadd.f32 %v3664_v22, %v7830_v17  ;;  %v2811_v0 = vsel %vm2755_vm9, %v2746_v8, %v1971_v14  ;;  %v2552_v43 = vsel %vm2495_vm5, %v2487_v7, %v9645_v28  ;;  %v9648_v22 = vld [vmem:[#allocation324_spill] sm:$0xff]  ;;  %v9649_v14 = vld [vmem:[#allocation318_spill] sm:$0xff] }
 0x5e1   :  { %v2876_v17 = vsel %vm2820_vm10, %v2811_v0, %v2163_v32  ;;  %v7938_v9 = vpop.f32.mrf.mxu2  ;;  %v3992_v32 = vld [vmem:[%s8376_s0 + $0xc0] sm:$0xff]  ;;  %v2617_v41 = vsel %vm2560_vm6, %v2552_v43, %v9646_v36  ;;  %v9652_v8 = vld [vmem:[#allocation26_spill] sm:$0xff]  ;;  %v9655_v43 = vld [vmem:[#allocation19_spill] sm:$0xff] }
 0x5e2   :  { %v2165_v21 = vpop.permute.xlu0 %2164  ;;  %v2682_v19 = vsel %vm2625_vm8, %v2617_v41, %v9647_v57  ;;  %v9656_v36 = vld [vmem:[#allocation395_spill] sm:$0xff]  ;;  %v3007_v57 = vld [vmem:[%s8377_s1 + $0x1c8] sm:$0xff] }
 0x5e4   :  { %3908 = vmatmul.msk.f32.gmra.mxu1 %vm103_vm1, %v3045_v55  ;;  %v9651_v55 = vld [vmem:[#allocation72_spill] sm:$0xff] }
 0x5e7   :  { %v2354_v56 = vpop.permute.xlu2 %2353  ;;  %v2352_v6 = vpop.permute.xlu1 %2351 }
 0x5e8   :  { %v2941_v42 = vsel %vm2885_vm11, %v2876_v17, %v2352_v6 }
 0x5e9   :  { %v3069_v30 = vmul.f32 %v3005_v13, %v2941_v42  ;;  %v3371_v12 = vpop.f32.mrf.mxu1  ;;  %v7955_v25 = vpop.f32.mrf.mxu2  ;;  %v2982_v13 = vld [vmem:[%s8377_s1 + $0x100] sm:$0xff]  ;;  %v9653_v42 = vld [vmem:[#allocation255_spill] sm:$0xff] }
 0x5ea   :  { %v2117_v33 = vpop.permute.xlu0 %2116  ;;  %v3372_v52 = vadd.f32 %v7781_v49, %v3371_v12 }
 0x5eb   :  { %3932 = vmatmul.msk.f32.gmra.mxu2 %vm103_vm1, %v3069_v30  ;;  %v2488_v30 = vsel %vm2430_vm4, %v9568_v51, %v9653_v42 }
 0x5ec   :  { %v3515_v18 = vadd.f32 %v3992_v32, %v3372_v52  ;;  %v9654_v32 = vld [vmem:[#allocation249_spill] sm:$0xff] }
 0x5ee   :  { %v3579_v29 = vmax.f32 %v3515_v18, 0.0  ;;  %v2553_v18 = vsel %vm2495_vm5, %v2488_v30, %v9654_v32  ;;  %v9664_v30 = vld [vmem:[#allocation392_spill] sm:$0xff] }
 0x5ef   :  { %v1782_v5 = vpop.permute.xlu2 %1781  ;;  %v1780_v44 = vpop.permute.xlu1 %1779 }
 0x5f0   :  { %v3666_v27 = vsel %vm2430_vm4, %v3579_v29, 0.0  ;;  %v2747_v39 = vsel %vm2690_vm7, %v2682_v19, %v1780_v44 }
 0x5f1   :  { %v3667_v24 = vadd.f32 %v3666_v27, %v3665_v59  ;;  %v2812_v50 = vsel %vm2755_vm9, %v2747_v39, %v1973_v10  ;;  %v3374_v53 = vpop.f32.mrf.mxu1  ;;  %v2463_v10 = vsel %vm2430_vm4, %v9553_v54, %v9648_v22  ;;  %v7975_v58 = vpop.f32.mrf.mxu2  ;;  %v9657_v39 = vld [vmem:[#allocation269_spill] sm:$0xff] }
 0x5f2   :  { %v1975_v45 = vpop.permute.xlu0 %1974  ;;  %v2877_v47 = vsel %vm2820_vm10, %v2812_v50, %v2165_v21  ;;  %v3375_v34 = vadd.f32 %v7781_v49, %v3374_v53  ;;  %v2528_v62 = vsel %vm2495_vm5, %v2463_v10, %v9649_v14  ;;  %v3008_v10 = vld [vmem:[%s8377_s1 + $0x1d0] sm:$0xff] }
 0x5f3   :  { %v2942_v2 = vsel %vm2885_vm11, %v2877_v47, %v2354_v56  ;;  %v2593_v21 = vsel %vm2560_vm6, %v2528_v62, %v9650_v4  ;;  %v9659_v47 = vld [vmem:[#allocation28_spill] sm:$0xff] }
 0x5f4   :  { %v3516_v23 = vadd.f32 %v3993_v37, %v3375_v34  ;;  %v3070_v40 = vmul.f32 %v3006_v46, %v2942_v2  ;;  %v2658_v54 = vsel %vm2625_vm8, %v2593_v21, %v9651_v55  ;;  %v9658_v46 = vld [vmem:[#allocation263_spill] sm:$0xff]  ;;  %v9660_v37 = vld [vmem:[#allocation390_spill] sm:$0xff] }
 0x5f5   :  { %v2723_v0 = vsel %vm2690_vm7, %v2658_v54, %v9652_v8  ;;  %v9662_v8 = vld [vmem:[#allocation283_spill] sm:$0xff] }
 0x5f6   :  { %v3580_v1 = vmax.f32 %v3516_v23, 0.0  ;;  %3933 = vmatmul.msk.f32.gmra.mxu2 %vm103_vm1, %v3070_v40 }
 0x5f7   :  { %v1925_v20 = vpop.permute.xlu1 %1924  ;;  %v2356_v26 = vpop.permute.xlu2 %2355 }
 0x5f8   :  { %v3668_v59 = vsel %vm2430_vm4, %v3580_v1, 0.0  ;;  %v2788_v56 = vsel %vm2755_vm9, %v2723_v0, %v1925_v20 }
 0x5f9   :  { %v3669_v11 = vadd.f32 %v3668_v59, %v3667_v24  ;;  %v2853_v17 = vsel %vm2820_vm10, %v2788_v56, %v2117_v33  ;;  %v7992_v12 = vpop.f32.mrf.mxu2  ;;  %v2618_v33 = vsel %vm2560_vm6, %v2553_v18, %v9655_v43  ;;  %v2489_v24 = vsel %vm2430_vm4, %v9564_v63, %v9657_v39 }
 0x5fa   :  { %v1784_v31 = vpop.permute.xlu0 %1783  ;;  %v2683_v41 = vsel %vm2625_vm8, %v2618_v33, %v9656_v36  ;;  %v9665_v36 = vld [vmem:[#allocation277_spill] sm:$0xff] }
 0x5fb   :  { %v2748_v51 = vsel %vm2690_vm7, %v2683_v41, %v1782_v5  ;;  %v2554_v5 = vsel %vm2495_vm5, %v2489_v24, %v9658_v46  ;;  %v2491_v41 = vsel %vm2430_vm4, %v9604_v35, %v9665_v36  ;;  %v9666_v24 = vld [vmem:[#allocation272_spill] sm:$0xff] }
 0x5fc   :  { %v2813_v29 = vsel %vm2755_vm9, %v2748_v51, %v1975_v45  ;;  %v2619_v34 = vsel %vm2560_vm6, %v2554_v5, %v9659_v47  ;;  %v3995_v35 = vld [vmem:[%s8376_s0 + $0xd8] sm:$0xff] }
 0x5fd   :  { %v2684_v23 = vsel %vm2625_vm8, %v2619_v34, %v9660_v37  ;;  %v9673_v36 = vld [vmem:[#allocation312_spill] sm:$0xff] }
 0x5fe   :  { %v2749_v40 = vsel %vm2690_vm7, %v2684_v23, %v1784_v31  ;;  %v3994_v31 = vld [vmem:[%s8376_s0 + $0xd0] sm:$0xff]  ;;  %v3010_v23 = vld [vmem:[%s8377_s1 + $0x1e0] sm:$0xff] }
 0x5ff   :  { %v2306_v6 = vpop.permute.xlu1 %2305  ;;  %v2169_v52 = vpop.permute.xlu2 %2168 }
 0x600   :  { %v2918_v60 = vsel %vm2885_vm11, %v2853_v17, %v2306_v6 }
 0x601   :  { %v3046_v7 = vmul.f32 %v2982_v13, %v2918_v60  ;;  %v8007_v44 = vpop.f32.mrf.mxu2  ;;  %v9663_v13 = vld [vmem:[#allocation349_spill] sm:$0xff] }
 0x602   :  { %v2358_v28 = vpop.permute.xlu0 %2357 }
 0x603   :  { %3909 = vmatmul.msk.f32.gmra.mxu1 %vm103_vm1, %v3046_v7 }
 0x607   :  { %v2167_v19 = vpop.permute.xlu1 %2166  ;;  %v1979_v45 = vpop.permute.xlu2 %1978 }
 0x608   :  { %v2878_v27 = vsel %vm2820_vm10, %v2813_v29, %v2167_v19 }
 0x609   :  { %v2943_v50 = vsel %vm2885_vm11, %v2878_v27, %v2356_v26  ;;  %v8022_v63 = vpop.f32.mrf.mxu2  ;;  %v9661_v26 = vld [vmem:[#allocation287_spill] sm:$0xff] }
 0x60a   :  { %v3071_v53 = vmul.f32 %v3007_v57, %v2943_v50  ;;  %v2171_v2 = vpop.permute.xlu0 %2170  ;;  %v2490_v4 = vsel %vm2430_vm4, %v9589_v48, %v9661_v26  ;;  %v2556_v50 = vsel %vm2495_vm5, %v2491_v41, %v9666_v24  ;;  %v2493_v41 = vsel %vm2430_vm4, %v9614_v16, %v9673_v36  ;;  %v9677_v16 = vld [vmem:[#allocation298_spill] sm:$0xff] }
 0x60b   :  { %v2555_v0 = vsel %vm2495_vm5, %v2490_v4, %v9662_v8 }
 0x60c   :  { %3934 = vmatmul.msk.f32.gmra.mxu2 %vm103_vm1, %v3071_v53  ;;  %v2620_v17 = vsel %vm2560_vm6, %v2555_v0, %v9663_v13  ;;  %v9667_v53 = vld [vmem:[#allocation31_spill] sm:$0xff]  ;;  %v3996_v0 = vld [vmem:[%s8376_s0 + $0xe0] sm:$0xff] }
 0x60d   :  { %v2685_v60 = vsel %vm2625_vm8, %v2620_v17, %v9664_v30  ;;  %v2621_v46 = vsel %vm2560_vm6, %v2556_v50, %v9667_v53  ;;  %v9672_v17 = vld [vmem:[#allocation393_spill] sm:$0xff]  ;;  %v9676_v53 = vld [vmem:[#allocation10_spill] sm:$0xff] }
 0x60f   :  { %v1977_v22 = vpop.permute.xlu1 %1976  ;;  %v1788_v56 = vpop.permute.xlu2 %1787 }
 0x610   :  { %v2814_v1 = vsel %vm2755_vm9, %v2749_v40, %v1977_v22  ;;  %v3377_v20 = vpop.f32.mrf.mxu1 }
 0x611   :  { %v2879_v14 = vsel %vm2820_vm10, %v2814_v1, %v2169_v52  ;;  %v3378_v62 = vadd.f32 %v7781_v49, %v3377_v20  ;;  %v8045_v7 = vpop.f32.mrf.mxu2  ;;  %v9669_v20 = vld [vmem:[#allocation289_spill] sm:$0xff] }
 0x612   :  { %v2944_v59 = vsel %vm2885_vm11, %v2879_v14, %v2358_v28  ;;  %v1981_v42 = vpop.permute.xlu0 %1980  ;;  %v3009_v28 = vld [vmem:[%s8377_s1 + $0x1d8] sm:$0xff]  ;;  %v2492_v14 = vsel %vm2430_vm4, %v9590_v61, %v9669_v20  ;;  %v9671_v61 = vld [vmem:[#allocation46_spill] sm:$0xff] }
 0x613   :  { %v3072_v21 = vmul.f32 %v3008_v10, %v2944_v59  ;;  %v3517_v55 = vadd.f32 %v3994_v31, %v3378_v62 }
 0x615   :  { %v3581_v54 = vmax.f32 %v3517_v55, 0.0  ;;  %3935 = vmatmul.msk.f32.gmra.mxu2 %vm103_vm1, %v3072_v21 }
 0x617   :  { %v3670_v6 = vsel %vm2430_vm4, %v3581_v54, 0.0  ;;  %v1786_v48 = vpop.permute.xlu1 %1785  ;;  %v2362_v29 = vpop.permute.xlu2 %2361  ;;  %v9670_v54 = vld [vmem:[#allocation285_spill] sm:$0xff] }
 0x618   :  { %v3671_v52 = vadd.f32 %v3670_v6, %v3669_v11  ;;  %v2750_v32 = vsel %vm2690_vm7, %v2685_v60, %v1786_v48  ;;  %v2557_v8 = vsel %vm2495_vm5, %v2492_v14, %v9670_v54  ;;  %v3013_v54 = vld [vmem:[%s8377_s1 + $0x1f8] sm:$0xff] }
 0x619   :  { %v2815_v18 = vsel %vm2755_vm9, %v2750_v32, %v1979_v45  ;;  %v8056_v51 = vpop.f32.mrf.mxu2  ;;  %v9668_v45 = vld [vmem:[#allocation14_spill] sm:$0xff]  ;;  %v2622_v13 = vsel %vm2560_vm6, %v2557_v8, %v9671_v61 }
 0x61a   :  { %v2880_v43 = vsel %vm2820_vm10, %v2815_v18, %v2171_v2  ;;  %v1790_v57 = vpop.permute.xlu0 %1789  ;;  %v2686_v47 = vsel %vm2625_vm8, %v2621_v46, %v9668_v45  ;;  %v2687_v6 = vsel %vm2625_vm8, %v2622_v13, %v9672_v17  ;;  %v3011_v32 = vld [vmem:[%s8377_s1 + $0x1e8] sm:$0xff]  ;;  %v2494_v45 = vsel %vm2430_vm4, %v9611_v38, %v9677_v16 }
 0x61b   :  { %v2751_v34 = vsel %vm2690_vm7, %v2686_v47, %v1788_v56  ;;  %v2752_v48 = vsel %vm2690_vm7, %v2687_v6, %v1790_v57  ;;  %v3997_v17 = vld [vmem:[%s8376_s0 + $0xe8] sm:$0xff] }
 0x61c   :  { %v2816_v37 = vsel %vm2755_vm9, %v2751_v34, %v1981_v42  ;;  %v9678_v34 = vld [vmem:[#allocation292_spill] sm:$0xff] }
 0x61f   :  { %v2360_v33 = vpop.permute.xlu1 %2359  ;;  %v2175_v4 = vpop.permute.xlu2 %2174 }
 0x620   :  { %v2945_v11 = vsel %vm2885_vm11, %v2880_v43, %v2360_v33 }
 0x621   :  { %v3073_v19 = vmul.f32 %v3009_v28, %v2945_v11  ;;  %v3380_v27 = vpop.f32.mrf.mxu1  ;;  %v8075_v22 = vpop.f32.mrf.mxu2 }
 0x622   :  { %v3381_v39 = vadd.f32 %v7781_v49, %v3380_v27  ;;  %v2364_v55 = vpop.permute.xlu0 %2363 }
 0x623   :  { %3936 = vmatmul.msk.f32.gmra.mxu2 %vm103_vm1, %v3073_v19  ;;  %v9674_v19 = vld [vmem:[#allocation305_spill] sm:$0xff] }
 0x624   :  { %v3518_v5 = vadd.f32 %v3995_v35, %v3381_v39  ;;  %v2558_v27 = vsel %vm2495_vm5, %v2493_v41, %v9674_v19  ;;  %v9675_v39 = vld [vmem:[#allocation351_spill] sm:$0xff] }
 0x625   :  { %v2623_v24 = vsel %vm2560_vm6, %v2558_v27, %v9675_v39 }
 0x626   :  { %v3582_v2 = vmax.f32 %v3518_v5, 0.0  ;;  %v2688_v46 = vsel %vm2625_vm8, %v2623_v24, %v9676_v53 }
 0x627   :  { %v2173_v40 = vpop.permute.xlu1 %2172  ;;  %v1985_v11 = vpop.permute.xlu2 %1984 }
 0x628   :  { %v3672_v10 = vsel %vm2430_vm4, %v3582_v2, 0.0  ;;  %v2881_v1 = vsel %vm2820_vm10, %v2816_v37, %v2173_v40  ;;  %v2559_v2 = vsel %vm2495_vm5, %v2494_v45, %v9678_v34  ;;  %v9679_v40 = vld [vmem:[#allocation353_spill] sm:$0xff]  ;;  %v3399_v45 = vadd.f32 %v7781_v49, %v7895_v15 }
 0x629   :  { %v3673_v62 = vadd.f32 %v3672_v10, %v3671_v52  ;;  %v2946_v59 = vsel %vm2885_vm11, %v2881_v1, %v2362_v29  ;;  %v3383_v26 = vpop.f32.mrf.mxu1  ;;  %v8095_v60 = vpop.f32.mrf.mxu2  ;;  %v2624_v10 = vsel %vm2560_vm6, %v2559_v2, %v9679_v40  ;;  %v4000_v34 = vld [vmem:[%s8376_s0 + $0x108] sm:$0xff]  ;;  %v3408_v15 = vadd.f32 %v7781_v49, %v7955_v25  ;;  %v4004_v25 = vld [vmem:[%s8376_s0 + $0x120] sm:$0xff] }
 0x62a   :  { %v3074_v21 = vmul.f32 %v3010_v23, %v2946_v59  ;;  %v3384_v31 = vadd.f32 %v7781_v49, %v3383_v26  ;;  %v2177_v57 = vpop.permute.xlu0 %2176  ;;  %v3012_v23 = vld [vmem:[%s8377_s1 + $0x1f0] sm:$0xff]  ;;  %v3524_v2 = vadd.f32 %v4000_v34, %v3399_v45  ;;  %v3429_v34 = vadd.f32 %v7781_v49, %v8075_v22  ;;  %v4011_v22 = vld [vmem:[%s8376_s0 + $0x158] sm:$0xff] }
 0x62c   :  { %v3519_v56 = vadd.f32 %v3996_v0, %v3384_v31  ;;  %3937 = vmatmul.msk.f32.gmra.mxu2 %vm103_vm1, %v3074_v21 }
 0x62e   :  { %v3583_v42 = vmax.f32 %v3519_v56, 0.0 }
 0x62f   :  { %v1983_v30 = vpop.permute.xlu1 %1982  ;;  %v1794_v37 = vpop.permute.xlu2 %1793 }
 0x630   :  { %v3674_v52 = vsel %vm2430_vm4, %v3583_v42, 0.0  ;;  %v2817_v18 = vsel %vm2755_vm9, %v2752_v48, %v1983_v30 }
 0x631   :  { %v3675_v28 = vadd.f32 %v3674_v52, %v3673_v62  ;;  %v2882_v43 = vsel %vm2820_vm10, %v2817_v18, %v2175_v4  ;;  %v8114_v35 = vpop.f32.mrf.mxu2  ;;  %v9680_v62 = vld [vmem:[#allocation20_spill] sm:$0xff] }
 0x632   :  { %v2947_v33 = vsel %vm2885_vm11, %v2882_v43, %v2364_v55  ;;  %v1987_v1 = vpop.permute.xlu0 %1986  ;;  %v2689_v38 = vsel %vm2625_vm8, %v2624_v10, %v9680_v62  ;;  %v4001_v10 = vld [vmem:[%s8376_s0 + $0x110] sm:$0xff] }
 0x633   :  { %v3075_v29 = vmul.f32 %v3011_v32, %v2947_v33  ;;  %v2754_v4 = vsel %vm2690_vm7, %v2689_v38, %v1794_v37  ;;  %v3998_v33 = vld [vmem:[%s8376_s0 + $0xf0] sm:$0xff]  ;;  %v3405_v37 = vadd.f32 %v7781_v49, %v7938_v9  ;;  %v3411_v9 = vadd.f32 %v7781_v49, %v7975_v58  ;;  %v4003_v38 = vld [vmem:[%s8376_s0 + $0x100] sm:$0xff]  ;;  %v4005_v58 = vld [vmem:[%s8376_s0 + $0x128] sm:$0xff] }
 0x634   :  { %v2819_v31 = vsel %vm2755_vm9, %v2754_v4, %v1987_v1 }
 0x635   :  { %3938 = vmatmul.msk.f32.gmra.mxu2 %vm103_vm1, %v3075_v29  ;;  %v2884_v55 = vsel %vm2820_vm10, %v2819_v31, %v2177_v57  ;;  %v3414_v31 = vadd.f32 %v7781_v49, %v7992_v12 }
 0x637   :  { %v1792_v50 = vpop.permute.xlu1 %1791 }
 0x638   :  { %v2753_v5 = vsel %vm2690_vm7, %v2688_v46, %v1792_v50 }
 0x639   :  { %v2818_v47 = vsel %vm2755_vm9, %v2753_v5, %v1985_v11  ;;  %v8131_v59 = vpop.f32.mrf.mxu2 }
 0x63a   :  { %v2883_v20 = vsel %vm2820_vm10, %v2818_v47, %v2177_v57  ;;  %v3402_v47 = vadd.f32 %v7781_v49, %v7924_v3 }
 0x63c   :  { %v3525_v1 = vadd.f32 %v4001_v10, %v3402_v47 }
 0x63e   :  { %v3589_v4 = vmax.f32 %v3525_v1, 0.0 }
 0x63f   :  { %v2366_v14 = vpop.permute.xlu1 %2365 }
 0x640   :  { %v2948_v26 = vsel %vm2885_vm11, %v2883_v20, %v2366_v14  ;;  %v2949_v8 = vsel %vm2885_vm11, %v2884_v55, %v2366_v14  ;;  %v3588_v20 = vmax.f32 %v3524_v2, 0.0  ;;  %v4002_v14 = vld [vmem:[%s8376_s0 + $0x118] sm:$0xff] }
 0x641   :  { %v3076_v21 = vmul.f32 %v3012_v23, %v2948_v26  ;;  %v8142_v0 = vpop.f32.mrf.mxu2  ;;  %v3077_v61 = vmul.f32 %v3013_v54, %v2949_v8  ;;  %v3526_v62 = vadd.f32 %v4002_v14, %v3405_v37 }
 0x642   :  { %v3689_v54 = vsel %vm2430_vm4, %v3588_v20, 0.0 }
 0x643   :  { %3939 = vmatmul.msk.f32.gmra.mxu2 %vm103_vm1, %v3076_v21  ;;  %v3527_v21 = vadd.f32 %v4004_v25, %v3408_v15  ;;  %v3590_v8 = vmax.f32 %v3526_v62, 0.0  ;;  %v3432_v15 = vadd.f32 %v7781_v49, %v8095_v60  ;;  %v3534_v62 = vadd.f32 %v4011_v22, %v3429_v34  ;;  %v4012_v60 = vld [vmem:[%s8376_s0 + $0x160] sm:$0xff] }
 0x645   :  { %v3591_v12 = vmax.f32 %v3527_v21, 0.0  ;;  %v3535_v25 = vadd.f32 %v4012_v60, %v3432_v15  ;;  %v3438_v21 = vadd.f32 %v7781_v49, %v8131_v59  ;;  %v4014_v59 = vld [vmem:[%s8376_s0 + $0x170] sm:$0xff]  ;;  %v4021_v60 = vld [vmem:[%s8376_s0 + $0x1a8] sm:$0xff] }
 0x648   :  { %v3386_v56 = vpop.f32.mrf.mxu1 }
 0x649   :  { %v3387_v13 = vadd.f32 %v7781_v49, %v3386_v56  ;;  %v8150_v30 = vpop.f32.mrf.mxu2  ;;  %v3528_v56 = vadd.f32 %v4005_v58, %v3411_v9  ;;  %v3435_v9 = vadd.f32 %v7781_v49, %v8114_v35  ;;  %v4013_v35 = vld [vmem:[%s8376_s0 + $0x168] sm:$0xff]  ;;  %v3441_v58 = vadd.f32 %v7781_v49, %v8142_v0  ;;  %v4015_v0 = vld [vmem:[%s8376_s0 + $0x178] sm:$0xff] }
 0x64b   :  { %v3520_v6 = vadd.f32 %v3997_v17, %v3387_v13  ;;  %3940 = vmatmul.msk.f32.gmra.mxu2 %vm103_vm1, %v3077_v61  ;;  %v3417_v61 = vadd.f32 %v7781_v49, %v8007_v44  ;;  %v3592_v44 = vmax.f32 %v3528_v56, 0.0 }
 0x64d   :  { %v3584_v42 = vmax.f32 %v3520_v6, 0.0 }
 0x64f   :  { %v3676_v48 = vsel %vm2430_vm4, %v3584_v42, 0.0  ;;  %v3691_v42 = vsel %vm2430_vm4, %v3589_v4, 0.0 }
 0x650   :  { %v3677_v52 = vadd.f32 %v3676_v48, %v3675_v28  ;;  %v3999_v28 = vld [vmem:[%s8376_s0 + $0xf8] sm:$0xff]  ;;  %v4006_v48 = vld [vmem:[%s8376_s0 + $0x130] sm:$0xff] }
 0x651   :  { %v8152_v32 = vpop.f32.mrf.mxu2 }
 0x659   :  { %v3389_v18 = vpop.f32.mrf.mxu1  ;;  %v8158_v29 = vpop.f32.mrf.mxu2 }
 0x65a   :  { %v3390_v43 = vadd.f32 %v7781_v49, %v3389_v18  ;;  %v3420_v18 = vadd.f32 %v7781_v49, %v8022_v63  ;;  %v4008_v63 = vld [vmem:[%s8376_s0 + $0x140] sm:$0xff] }
 0x65c   :  { %v3521_v36 = vadd.f32 %v3998_v33, %v3390_v43  ;;  %v3693_v33 = vsel %vm2430_vm4, %v3590_v8, 0.0  ;;  %v3536_v8 = vadd.f32 %v4013_v35, %v3435_v9 }
 0x65e   :  { %v3585_v41 = vmax.f32 %v3521_v36, 0.0  ;;  %v4007_v36 = vld [vmem:[%s8376_s0 + $0x138] sm:$0xff] }
 0x660   :  { %v3678_v11 = vsel %vm2430_vm4, %v3585_v41, 0.0  ;;  %v3530_v41 = vadd.f32 %v4007_v36, %v3417_v61 }
 0x661   :  { %v3679_v57 = vadd.f32 %v3678_v11, %v3677_v52  ;;  %v3392_v19 = vpop.f32.mrf.mxu1  ;;  %v8165_v50 = vpop.f32.mrf.mxu2  ;;  %v3529_v52 = vadd.f32 %v4006_v48, %v3414_v31  ;;  %v3423_v11 = vadd.f32 %v7781_v49, %v8045_v7  ;;  %v4009_v7 = vld [vmem:[%s8376_s0 + $0x148] sm:$0xff] }
 0x662   :  { %v3393_v27 = vadd.f32 %v7781_v49, %v3392_v19  ;;  %v3695_v19 = vsel %vm2430_vm4, %v3591_v12, 0.0  ;;  %v3594_v45 = vmax.f32 %v3530_v41, 0.0  ;;  %v3444_v12 = vadd.f32 %v7781_v49, %v8150_v30  ;;  %v4016_v30 = vld [vmem:[%s8376_s0 + $0x180] sm:$0xff] }
 0x663   :  { %v3532_v47 = vadd.f32 %v4009_v7, %v3423_v11 }
 0x664   :  { %v3522_v39 = vadd.f32 %v3999_v28, %v3393_v27  ;;  %v3593_v27 = vmax.f32 %v3529_v52, 0.0  ;;  %v3531_v28 = vadd.f32 %v4008_v63, %v3420_v18  ;;  %v3701_v20 = vsel %vm2430_vm4, %v3594_v45, 0.0 }
 0x665   :  { %v3596_v14 = vmax.f32 %v3532_v47, 0.0  ;;  %v3600_v18 = vmax.f32 %v3536_v8, 0.0  ;;  %v3539_v11 = vadd.f32 %v4016_v30, %v3444_v12 }
 0x666   :  { %v3586_v24 = vmax.f32 %v3522_v39, 0.0  ;;  %v3426_v39 = vadd.f32 %v7781_v49, %v8056_v51  ;;  %v3595_v10 = vmax.f32 %v3531_v28, 0.0  ;;  %v4010_v51 = vld [vmem:[%s8376_s0 + $0x150] sm:$0xff] }
 0x667   :  { %v3603_v45 = vmax.f32 %v3539_v11, 0.0 }
 0x668   :  { %v3680_v53 = vsel %vm2430_vm4, %v3586_v24, 0.0  ;;  %v3533_v1 = vadd.f32 %v4010_v51, %v3426_v39  ;;  %v3453_v39 = vadd.f32 %v7781_v49, %v8165_v50  ;;  %v4019_v50 = vld [vmem:[%s8376_s0 + $0x198] sm:$0xff] }
 0x669   :  { %v8168_v46 = vadd.f32 %v3680_v53, %v3679_v57  ;;  %v8170_v5 = vpop.f32.mrf.mxu2  ;;  %v3697_v53 = vsel %vm2430_vm4, %v3592_v44, 0.0  ;;  %v3719_v15 = vsel %vm2430_vm4, %v3603_v45, 0.0 }
 0x66a   :  { %v3597_v4 = vmax.f32 %v3533_v1, 0.0  ;;  %v3456_v47 = vadd.f32 %v7781_v49, %v8170_v5  ;;  %v3542_v51 = vadd.f32 %v4019_v50, %v3453_v39  ;;  %v4028_v50 = vld [vmem:[%s8376_s0 + $0x1e0] sm:$0xff] }
 0x66c   :  { %v3606_v9 = vmax.f32 %v3542_v51, 0.0 }
 0x671   :  { %v8172_v16 = vpop.f32.mrf.mxu2 }
 0x672   :  { %v3459_v5 = vadd.f32 %v7781_v49, %v8172_v16  ;;  %v3725_v16 = vsel %vm2430_vm4, %v3606_v9, 0.0 }
 0x679   :  { %v8183_v23 = vpop.f32.mrf.mxu2 }
 0x680   :  { %v3395_v40 = vpop.f32.mrf.mxu1 }
 0x681   :  { %v3396_v3 = vadd.f32 %v7781_v49, %v3395_v40  ;;  %v8211_v17 = vpop.f32.mrf.mxu2  ;;  %v3699_v40 = vsel %vm2430_vm4, %v3593_v27, 0.0  ;;  %v3713_v27 = vsel %vm2430_vm4, %v3600_v18, 0.0 }
 0x683   :  { %v3523_v26 = vadd.f32 %v4003_v38, %v3396_v3 }
 0x685   :  { %v3587_v55 = vmax.f32 %v3523_v26, 0.0  ;;  %v3703_v26 = vsel %vm2430_vm4, %v3595_v10, 0.0 }
 0x687   :  { %v3688_v13 = vsel %vm2430_vm4, %v3587_v55, 0.0  ;;  %v3705_v55 = vsel %vm2430_vm4, %v3596_v14, 0.0 }
 0x688   :  { %v3690_v6 = vadd.f32 %v3689_v54, %v3688_v13  ;;  %v3598_v54 = vmax.f32 %v3534_v62, 0.0  ;;  %v3707_v13 = vsel %vm2430_vm4, %v3597_v4, 0.0 }
 0x689   :  { %v8237_v2 = vpop.f32.mrf.mxu2 }
 0x68a   :  { %v3692_v43 = vadd.f32 %v3691_v42, %v3690_v6  ;;  %v3599_v6 = vmax.f32 %v3535_v25, 0.0  ;;  %v3537_v42 = vadd.f32 %v4014_v59, %v3438_v21  ;;  %v3709_v52 = vsel %vm2430_vm4, %v3598_v54, 0.0 }
 0x68b   :  { %v3544_v25 = vadd.f32 %v4021_v60, %v3459_v5  ;;  %v3462_v21 = vadd.f32 %v7781_v49, %v8183_v23 }
 0x68c   :  { %v3694_v57 = vadd.f32 %v3693_v33, %v3692_v43  ;;  %v3538_v43 = vadd.f32 %v4015_v0, %v3441_v58  ;;  %v3447_v33 = vadd.f32 %v7781_v49, %v8152_v32  ;;  %v3711_v36 = vsel %vm2430_vm4, %v3599_v6, 0.0  ;;  %v4017_v32 = vld [vmem:[%s8376_s0 + $0x188] sm:$0xff]  ;;  %v4022_v58 = vld [vmem:[%s8376_s0 + $0x1b0] sm:$0xff] }
 0x68d   :  { %v3601_v41 = vmax.f32 %v3537_v42, 0.0  ;;  %v3608_v8 = vmax.f32 %v3544_v25, 0.0  ;;  %v4023_v42 = vld [vmem:[%s8376_s0 + $0x1b8] sm:$0xff] }
 0x68e   :  { %v3696_v24 = vadd.f32 %v3695_v19, %v3694_v57  ;;  %v3450_v57 = vadd.f32 %v7781_v49, %v8158_v29  ;;  %v3602_v63 = vmax.f32 %v3538_v43, 0.0  ;;  %v3540_v28 = vadd.f32 %v4017_v32, %v3447_v33  ;;  %v4018_v29 = vld [vmem:[%s8376_s0 + $0x190] sm:$0xff] }
 0x68f   :  { %v3729_v59 = vsel %vm2430_vm4, %v3608_v8, 0.0  ;;  %v4026_v32 = vld [vmem:[%s8376_s0 + $0x1d0] sm:$0xff]  ;;  %v4031_v8 = vld [vmem:[%s8376_s0 + $0x1f8] sm:$0xff] }
 0x690   :  { %v3698_v37 = vadd.f32 %v3697_v53, %v3696_v24  ;;  %v3715_v53 = vsel %vm2430_vm4, %v3601_v41, 0.0  ;;  %v3541_v7 = vadd.f32 %v4018_v29, %v3450_v57  ;;  %v3604_v10 = vmax.f32 %v3540_v28, 0.0  ;;  %v4027_v29 = vld [vmem:[%s8376_s0 + $0x1d8] sm:$0xff] }
 0x691   :  { %v8263_v61 = vpop.f32.mrf.mxu2 }
 0x692   :  { %v3700_v3 = vadd.f32 %v3699_v40, %v3698_v37  ;;  %v3717_v40 = vsel %vm2430_vm4, %v3602_v63, 0.0  ;;  %v3721_v62 = vsel %vm2430_vm4, %v3604_v10, 0.0 }
 0x694   :  { %v3702_v38 = vadd.f32 %v3701_v20, %v3700_v3  ;;  %v3605_v3 = vmax.f32 %v3541_v7, 0.0  ;;  %v4020_v20 = vld [vmem:[%s8376_s0 + $0x1a0] sm:$0xff] }
 0x695   :  { %v3543_v14 = vadd.f32 %v4020_v20, %v3456_v47 }
 0x696   :  { %v3704_v31 = vadd.f32 %v3703_v26, %v3702_v38  ;;  %v3723_v26 = vsel %vm2430_vm4, %v3605_v3, 0.0  ;;  %v4029_v3 = vld [vmem:[%s8376_s0 + $0x1e8] sm:$0xff] }
 0x697   :  { %v3607_v4 = vmax.f32 %v3543_v14, 0.0 }
 0x698   :  { %v3706_v56 = vadd.f32 %v3705_v55, %v3704_v31 }
 0x699   :  { %v3473_v37 = vpop.f32.mrf.mxu2  ;;  %v3727_v35 = vsel %vm2430_vm4, %v3607_v4, 0.0  ;;  %v3682_v4 = vrot.slane %v8168_v46, 4 }
 0x69a   :  { %v3708_v48 = vadd.f32 %v3707_v13, %v3706_v56  ;;  %v3545_v56 = vadd.f32 %v4022_v58, %v3462_v21  ;;  %v3465_v13 = vadd.f32 %v7781_v49, %v8211_v17  ;;  %v4024_v17 = vld [vmem:[%s8376_s0 + $0x1c0] sm:$0xff]  ;;  %v3474_v57 = vadd.f32 %v7781_v49, %v3473_v37 }
 0x69c   :  { %v3710_v44 = vadd.f32 %v3709_v52, %v3708_v48  ;;  %v3609_v23 = vmax.f32 %v3545_v56, 0.0  ;;  %v3546_v12 = vadd.f32 %v4023_v42, %v3465_v13  ;;  %v3468_v48 = vadd.f32 %v7781_v49, %v8237_v2  ;;  %v4025_v2 = vld [vmem:[%s8376_s0 + $0x1c8] sm:$0xff] }
 0x69e   :  { %v3712_v19 = vadd.f32 %v3711_v36, %v3710_v44  ;;  %v3731_v0 = vsel %vm2430_vm4, %v3609_v23, 0.0  ;;  %v3610_v43 = vmax.f32 %v3546_v12, 0.0  ;;  %v3547_v33 = vadd.f32 %v4024_v17, %v3468_v48 }
 0x69f   :  { %v3471_v44 = vadd.f32 %v7781_v49, %v8263_v61  ;;  %v3549_v61 = vadd.f32 %v4026_v32, %v3474_v57 }
 0x6a0   :  { %v3714_v24 = vadd.f32 %v3713_v27, %v3712_v19  ;;  %v3733_v41 = vsel %vm2430_vm4, %v3610_v43, 0.0  ;;  %v3611_v30 = vmax.f32 %v3547_v33, 0.0 }
 0x6a1   :  { %v3548_v11 = vadd.f32 %v4025_v2, %v3471_v44  ;;  %v3613_v45 = vmax.f32 %v3549_v61, 0.0 }
 0x6a2   :  { %v3716_v34 = vadd.f32 %v3715_v53, %v3714_v24  ;;  %v3735_v27 = vsel %vm2430_vm4, %v3611_v30, 0.0 }
 0x6a3   :  { %v3612_v63 = vmax.f32 %v3548_v11, 0.0 }
 0x6a4   :  { %v3718_v1 = vadd.f32 %v3717_v40, %v3716_v34  ;;  %v3739_v40 = vsel %vm2430_vm4, %v3613_v45, 0.0 }
 0x6a5   :  { %v3737_v53 = vsel %vm2430_vm4, %v3612_v63, 0.0 }
 0x6a6   :  { %v3720_v22 = vadd.f32 %v3719_v15, %v3718_v1  ;;  %v3476_v55 = vpop.f32.mrf.mxu2 }
 0x6a7   :  { %v3477_v28 = vadd.f32 %v7781_v49, %v3476_v55 }
 0x6a8   :  { %v3722_v38 = vadd.f32 %v3721_v62, %v3720_v22  ;;  %v4030_v62 = vld [vmem:[%s8376_s0 + $0x1f0] sm:$0xff] }
 0x6a9   :  { %v3550_v7 = vadd.f32 %v4027_v29, %v3477_v28 }
 0x6aa   :  { %v3724_v31 = vadd.f32 %v3723_v26, %v3722_v38 }
 0x6ab   :  { %v3614_v10 = vmax.f32 %v3550_v7, 0.0 }
 0x6ac   :  { %v3726_v54 = vadd.f32 %v3725_v16, %v3724_v31 }
 0x6ad   :  { %v3741_v5 = vsel %vm2430_vm4, %v3614_v10, 0.0 }
 0x6ae   :  { %v3728_v6 = vadd.f32 %v3727_v35, %v3726_v54  ;;  %v3683_v54 = vadd.f32 %v3682_v4, %v8168_v46 }
 0x6af   :  { %v3479_v18 = vpop.f32.mrf.mxu2 }
 0x6b0   :  { %v3730_v52 = vadd.f32 %v3729_v59, %v3728_v6  ;;  %v3480_v47 = vadd.f32 %v7781_v49, %v3479_v18  ;;  %v3684_v6 = vrot.slane %v3683_v54, 2 }
 0x6b2   :  { %v3732_v36 = vadd.f32 %v3731_v0, %v3730_v52  ;;  %v3551_v51 = vadd.f32 %v4028_v50, %v3480_v47  ;;  %v3685_v12 = vadd.f32 %v3684_v6, %v3683_v54 }
 0x6b4   :  { %v3734_v19 = vadd.f32 %v3733_v41, %v3732_v36  ;;  %v3615_v22 = vmax.f32 %v3551_v51, 0.0  ;;  %v3965_v41 = vld [vmem:[%s8383_s7] ss:$0 sm:$0xff] }
 0x6b6   :  { %v3736_v39 = vadd.f32 %v3735_v27, %v3734_v19  ;;  %v3743_v60 = vsel %vm2430_vm4, %v3615_v22, 0.0 }
 0x6b8   :  { %v3482_v24 = vpop.f32.mrf.mxu2  ;;  %v3738_v34 = vadd.f32 %v3737_v53, %v3736_v39 }
 0x6b9   :  { %v3483_v37 = vadd.f32 %v7781_v49, %v3482_v24 }
 0x6ba   :  { %v3740_v1 = vadd.f32 %v3739_v40, %v3738_v34 }
 0x6bb   :  { %v3552_v20 = vadd.f32 %v4029_v3, %v3483_v37 }
 0x6bc   :  { %v3742_v38 = vadd.f32 %v3741_v5, %v3740_v1 }
 0x6bd   :  { %v3616_v26 = vmax.f32 %v3552_v20, 0.0 }
 0x6be   :  { %v3744_v21 = vadd.f32 %v3743_v60, %v3742_v38 }
 0x6bf   :  { %v3745_v55 = vsel %vm2430_vm4, %v3616_v26, 0.0 }
 0x6c0   :  { %v3746_v56 = vadd.f32 %v3745_v55, %v3744_v21 }
 0x6c6   :  { %v3485_v15 = vpop.f32.mrf.mxu2 }
 0x6c7   :  { %v3486_v14 = vadd.f32 %v7781_v49, %v3485_v15 }
 0x6c9   :  { %v3553_v9 = vadd.f32 %v4030_v62, %v3486_v14 }
 0x6cb   :  { %v3617_v25 = vmax.f32 %v3553_v9, 0.0 }
 0x6cd   :  { %v3747_v35 = vsel %vm2430_vm4, %v3617_v25, 0.0 }
 0x6ce   :  { %v3488_v31 = vpop.f32.mrf.mxu2  ;;  %v3748_v59 = vadd.f32 %v3747_v35, %v3746_v56 }
 0x6cf   :  { %v3489_v16 = vadd.f32 %v7781_v49, %v3488_v31  ;;  %v3686_v49 = vrot.slane %v3685_v12, 1 }
 0x6d1   :  { %v3554_v58 = vadd.f32 %v4031_v8, %v3489_v16  ;;  %v3687_v43 = vadd.f32 %v3686_v49, %v3685_v12 }
 0x6d3   :  { %v3618_v13 = vmax.f32 %v3554_v58, 0.0  ;;  %v3757_v33 = vmul.f32 0.00390625, %v3687_v43 }
 0x6d5   :  { %v3749_v23 = vsel %vm2430_vm4, %v3618_v13, 0.0 }
 0x6d6   :  { %v3750_v42 = vadd.f32 %v3749_v23, %v3748_v59 }
 0x6d8   :  { %v3751_v48 = vrot.slane %v3750_v42, 4 }
 0x6da   :  { %v3752_v52 = vadd.f32 %v3751_v48, %v3750_v42 }
 0x6dc   :  { %v3753_v18 = vrot.slane %v3752_v52, 2 }
 0x6de   :  { %v3754_v46 = vadd.f32 %v3753_v18, %v3752_v52 }
 0x6e0   :  { %v3755_v0 = vrot.slane %v3754_v46, 1 }
 0x6e2   :  { %v3756_v17 = vadd.f32 %v3755_v0, %v3754_v46 }
 0x6e4   :  { %v3758_v44 = vmul.f32 0.00390625, %v3756_v17 }
 0x6e6   :  { %v3767_v36 = vsel %vm3766_vm12, %v3758_v44, %v3757_v33 }
 0x6e7   :  { %3942 = vmatmul.msk.f32.vlgmr.msrb.gmra.mxu2 %vm2430_vm4, %v3767_v36 }
 0x76a   :  { %v3790_v30 = vpop.f32.mrf.mxu2 }
 0x76b   :  { %v3791_v2 = vadd.f32 %v3965_v41, %v3790_v30 }
 0x76d   :  { %3794 = vst.msk [vmem:[#allocation2] sm:$0x3] %vm3793_vm13, %v3791_v2 }
 0x76e   :  { %3805 = dma.vmem_to_hbm [thread:$0]  %s3801_s22, 32, %s3803_s6, [#allocation3]  }
 0x76f   :  { %4056 = dma.done.wait [#allocation3], 32  }
 0x770   :  { %4057 = vsyncadd [#allocation3], 4294967264 }
 0x771   :  { %3810 = vsyncpa [#allocation3], 1 }

</bundles_post_ra>
